<compile_context>
chip_gen: v7x
topology: tpu7x:2x2x1
jax: 0.10.0
libtpu: 0.0.40
codegen_flags: <defaults>
</compile_context>

<pallas_src>
import numpy as np
import jax
import jax.numpy as jnp
from jax.experimental import pallas as pl
from jax.experimental.pallas import tpu as pltpu

# ------------------------- small config ------------------------------------
BATCH = 2
SIGNAL_LEN = 256
PATCH = 16
IN_CHANS = 1                      # kernel assumes in_chans == 1 (module default)
EMBED = 64
DEPTH = 2
HEADS = 4
MLP_RATIO = 4
NUM_PATCHES = SIGNAL_LEN // PATCH     # 16 tokens
HEAD_DIM = EMBED // HEADS             # 16
HIDDEN = MLP_RATIO * EMBED            # 256
HALF = PATCH // 2                     # == (signal_length//2) // num_patches
M = NUM_PATCHES * HALF                # signal_length // 2 == 128
MASK_RATIO = 0.5
LN_EPS = 1e-5
HW = 3 * HEAD_DIM                     # per-head [q|k|v] column width (48)


# ------------------------- kernel -------------------------------------------
def _layer_norm(x, g, b):
    mu = jnp.mean(x, axis=-1, keepdims=True)
    var = jnp.mean((x - mu) ** 2, axis=-1, keepdims=True)
    return (x - mu) * jax.lax.rsqrt(var + LN_EPS) * g + b


def neuro2vec_kernel(xp_ref, xsig_ref, mask_ref, pos_ref, wp_ref, mtok_ref,
                     ln1g_ref, ln1b_ref, wqkv_ref, bqkv_ref, wo_ref, bo_ref,
                     ln2g_ref, ln2b_ref, w1_ref, b1_ref, w2_ref, b2_ref,
                     wfold_ref, bfold_ref,
                     fp_ref, xn_ref):
    n = xp_ref.shape[0]
    nt = n * NUM_PATCHES

    # ---- per-sample normalization (torch mean / unbiased std over L) --------
    # lane-dense view (n, L): normalized signal == fourier-loss target.
    xs = xsig_ref[...]
    mu2 = jnp.sum(xs, axis=1, keepdims=True) * (1.0 / SIGNAL_LEN)
    d2 = xs - mu2
    var2 = jnp.sum(d2 * d2, axis=1, keepdims=True) * (1.0 / (SIGNAL_LEN - 1))
    xn_ref[...] = d2 * jax.lax.rsqrt(var2)

    # Patch-major view (n, T, P): stats are recomputed (identical values).
    # Reusing mu2/var2 would need a rank-changing (n,1)->(n,1,1) relayout of
    # the stats; the recompute is ~6 VPU ops on 512 elements (noise).
    xp = xp_ref[...]
    rs = jnp.sum(xp, axis=2, keepdims=True)
    mu = jnp.sum(rs, axis=1, keepdims=True) * (1.0 / SIGNAL_LEN)
    d = xp - mu
    ss = jnp.sum(d * d, axis=2, keepdims=True)
    var = jnp.sum(ss, axis=1, keepdims=True) * (1.0 / (SIGNAL_LEN - 1))
    xpn = d * jax.lax.rsqrt(var)                                   # (n, T, P)

    # ---- patch embedding: Conv1d(k=stride=P, no bias) == per-patch matmul ---
    emb = jnp.dot(xpn.reshape(nt, PATCH), wp_ref[...],
                  preferred_element_type=jnp.float32)              # (n*T, D)

    # masked tokens -> mask_token; add frozen sin-cos pos embed (broadcast
    # in-kernel: mask is (n*T, 1), pos is (1, T, D) -- no HBM slabs).
    x = jnp.where(mask_ref[...] > 0.5, mtok_ref[...], emb)         # (n*T, D)
    x = (x.reshape(n, NUM_PATCHES, EMBED) + pos_ref[...]).reshape(nt, EMBED)

    # ---- transformer encoder (pre-norm), batch folded into token axis -------
    for l in range(DEPTH):
        h = _layer_norm(x, ln1g_ref[l], ln1b_ref[l])
        # wqkv columns are head-major [q_h|k_h|v_h]; 1/sqrt(hd) folded into Q.
        qkv = jnp.dot(h, wqkv_ref[l],
                      preferred_element_type=jnp.float32) + bqkv_ref[l]
        qkv3 = qkv.reshape(n, NUM_PATCHES, 3 * EMBED)
        qkv_hb = jnp.concatenate(
            [qkv3[:, :, hh * HW:(hh + 1) * HW] for hh in range(HEADS)],
            axis=0)                                                # (H*n, T, 3*hd)
        q = qkv_hb[:, :, 0:HEAD_DIM]
        k = qkv_hb[:, :, HEAD_DIM:2 * HEAD_DIM]
        v = qkv_hb[:, :, 2 * HEAD_DIM:3 * HEAD_DIM]
        s = jnp.einsum('bqd,bkd->bqk', q, k,
                       preferred_element_type=jnp.float32)         # scale pre-folded
        s = s - jnp.max(s, axis=-1, keepdims=True)
        e = jnp.exp(s)
        p = e / jnp.sum(e, axis=-1, keepdims=True)                 # exact softmax
        o = jnp.einsum('bqk,bkd->bqd', p, v,
                       preferred_element_type=jnp.float32)         # (H*n, T, hd)
        attn = jnp.concatenate([o[hh * n:(hh + 1) * n] for hh in range(HEADS)],
                               axis=-1).reshape(nt, EMBED)         # (n*T, D)
        x = x + jnp.dot(attn, wo_ref[l],
                        preferred_element_type=jnp.float32) + bo_ref[l]

        h2 = _layer_norm(x, ln2g_ref[l], ln2b_ref[l])
        mlp = jnp.dot(h2, w1_ref[l], preferred_element_type=jnp.float32) + b1_ref[l]
        # Reference Transformer is unspecified; tanh-GELU used (see header).
        mlp = jax.nn.gelu(mlp, approximate=True)
        x = x + jnp.dot(mlp, w2_ref[l],
                        preferred_element_type=jnp.float32) + b2_ref[l]

    # ---- fused amp/phase heads + real ifft: ONE K = T*D matmul --------------
    # widen x to (n, T*D) via lane concats (pairs first -> 128-aligned pieces).
    x3 = x.reshape(n, NUM_PATCHES, EMBED)
    pairs = [jnp.concatenate([x3[:, 2 * t, :], x3[:, 2 * t + 1, :]], axis=-1)
             for t in range(NUM_PATCHES // 2)]
    xwide = jnp.concatenate(pairs, axis=-1)                        # (n, T*D)
    fp_ref[...] = (jnp.dot(xwide, wfold_ref[...],
                           preferred_element_type=jnp.float32)
                   + bfold_ref[...])                               # (n, 2M)


# ------------------------- glue / wrapper -----------------------------------
def get_1d_sincos_pos_embed(embed_dim, length):
    pos = np.arange(length, dtype=np.float64)
    omega = np.arange(embed_dim // 2, dtype=np.float64) / (embed_dim / 2.0)
    omega = 1.0 / 10000 ** omega
    out = np.einsum('m,d->md', pos, omega)
    emb = np.concatenate([np.sin(out), np.cos(out)], axis=1)
    return emb.astype(np.float32)


def build_fourier_tensor():
    """(T, 2*HALF, 2M) constant: real part of the unnormalized inverse DFT of
    concat(l_fourier, r_fourier), rearranged per-token to match the
    [amp_t | phs_t] head output."""
    n_fft = 2 * M
    k = np.arange(n_fft)[:, None].astype(np.float64)
    s = np.arange(n_fft)[None, :].astype(np.float64)
    theta = 2.0 * np.pi * k * s / n_fft
    cfull, sfull = np.cos(theta), np.sin(theta)
    a_map = np.zeros((n_fft, M))
    b_map = np.zeros((n_fft, M))
    a_map[:M, :] = np.eye(M)
    b_map[:M, :] = np.eye(M)
    a_map[M, 0] = 1.0
    b_map[M, 0] = -1.0
    for j in range(1, M):
        a_map[M + j, M - j] = 1.0
        b_map[M + j, M - j] = -1.0
    cm = a_map.T @ cfull            # (M, 2M) amplitude coefficients
    sm = -(b_map.T @ sfull)         # (M, 2M) phase coefficients
    cm3 = cm.reshape(NUM_PATCHES, HALF, n_fft)
    sm3 = sm.reshape(NUM_PATCHES, HALF, n_fft)
    f3 = np.concatenate([cm3, sm3], axis=1).astype(np.float32)  # (T, 2H, 2M)
    return jnp.asarray(f3)


def random_masking_mask(key, n, length, mask_ratio):
    # exact torch random_masking mask semantics
    len_keep = int(length * (1 - mask_ratio))
    noise = jax.random.uniform(key, (n, length))
    ids_shuffle = jnp.argsort(noise, axis=1)
    ids_restore = jnp.argsort(ids_shuffle, axis=1)
    mask = jnp.ones((n, length), jnp.float32)
    mask = mask.at[:, :len_keep].set(0.0)
    mask = jnp.take_along_axis(mask, ids_restore, axis=1)
    return mask


def init_params(key):
    ks = jax.random.split(key, 8)
    s = 0.02
    return {
        # conv weight (D, 1, P) pre-transposed to (P, D)
        'wp': jax.random.normal(ks[0], (PATCH, EMBED), jnp.float32) * s,
        'pos': jnp.asarray(get_1d_sincos_pos_embed(EMBED, NUM_PATCHES)),
        'mask_token': jnp.zeros((1, EMBED), jnp.float32),        # matches __init__
        'ln1_g': jnp.ones((DEPTH, 1, EMBED), jnp.float32),
        'ln1_b': jnp.zeros((DEPTH, 1, EMBED), jnp.float32),
        'ln2_g': jnp.ones((DEPTH, 1, EMBED), jnp.float32),
        'ln2_b': jnp.zeros((DEPTH, 1, EMBED), jnp.float32),
        'wqkv': jax.random.normal(ks[1], (DEPTH, EMBED, 3 * EMBED), jnp.float32) * s,
        'bqkv': jnp.zeros((DEPTH, 1, 3 * EMBED), jnp.float32),
        'wo': jax.random.normal(ks[2], (DEPTH, EMBED, EMBED), jnp.float32) * s,
        'bo': jnp.zeros((DEPTH, 1, EMBED), jnp.float32),
        'w1': jax.random.normal(ks[3], (DEPTH, EMBED, HIDDEN), jnp.float32) * s,
        'b1': jnp.zeros((DEPTH, 1, HIDDEN), jnp.float32),
        'w2': jax.random.normal(ks[4], (DEPTH, HIDDEN, EMBED), jnp.float32) * s,
        'b2': jnp.zeros((DEPTH, 1, EMBED), jnp.float32),
        'wa': jax.random.normal(ks[5], (EMBED, HALF), jnp.float32) * s,
        'ba': jnp.zeros((1, HALF), jnp.float32),
        'wph': jax.random.normal(ks[6], (EMBED, HALF), jnp.float32) * s,
        'bph': jnp.zeros((1, HALF), jnp.float32),
    }


# static column permutation: [Q|K|V]-major -> head-major [q_h|k_h|v_h]
_HEAD_MAJOR_PERM = np.concatenate([
    np.concatenate([w * EMBED + h * HEAD_DIM + np.arange(HEAD_DIM)
                    for w in range(3)])
    for h in range(HEADS)])


def _prep_qkv(wqkv, bqkv):
    """Fold 1/sqrt(head_dim) into the Q columns and permute qkv columns to
    head-major order so the kernel slices one contiguous block per head."""
    scale = np.ones((3 * EMBED,), np.float32)
    scale[:EMBED] = 1.0 / np.sqrt(HEAD_DIM)
    scale = jnp.asarray(scale)
    w = (wqkv * scale)[..., _HEAD_MAJOR_PERM]
    b = (bqkv * scale)[..., _HEAD_MAJOR_PERM]
    return w, b


@jax.jit
def neuro2vec_forward(inputs, params, mask, f3):
    # inputs: (N, 1, L) float32 (PyTorch NCL); mask: (N, num_patches)
    n = inputs.shape[0]
    xp3 = inputs.reshape(n, NUM_PATCHES, PATCH)
    xsig = inputs.reshape(n, SIGNAL_LEN)
    mask_col = mask.reshape(n * NUM_PATCHES, 1).astype(jnp.float32)
    pos3 = params['pos'].reshape(1, NUM_PATCHES, EMBED)
    wqkv_p, bqkv_p = _prep_qkv(params['wqkv'], params['bqkv'])

    # fold amp/phase heads into the inverse-DFT constant: fp = xwide@Wfold + b
    wap = jnp.concatenate([params['wa'], params['wph']], axis=1)     # (D, 2H)
    bap = jnp.concatenate([params['ba'], params['bph']], axis=1)     # (1, 2H)
    wfold = jnp.einsum('dh,thm->tdm', wap, f3).reshape(
        NUM_PATCHES * EMBED, 2 * M)                                  # (T*D, 2M)
    bfold = jnp.einsum('h,thm->m', bap[0], f3).reshape(1, 2 * M)

    args = (xp3, xsig, mask_col, pos3, params['wp'], params['mask_token'],
            params['ln1_g'], params['ln1_b'], wqkv_p, bqkv_p,
            params['wo'], params['bo'], params['ln2_g'], params['ln2_b'],
            params['w1'], params['b1'], params['w2'], params['b2'],
            wfold, bfold)

    vmem = pl.BlockSpec(memory_space=pltpu.MemorySpace.VMEM)
    fp, xn = pl.pallas_call(
        neuro2vec_kernel,
        out_shape=(jax.ShapeDtypeStruct((n, SIGNAL_LEN), jnp.float32),
                   jax.ShapeDtypeStruct((n, SIGNAL_LEN), jnp.float32)),
        in_specs=[vmem] * len(args),
        out_specs=(vmem, vmem),
    )(*args)

    # fourier_loss = ((fourier_pred - target) ** 2).mean()  -- trivial, in XLA.
    loss = jnp.mean((fp - xn) ** 2)
    return loss, fp, mask


# ------------------------- main ----------------------------------------------
if __name__ == "__main__":
    key = jax.random.PRNGKey(0)
    k_in, k_par, k_mask = jax.random.split(key, 3)

    inputs = jax.random.normal(k_in, (BATCH, IN_CHANS, SIGNAL_LEN), jnp.float32)
    params = init_params(k_par)
    mask = random_masking_mask(k_mask, BATCH, NUM_PATCHES, MASK_RATIO)
    f3 = build_fourier_tensor()

    loss, fourier_pred, mask_out = neuro2vec_forward(inputs, params, mask, f3)
    loss, fourier_pred, mask_out = jax.block_until_ready(
        (loss, fourier_pred, mask_out))

    assert fourier_pred.shape == (BATCH, SIGNAL_LEN)
    assert mask_out.shape == (BATCH, NUM_PATCHES)
    assert bool(jnp.isfinite(loss))
    print("KERNEL_OK")
</pallas_src>

<mosaic_0001>
module attributes {stable_mosaic.version = 11 : i64} {
  func.func @neuro2vec_kernel(%arg0: memref<2x16x16xf32, #tpu.memory_space<vmem>>, %arg1: memref<2x256xf32, #tpu.memory_space<vmem>>, %arg2: memref<32x1xf32, #tpu.memory_space<vmem>>, %arg3: memref<1x16x64xf32, #tpu.memory_space<vmem>>, %arg4: memref<16x64xf32, #tpu.memory_space<vmem>>, %arg5: memref<1x64xf32, #tpu.memory_space<vmem>>, %arg6: memref<2x1x64xf32, #tpu.memory_space<vmem>>, %arg7: memref<2x1x64xf32, #tpu.memory_space<vmem>>, %arg8: memref<2x64x192xf32, #tpu.memory_space<vmem>>, %arg9: memref<2x1x192xf32, #tpu.memory_space<vmem>>, %arg10: memref<2x64x64xf32, #tpu.memory_space<vmem>>, %arg11: memref<2x1x64xf32, #tpu.memory_space<vmem>>, %arg12: memref<2x1x64xf32, #tpu.memory_space<vmem>>, %arg13: memref<2x1x64xf32, #tpu.memory_space<vmem>>, %arg14: memref<2x64x256xf32, #tpu.memory_space<vmem>>, %arg15: memref<2x1x256xf32, #tpu.memory_space<vmem>>, %arg16: memref<2x256x64xf32, #tpu.memory_space<vmem>>, %arg17: memref<2x1x64xf32, #tpu.memory_space<vmem>>, %arg18: memref<1024x256xf32, #tpu.memory_space<vmem>>, %arg19: memref<1x256xf32, #tpu.memory_space<vmem>>, %arg20: memref<2x256xf32, #tpu.memory_space<vmem>>, %arg21: memref<2x256xf32, #tpu.memory_space<vmem>>) attributes {dimension_semantics = [], scalar_prefetch = 0 : i64, scratch_operands = 0 : i64, tpu.core_type = #tpu.core_type<tc>} {
    %c0 = arith.constant 0 : index
    %c0_0 = arith.constant 0 : index
    %0 = vector.load %arg1[%c0, %c0_0] : memref<2x256xf32, #tpu.memory_space<vmem>>, vector<2x256xf32>
    %cst = arith.constant dense<0.000000e+00> : vector<2xf32>
    %1 = vector.multi_reduction <add>, %0, %cst [1] : vector<2x256xf32> to vector<2xf32>
    %2 = vector.shape_cast %1 : vector<2xf32> to vector<2x1xf32>
    %cst_1 = arith.constant 3.906250e-03 : f32
    %3 = vector.broadcast %cst_1 : f32 to vector<2x1xf32>
    %4 = arith.mulf %2, %3 : vector<2x1xf32>
    %5 = vector.broadcast %4 : vector<2x1xf32> to vector<2x256xf32>
    %6 = arith.subf %0, %5 : vector<2x256xf32>
    %7 = arith.mulf %6, %6 : vector<2x256xf32>
    %cst_2 = arith.constant dense<0.000000e+00> : vector<2xf32>
    %8 = vector.multi_reduction <add>, %7, %cst_2 [1] : vector<2x256xf32> to vector<2xf32>
    %9 = vector.shape_cast %8 : vector<2xf32> to vector<2x1xf32>
    %cst_3 = arith.constant 0.00392156886 : f32
    %10 = vector.broadcast %cst_3 : f32 to vector<2x1xf32>
    %11 = arith.mulf %9, %10 : vector<2x1xf32>
    %12 = math.rsqrt %11 : vector<2x1xf32>
    %13 = vector.broadcast %12 : vector<2x1xf32> to vector<2x256xf32>
    %14 = arith.mulf %6, %13 : vector<2x256xf32>
    %c0_4 = arith.constant 0 : index
    %c0_5 = arith.constant 0 : index
    %15 = vector.load %arg21[%c0_4, %c0_5] : memref<2x256xf32, #tpu.memory_space<vmem>>, vector<2x256xf32>
    tpu.vector_store %arg21[%c0_4, %c0_5], %14 {strides = array<i32>} : memref<2x256xf32, #tpu.memory_space<vmem>>, vector<2x256xf32>,
    %c0_6 = arith.constant 0 : index
    %c0_7 = arith.constant 0 : index
    %c0_8 = arith.constant 0 : index
    %16 = vector.load %arg0[%c0_6, %c0_7, %c0_8] : memref<2x16x16xf32, #tpu.memory_space<vmem>>, vector<2x16x16xf32>
    %cst_9 = arith.constant dense<0.000000e+00> : vector<2x16xf32>
    %17 = vector.multi_reduction <add>, %16, %cst_9 [2] : vector<2x16x16xf32> to vector<2x16xf32>
    %18 = vector.shape_cast %17 : vector<2x16xf32> to vector<2x16x1xf32>
    %cst_10 = arith.constant dense<0.000000e+00> : vector<2x1xf32>
    %19 = vector.multi_reduction <add>, %18, %cst_10 [1] : vector<2x16x1xf32> to vector<2x1xf32>
    %20 = vector.shape_cast %19 : vector<2x1xf32> to vector<2x1x1xf32>
    %cst_11 = arith.constant 3.906250e-03 : f32
    %21 = vector.broadcast %cst_11 : f32 to vector<2x1x1xf32>
    %22 = arith.mulf %20, %21 : vector<2x1x1xf32>
    %23 = vector.broadcast %22 : vector<2x1x1xf32> to vector<2x16x16xf32>
    %24 = arith.subf %16, %23 : vector<2x16x16xf32>
    %25 = arith.mulf %24, %24 : vector<2x16x16xf32>
    %cst_12 = arith.constant dense<0.000000e+00> : vector<2x16xf32>
    %26 = vector.multi_reduction <add>, %25, %cst_12 [2] : vector<2x16x16xf32> to vector<2x16xf32>
    %27 = vector.shape_cast %26 : vector<2x16xf32> to vector<2x16x1xf32>
    %cst_13 = arith.constant dense<0.000000e+00> : vector<2x1xf32>
    %28 = vector.multi_reduction <add>, %27, %cst_13 [1] : vector<2x16x1xf32> to vector<2x1xf32>
    %29 = vector.shape_cast %28 : vector<2x1xf32> to vector<2x1x1xf32>
    %cst_14 = arith.constant 0.00392156886 : f32
    %30 = vector.broadcast %cst_14 : f32 to vector<2x1x1xf32>
    %31 = arith.mulf %29, %30 : vector<2x1x1xf32>
    %32 = math.rsqrt %31 : vector<2x1x1xf32>
    %33 = vector.broadcast %32 : vector<2x1x1xf32> to vector<2x16x16xf32>
    %34 = arith.mulf %24, %33 : vector<2x16x16xf32>
    %35 = vector.shape_cast %34 : vector<2x16x16xf32> to vector<32x16xf32>
    %c0_15 = arith.constant 0 : index
    %c0_16 = arith.constant 0 : index
    %36 = vector.load %arg4[%c0_15, %c0_16] : memref<16x64xf32, #tpu.memory_space<vmem>>, vector<16x64xf32>
    %cst_17 = arith.constant dense<0.000000e+00> : vector<32x64xf32>
    %37 = tpu.matmul %35, %36, %cst_17 {dimension_numbers = #tpu.dot_dimension_numbers<[1], [0], [0], [1], [0, 0, 1, 1], [], []>} : vector<32x16xf32>, vector<16x64xf32>, vector<32x64xf32> -> vector<32x64xf32>
    %c0_18 = arith.constant 0 : index
    %c0_19 = arith.constant 0 : index
    %38 = vector.load %arg2[%c0_18, %c0_19] : memref<32x1xf32, #tpu.memory_space<vmem>>, vector<32x1xf32>
    %cst_20 = arith.constant 5.000000e-01 : f32
    %39 = vector.broadcast %cst_20 : f32 to vector<32x1xf32>
    %40 = arith.cmpf ogt, %38, %39 : vector<32x1xf32>
    %c0_21 = arith.constant 0 : index
    %c0_22 = arith.constant 0 : index
    %41 = vector.load %arg5[%c0_21, %c0_22] : memref<1x64xf32, #tpu.memory_space<vmem>>, vector<1x64xf32>
    %42 = vector.shape_cast %40 : vector<32x1xi1> to vector<32x1xi1>
    %43 = vector.broadcast %42 : vector<32x1xi1> to vector<32x64xi1>
    %44 = vector.shape_cast %41 : vector<1x64xf32> to vector<1x64xf32>
    %45 = vector.broadcast %44 : vector<1x64xf32> to vector<32x64xf32>
    %46 = arith.select %43, %45, %37 : vector<32x64xi1>, vector<32x64xf32>
    %47 = vector.shape_cast %46 : vector<32x64xf32> to vector<2x16x64xf32>
    %c0_23 = arith.constant 0 : index
    %c0_24 = arith.constant 0 : index
    %c0_25 = arith.constant 0 : index
    %48 = vector.load %arg3[%c0_23, %c0_24, %c0_25] : memref<1x16x64xf32, #tpu.memory_space<vmem>>, vector<1x16x64xf32>
    %49 = vector.broadcast %48 : vector<1x16x64xf32> to vector<2x16x64xf32>
    %50 = arith.addf %47, %49 : vector<2x16x64xf32>
    %51 = vector.shape_cast %50 : vector<2x16x64xf32> to vector<32x64xf32>
    %c0_26 = arith.constant 0 : index
    %c0_27 = arith.constant 0 : index
    %c0_28 = arith.constant 0 : index
    %52 = vector.load %arg6[%c0_26, %c0_27, %c0_28] : memref<2x1x64xf32, #tpu.memory_space<vmem>>, vector<1x1x64xf32>
    %53 = vector.shape_cast %52 : vector<1x1x64xf32> to vector<1x64xf32>
    %c0_29 = arith.constant 0 : index
    %c0_30 = arith.constant 0 : index
    %c0_31 = arith.constant 0 : index
    %54 = vector.load %arg7[%c0_29, %c0_30, %c0_31] : memref<2x1x64xf32, #tpu.memory_space<vmem>>, vector<1x1x64xf32>
    %55 = vector.shape_cast %54 : vector<1x1x64xf32> to vector<1x64xf32>
    %cst_32 = arith.constant dense<0.000000e+00> : vector<32xf32>
    %56 = vector.multi_reduction <add>, %51, %cst_32 [1] : vector<32x64xf32> to vector<32xf32>
    %57 = vector.shape_cast %56 : vector<32xf32> to vector<32x1xf32>
    %cst_33 = arith.constant 6.400000e+01 : f32
    %58 = vector.broadcast %cst_33 : f32 to vector<32x1xf32>
    %59 = arith.divf %57, %58 : vector<32x1xf32>
    %60 = vector.broadcast %59 : vector<32x1xf32> to vector<32x64xf32>
    %61 = arith.subf %51, %60 : vector<32x64xf32>
    %62 = arith.mulf %61, %61 : vector<32x64xf32>
    %cst_34 = arith.constant dense<0.000000e+00> : vector<32xf32>
    %63 = vector.multi_reduction <add>, %62, %cst_34 [1] : vector<32x64xf32> to vector<32xf32>
    %64 = vector.shape_cast %63 : vector<32xf32> to vector<32x1xf32>
    %cst_35 = arith.constant 6.400000e+01 : f32
    %65 = vector.broadcast %cst_35 : f32 to vector<32x1xf32>
    %66 = arith.divf %64, %65 : vector<32x1xf32>
    %67 = vector.broadcast %59 : vector<32x1xf32> to vector<32x64xf32>
    %68 = arith.subf %51, %67 : vector<32x64xf32>
    %cst_36 = arith.constant 9.99999974E-6 : f32
    %69 = vector.broadcast %cst_36 : f32 to vector<32x1xf32>
    %70 = arith.addf %66, %69 : vector<32x1xf32>
    %71 = math.rsqrt %70 : vector<32x1xf32>
    %72 = vector.broadcast %71 : vector<32x1xf32> to vector<32x64xf32>
    %73 = arith.mulf %68, %72 : vector<32x64xf32>
    %74 = vector.broadcast %53 : vector<1x64xf32> to vector<32x64xf32>
    %75 = arith.mulf %73, %74 : vector<32x64xf32>
    %76 = vector.broadcast %55 : vector<1x64xf32> to vector<32x64xf32>
    %77 = arith.addf %75, %76 : vector<32x64xf32>
    %c0_37 = arith.constant 0 : index
    %c0_38 = arith.constant 0 : index
    %c0_39 = arith.constant 0 : index
    %78 = vector.load %arg8[%c0_37, %c0_38, %c0_39] : memref<2x64x192xf32, #tpu.memory_space<vmem>>, vector<1x64x192xf32>
    %79 = vector.shape_cast %78 : vector<1x64x192xf32> to vector<64x192xf32>
    %cst_40 = arith.constant dense<0.000000e+00> : vector<32x192xf32>
    %80 = tpu.matmul %77, %79, %cst_40 {dimension_numbers = #tpu.dot_dimension_numbers<[1], [0], [0], [1], [0, 0, 1, 1], [], []>} : vector<32x64xf32>, vector<64x192xf32>, vector<32x192xf32> -> vector<32x192xf32>
    %c0_41 = arith.constant 0 : index
    %c0_42 = arith.constant 0 : index
    %c0_43 = arith.constant 0 : index
    %81 = vector.load %arg9[%c0_41, %c0_42, %c0_43] : memref<2x1x192xf32, #tpu.memory_space<vmem>>, vector<1x1x192xf32>
    %82 = vector.shape_cast %81 : vector<1x1x192xf32> to vector<1x192xf32>
    %83 = vector.broadcast %82 : vector<1x192xf32> to vector<32x192xf32>
    %84 = arith.addf %80, %83 : vector<32x192xf32>
    %85 = vector.shape_cast %84 : vector<32x192xf32> to vector<2x16x192xf32>
    %86 = vector.extract_strided_slice %85 {offsets = [0, 0, 0], sizes = [2, 16, 48], strides = [1, 1, 1]} : vector<2x16x192xf32> to vector<2x16x48xf32>
    %87 = vector.extract_strided_slice %85 {offsets = [0, 0, 48], sizes = [2, 16, 48], strides = [1, 1, 1]} : vector<2x16x192xf32> to vector<2x16x48xf32>
    %88 = vector.extract_strided_slice %85 {offsets = [0, 0, 96], sizes = [2, 16, 48], strides = [1, 1, 1]} : vector<2x16x192xf32> to vector<2x16x48xf32>
    %89 = vector.extract_strided_slice %85 {offsets = [0, 0, 144], sizes = [2, 16, 48], strides = [1, 1, 1]} : vector<2x16x192xf32> to vector<2x16x48xf32>
    %90 = tpu.concatenate %86, %87, %88, %89 in 0 : vector<2x16x48xf32>, vector<2x16x48xf32>, vector<2x16x48xf32>, vector<2x16x48xf32> -> vector<8x16x48xf32>
    %91 = vector.extract_strided_slice %90 {offsets = [0, 0, 0], sizes = [8, 16, 16], strides = [1, 1, 1]} : vector<8x16x48xf32> to vector<8x16x16xf32>
    %92 = vector.extract_strided_slice %90 {offsets = [0, 0, 16], sizes = [8, 16, 16], strides = [1, 1, 1]} : vector<8x16x48xf32> to vector<8x16x16xf32>
    %93 = vector.extract_strided_slice %90 {offsets = [0, 0, 32], sizes = [8, 16, 16], strides = [1, 1, 1]} : vector<8x16x48xf32> to vector<8x16x16xf32>
    "tpu.trace_start"() <{level = 10 : i32, message = "bqd,bkd->bqk"}> : () -> ()
    %cst_44 = arith.constant dense<0.000000e+00> : vector<8x16x16xf32>
    %94 = tpu.matmul %91, %92, %cst_44 {dimension_numbers = #tpu.dot_dimension_numbers<[2], [2], [1], [1], [0, 0, 0, 1, 1, 1], [0], [0]>} : vector<8x16x16xf32>, vector<8x16x16xf32>, vector<8x16x16xf32> -> vector<8x16x16xf32>
    "tpu.trace_stop"() : () -> ()
    %cst_45 = arith.constant dense<0xFF800000> : vector<8x16xf32>
    %95 = vector.multi_reduction <maximumf>, %94, %cst_45 [2] : vector<8x16x16xf32> to vector<8x16xf32>
    %96 = vector.shape_cast %95 : vector<8x16xf32> to vector<8x16x1xf32>
    %97 = vector.broadcast %96 : vector<8x16x1xf32> to vector<8x16x16xf32>
    %98 = arith.subf %94, %97 : vector<8x16x16xf32>
    %99 = math.exp %98 : vector<8x16x16xf32>
    %cst_46 = arith.constant dense<0.000000e+00> : vector<8x16xf32>
    %100 = vector.multi_reduction <add>, %99, %cst_46 [2] : vector<8x16x16xf32> to vector<8x16xf32>
    %101 = vector.shape_cast %100 : vector<8x16xf32> to vector<8x16x1xf32>
    %102 = vector.broadcast %101 : vector<8x16x1xf32> to vector<8x16x16xf32>
    %103 = arith.divf %99, %102 : vector<8x16x16xf32>
    "tpu.trace_start"() <{level = 10 : i32, message = "bqk,bkd->bqd"}> : () -> ()
    %cst_47 = arith.constant dense<0.000000e+00> : vector<8x16x16xf32>
    %104 = tpu.matmul %103, %93, %cst_47 {dimension_numbers = #tpu.dot_dimension_numbers<[2], [1], [1], [2], [0, 0, 0, 1, 1, 2], [0], [0]>} : vector<8x16x16xf32>, vector<8x16x16xf32>, vector<8x16x16xf32> -> vector<8x16x16xf32>
    "tpu.trace_stop"() : () -> ()
    %105 = vector.extract_strided_slice %104 {offsets = [0, 0, 0], sizes = [2, 16, 16], strides = [1, 1, 1]} : vector<8x16x16xf32> to vector<2x16x16xf32>
    %106 = vector.extract_strided_slice %104 {offsets = [2, 0, 0], sizes = [2, 16, 16], strides = [1, 1, 1]} : vector<8x16x16xf32> to vector<2x16x16xf32>
    %107 = vector.extract_strided_slice %104 {offsets = [4, 0, 0], sizes = [2, 16, 16], strides = [1, 1, 1]} : vector<8x16x16xf32> to vector<2x16x16xf32>
    %108 = vector.extract_strided_slice %104 {offsets = [6, 0, 0], sizes = [2, 16, 16], strides = [1, 1, 1]} : vector<8x16x16xf32> to vector<2x16x16xf32>
    %109 = tpu.concatenate %105, %106, %107, %108 in 2 : vector<2x16x16xf32>, vector<2x16x16xf32>, vector<2x16x16xf32>, vector<2x16x16xf32> -> vector<2x16x64xf32>
    %110 = vector.shape_cast %109 : vector<2x16x64xf32> to vector<32x64xf32>
    %c0_48 = arith.constant 0 : index
    %c0_49 = arith.constant 0 : index
    %c0_50 = arith.constant 0 : index
    %111 = vector.load %arg10[%c0_48, %c0_49, %c0_50] : memref<2x64x64xf32, #tpu.memory_space<vmem>>, vector<1x64x64xf32>
    %112 = vector.shape_cast %111 : vector<1x64x64xf32> to vector<64x64xf32>
    %cst_51 = arith.constant dense<0.000000e+00> : vector<32x64xf32>
    %113 = tpu.matmul %110, %112, %cst_51 {dimension_numbers = #tpu.dot_dimension_numbers<[1], [0], [0], [1], [0, 0, 1, 1], [], []>} : vector<32x64xf32>, vector<64x64xf32>, vector<32x64xf32> -> vector<32x64xf32>
    %114 = arith.addf %51, %113 : vector<32x64xf32>
    %c0_52 = arith.constant 0 : index
    %c0_53 = arith.constant 0 : index
    %c0_54 = arith.constant 0 : index
    %115 = vector.load %arg11[%c0_52, %c0_53, %c0_54] : memref<2x1x64xf32, #tpu.memory_space<vmem>>, vector<1x1x64xf32>
    %116 = vector.shape_cast %115 : vector<1x1x64xf32> to vector<1x64xf32>
    %117 = vector.broadcast %116 : vector<1x64xf32> to vector<32x64xf32>
    %118 = arith.addf %114, %117 : vector<32x64xf32>
    %c0_55 = arith.constant 0 : index
    %c0_56 = arith.constant 0 : index
    %c0_57 = arith.constant 0 : index
    %119 = vector.load %arg12[%c0_55, %c0_56, %c0_57] : memref<2x1x64xf32, #tpu.memory_space<vmem>>, vector<1x1x64xf32>
    %120 = vector.shape_cast %119 : vector<1x1x64xf32> to vector<1x64xf32>
    %c0_58 = arith.constant 0 : index
    %c0_59 = arith.constant 0 : index
    %c0_60 = arith.constant 0 : index
    %121 = vector.load %arg13[%c0_58, %c0_59, %c0_60] : memref<2x1x64xf32, #tpu.memory_space<vmem>>, vector<1x1x64xf32>
    %122 = vector.shape_cast %121 : vector<1x1x64xf32> to vector<1x64xf32>
    %cst_61 = arith.constant dense<0.000000e+00> : vector<32xf32>
    %123 = vector.multi_reduction <add>, %118, %cst_61 [1] : vector<32x64xf32> to vector<32xf32>
    %124 = vector.shape_cast %123 : vector<32xf32> to vector<32x1xf32>
    %cst_62 = arith.constant 6.400000e+01 : f32
    %125 = vector.broadcast %cst_62 : f32 to vector<32x1xf32>
    %126 = arith.divf %124, %125 : vector<32x1xf32>
    %127 = vector.broadcast %126 : vector<32x1xf32> to vector<32x64xf32>
    %128 = arith.subf %118, %127 : vector<32x64xf32>
    %129 = arith.mulf %128, %128 : vector<32x64xf32>
    %cst_63 = arith.constant dense<0.000000e+00> : vector<32xf32>
    %130 = vector.multi_reduction <add>, %129, %cst_63 [1] : vector<32x64xf32> to vector<32xf32>
    %131 = vector.shape_cast %130 : vector<32xf32> to vector<32x1xf32>
    %cst_64 = arith.constant 6.400000e+01 : f32
    %132 = vector.broadcast %cst_64 : f32 to vector<32x1xf32>
    %133 = arith.divf %131, %132 : vector<32x1xf32>
    %134 = vector.broadcast %126 : vector<32x1xf32> to vector<32x64xf32>
    %135 = arith.subf %118, %134 : vector<32x64xf32>
    %cst_65 = arith.constant 9.99999974E-6 : f32
    %136 = vector.broadcast %cst_65 : f32 to vector<32x1xf32>
    %137 = arith.addf %133, %136 : vector<32x1xf32>
    %138 = math.rsqrt %137 : vector<32x1xf32>
    %139 = vector.broadcast %138 : vector<32x1xf32> to vector<32x64xf32>
    %140 = arith.mulf %135, %139 : vector<32x64xf32>
    %141 = vector.broadcast %120 : vector<1x64xf32> to vector<32x64xf32>
    %142 = arith.mulf %140, %141 : vector<32x64xf32>
    %143 = vector.broadcast %122 : vector<1x64xf32> to vector<32x64xf32>
    %144 = arith.addf %142, %143 : vector<32x64xf32>
    %c0_66 = arith.constant 0 : index
    %c0_67 = arith.constant 0 : index
    %c0_68 = arith.constant 0 : index
    %145 = vector.load %arg14[%c0_66, %c0_67, %c0_68] : memref<2x64x256xf32, #tpu.memory_space<vmem>>, vector<1x64x256xf32>
    %146 = vector.shape_cast %145 : vector<1x64x256xf32> to vector<64x256xf32>
    %cst_69 = arith.constant dense<0.000000e+00> : vector<32x256xf32>
    %147 = tpu.matmul %144, %146, %cst_69 {dimension_numbers = #tpu.dot_dimension_numbers<[1], [0], [0], [1], [0, 0, 1, 1], [], []>} : vector<32x64xf32>, vector<64x256xf32>, vector<32x256xf32> -> vector<32x256xf32>
    %c0_70 = arith.constant 0 : index
    %c0_71 = arith.constant 0 : index
    %c0_72 = arith.constant 0 : index
    %148 = vector.load %arg15[%c0_70, %c0_71, %c0_72] : memref<2x1x256xf32, #tpu.memory_space<vmem>>, vector<1x1x256xf32>
    %149 = vector.shape_cast %148 : vector<1x1x256xf32> to vector<1x256xf32>
    %150 = vector.broadcast %149 : vector<1x256xf32> to vector<32x256xf32>
    %151 = arith.addf %147, %150 : vector<32x256xf32>
    %152 = arith.mulf %151, %151 : vector<32x256xf32>
    %153 = arith.mulf %151, %152 : vector<32x256xf32>
    %cst_73 = arith.constant 4.471500e-02 : f32
    %154 = vector.broadcast %cst_73 : f32 to vector<32x256xf32>
    %155 = arith.mulf %154, %153 : vector<32x256xf32>
    %156 = arith.addf %151, %155 : vector<32x256xf32>
    %cst_74 = arith.constant 0.797884583 : f32
    %157 = vector.broadcast %cst_74 : f32 to vector<32x256xf32>
    %158 = arith.mulf %157, %156 : vector<32x256xf32>
    %159 = math.tanh %158 : vector<32x256xf32>
    %cst_75 = arith.constant 1.000000e+00 : f32
    %160 = vector.broadcast %cst_75 : f32 to vector<32x256xf32>
    %161 = arith.addf %160, %159 : vector<32x256xf32>
    %cst_76 = arith.constant 5.000000e-01 : f32
    %162 = vector.broadcast %cst_76 : f32 to vector<32x256xf32>
    %163 = arith.mulf %162, %161 : vector<32x256xf32>
    %164 = arith.mulf %151, %163 : vector<32x256xf32>
    %c0_77 = arith.constant 0 : index
    %c0_78 = arith.constant 0 : index
    %c0_79 = arith.constant 0 : index
    %165 = vector.load %arg16[%c0_77, %c0_78, %c0_79] : memref<2x256x64xf32, #tpu.memory_space<vmem>>, vector<1x256x64xf32>
    %166 = vector.shape_cast %165 : vector<1x256x64xf32> to vector<256x64xf32>
    %cst_80 = arith.constant dense<0.000000e+00> : vector<32x64xf32>
    %167 = tpu.matmul %164, %166, %cst_80 {dimension_numbers = #tpu.dot_dimension_numbers<[1], [0], [0], [1], [0, 0, 1, 1], [], []>} : vector<32x256xf32>, vector<256x64xf32>, vector<32x64xf32> -> vector<32x64xf32>
    %168 = arith.addf %118, %167 : vector<32x64xf32>
    %c0_81 = arith.constant 0 : index
    %c0_82 = arith.constant 0 : index
    %c0_83 = arith.constant 0 : index
    %169 = vector.load %arg17[%c0_81, %c0_82, %c0_83] : memref<2x1x64xf32, #tpu.memory_space<vmem>>, vector<1x1x64xf32>
    %170 = vector.shape_cast %169 : vector<1x1x64xf32> to vector<1x64xf32>
    %171 = vector.broadcast %170 : vector<1x64xf32> to vector<32x64xf32>
    %172 = arith.addf %168, %171 : vector<32x64xf32>
    %c1 = arith.constant 1 : index
    %c0_84 = arith.constant 0 : index
    %c0_85 = arith.constant 0 : index
    %173 = vector.load %arg6[%c1, %c0_84, %c0_85] : memref<2x1x64xf32, #tpu.memory_space<vmem>>, vector<1x1x64xf32>
    %174 = vector.shape_cast %173 : vector<1x1x64xf32> to vector<1x64xf32>
    %c1_86 = arith.constant 1 : index
    %c0_87 = arith.constant 0 : index
    %c0_88 = arith.constant 0 : index
    %175 = vector.load %arg7[%c1_86, %c0_87, %c0_88] : memref<2x1x64xf32, #tpu.memory_space<vmem>>, vector<1x1x64xf32>
    %176 = vector.shape_cast %175 : vector<1x1x64xf32> to vector<1x64xf32>
    %cst_89 = arith.constant dense<0.000000e+00> : vector<32xf32>
    %177 = vector.multi_reduction <add>, %172, %cst_89 [1] : vector<32x64xf32> to vector<32xf32>
    %178 = vector.shape_cast %177 : vector<32xf32> to vector<32x1xf32>
    %cst_90 = arith.constant 6.400000e+01 : f32
    %179 = vector.broadcast %cst_90 : f32 to vector<32x1xf32>
    %180 = arith.divf %178, %179 : vector<32x1xf32>
    %181 = vector.broadcast %180 : vector<32x1xf32> to vector<32x64xf32>
    %182 = arith.subf %172, %181 : vector<32x64xf32>
    %183 = arith.mulf %182, %182 : vector<32x64xf32>
    %cst_91 = arith.constant dense<0.000000e+00> : vector<32xf32>
    %184 = vector.multi_reduction <add>, %183, %cst_91 [1] : vector<32x64xf32> to vector<32xf32>
    %185 = vector.shape_cast %184 : vector<32xf32> to vector<32x1xf32>
    %cst_92 = arith.constant 6.400000e+01 : f32
    %186 = vector.broadcast %cst_92 : f32 to vector<32x1xf32>
    %187 = arith.divf %185, %186 : vector<32x1xf32>
    %188 = vector.broadcast %180 : vector<32x1xf32> to vector<32x64xf32>
    %189 = arith.subf %172, %188 : vector<32x64xf32>
    %cst_93 = arith.constant 9.99999974E-6 : f32
    %190 = vector.broadcast %cst_93 : f32 to vector<32x1xf32>
    %191 = arith.addf %187, %190 : vector<32x1xf32>
    %192 = math.rsqrt %191 : vector<32x1xf32>
    %193 = vector.broadcast %192 : vector<32x1xf32> to vector<32x64xf32>
    %194 = arith.mulf %189, %193 : vector<32x64xf32>
    %195 = vector.broadcast %174 : vector<1x64xf32> to vector<32x64xf32>
    %196 = arith.mulf %194, %195 : vector<32x64xf32>
    %197 = vector.broadcast %176 : vector<1x64xf32> to vector<32x64xf32>
    %198 = arith.addf %196, %197 : vector<32x64xf32>
    %c1_94 = arith.constant 1 : index
    %c0_95 = arith.constant 0 : index
    %c0_96 = arith.constant 0 : index
    %199 = vector.load %arg8[%c1_94, %c0_95, %c0_96] : memref<2x64x192xf32, #tpu.memory_space<vmem>>, vector<1x64x192xf32>
    %200 = vector.shape_cast %199 : vector<1x64x192xf32> to vector<64x192xf32>
    %cst_97 = arith.constant dense<0.000000e+00> : vector<32x192xf32>
    %201 = tpu.matmul %198, %200, %cst_97 {dimension_numbers = #tpu.dot_dimension_numbers<[1], [0], [0], [1], [0, 0, 1, 1], [], []>} : vector<32x64xf32>, vector<64x192xf32>, vector<32x192xf32> -> vector<32x192xf32>
    %c1_98 = arith.constant 1 : index
    %c0_99 = arith.constant 0 : index
    %c0_100 = arith.constant 0 : index
    %202 = vector.load %arg9[%c1_98, %c0_99, %c0_100] : memref<2x1x192xf32, #tpu.memory_space<vmem>>, vector<1x1x192xf32>
    %203 = vector.shape_cast %202 : vector<1x1x192xf32> to vector<1x192xf32>
    %204 = vector.broadcast %203 : vector<1x192xf32> to vector<32x192xf32>
    %205 = arith.addf %201, %204 : vector<32x192xf32>
    %206 = vector.shape_cast %205 : vector<32x192xf32> to vector<2x16x192xf32>
    %207 = vector.extract_strided_slice %206 {offsets = [0, 0, 0], sizes = [2, 16, 48], strides = [1, 1, 1]} : vector<2x16x192xf32> to vector<2x16x48xf32>
    %208 = vector.extract_strided_slice %206 {offsets = [0, 0, 48], sizes = [2, 16, 48], strides = [1, 1, 1]} : vector<2x16x192xf32> to vector<2x16x48xf32>
    %209 = vector.extract_strided_slice %206 {offsets = [0, 0, 96], sizes = [2, 16, 48], strides = [1, 1, 1]} : vector<2x16x192xf32> to vector<2x16x48xf32>
    %210 = vector.extract_strided_slice %206 {offsets = [0, 0, 144], sizes = [2, 16, 48], strides = [1, 1, 1]} : vector<2x16x192xf32> to vector<2x16x48xf32>
    %211 = tpu.concatenate %207, %208, %209, %210 in 0 : vector<2x16x48xf32>, vector<2x16x48xf32>, vector<2x16x48xf32>, vector<2x16x48xf32> -> vector<8x16x48xf32>
    %212 = vector.extract_strided_slice %211 {offsets = [0, 0, 0], sizes = [8, 16, 16], strides = [1, 1, 1]} : vector<8x16x48xf32> to vector<8x16x16xf32>
    %213 = vector.extract_strided_slice %211 {offsets = [0, 0, 16], sizes = [8, 16, 16], strides = [1, 1, 1]} : vector<8x16x48xf32> to vector<8x16x16xf32>
    %214 = vector.extract_strided_slice %211 {offsets = [0, 0, 32], sizes = [8, 16, 16], strides = [1, 1, 1]} : vector<8x16x48xf32> to vector<8x16x16xf32>
    "tpu.trace_start"() <{level = 10 : i32, message = "bqd,bkd->bqk"}> : () -> ()
    %cst_101 = arith.constant dense<0.000000e+00> : vector<8x16x16xf32>
    %215 = tpu.matmul %212, %213, %cst_101 {dimension_numbers = #tpu.dot_dimension_numbers<[2], [2], [1], [1], [0, 0, 0, 1, 1, 1], [0], [0]>} : vector<8x16x16xf32>, vector<8x16x16xf32>, vector<8x16x16xf32> -> vector<8x16x16xf32>
    "tpu.trace_stop"() : () -> ()
    %cst_102 = arith.constant dense<0xFF800000> : vector<8x16xf32>
    %216 = vector.multi_reduction <maximumf>, %215, %cst_102 [2] : vector<8x16x16xf32> to vector<8x16xf32>
    %217 = vector.shape_cast %216 : vector<8x16xf32> to vector<8x16x1xf32>
    %218 = vector.broadcast %217 : vector<8x16x1xf32> to vector<8x16x16xf32>
    %219 = arith.subf %215, %218 : vector<8x16x16xf32>
    %220 = math.exp %219 : vector<8x16x16xf32>
    %cst_103 = arith.constant dense<0.000000e+00> : vector<8x16xf32>
    %221 = vector.multi_reduction <add>, %220, %cst_103 [2] : vector<8x16x16xf32> to vector<8x16xf32>
    %222 = vector.shape_cast %221 : vector<8x16xf32> to vector<8x16x1xf32>
    %223 = vector.broadcast %222 : vector<8x16x1xf32> to vector<8x16x16xf32>
    %224 = arith.divf %220, %223 : vector<8x16x16xf32>
    "tpu.trace_start"() <{level = 10 : i32, message = "bqk,bkd->bqd"}> : () -> ()
    %cst_104 = arith.constant dense<0.000000e+00> : vector<8x16x16xf32>
    %225 = tpu.matmul %224, %214, %cst_104 {dimension_numbers = #tpu.dot_dimension_numbers<[2], [1], [1], [2], [0, 0, 0, 1, 1, 2], [0], [0]>} : vector<8x16x16xf32>, vector<8x16x16xf32>, vector<8x16x16xf32> -> vector<8x16x16xf32>
    "tpu.trace_stop"() : () -> ()
    %226 = vector.extract_strided_slice %225 {offsets = [0, 0, 0], sizes = [2, 16, 16], strides = [1, 1, 1]} : vector<8x16x16xf32> to vector<2x16x16xf32>
    %227 = vector.extract_strided_slice %225 {offsets = [2, 0, 0], sizes = [2, 16, 16], strides = [1, 1, 1]} : vector<8x16x16xf32> to vector<2x16x16xf32>
    %228 = vector.extract_strided_slice %225 {offsets = [4, 0, 0], sizes = [2, 16, 16], strides = [1, 1, 1]} : vector<8x16x16xf32> to vector<2x16x16xf32>
    %229 = vector.extract_strided_slice %225 {offsets = [6, 0, 0], sizes = [2, 16, 16], strides = [1, 1, 1]} : vector<8x16x16xf32> to vector<2x16x16xf32>
    %230 = tpu.concatenate %226, %227, %228, %229 in 2 : vector<2x16x16xf32>, vector<2x16x16xf32>, vector<2x16x16xf32>, vector<2x16x16xf32> -> vector<2x16x64xf32>
    %231 = vector.shape_cast %230 : vector<2x16x64xf32> to vector<32x64xf32>
    %c1_105 = arith.constant 1 : index
    %c0_106 = arith.constant 0 : index
    %c0_107 = arith.constant 0 : index
    %232 = vector.load %arg10[%c1_105, %c0_106, %c0_107] : memref<2x64x64xf32, #tpu.memory_space<vmem>>, vector<1x64x64xf32>
    %233 = vector.shape_cast %232 : vector<1x64x64xf32> to vector<64x64xf32>
    %cst_108 = arith.constant dense<0.000000e+00> : vector<32x64xf32>
    %234 = tpu.matmul %231, %233, %cst_108 {dimension_numbers = #tpu.dot_dimension_numbers<[1], [0], [0], [1], [0, 0, 1, 1], [], []>} : vector<32x64xf32>, vector<64x64xf32>, vector<32x64xf32> -> vector<32x64xf32>
    %235 = arith.addf %172, %234 : vector<32x64xf32>
    %c1_109 = arith.constant 1 : index
    %c0_110 = arith.constant 0 : index
    %c0_111 = arith.constant 0 : index
    %236 = vector.load %arg11[%c1_109, %c0_110, %c0_111] : memref<2x1x64xf32, #tpu.memory_space<vmem>>, vector<1x1x64xf32>
    %237 = vector.shape_cast %236 : vector<1x1x64xf32> to vector<1x64xf32>
    %238 = vector.broadcast %237 : vector<1x64xf32> to vector<32x64xf32>
    %239 = arith.addf %235, %238 : vector<32x64xf32>
    %c1_112 = arith.constant 1 : index
    %c0_113 = arith.constant 0 : index
    %c0_114 = arith.constant 0 : index
    %240 = vector.load %arg12[%c1_112, %c0_113, %c0_114] : memref<2x1x64xf32, #tpu.memory_space<vmem>>, vector<1x1x64xf32>
    %241 = vector.shape_cast %240 : vector<1x1x64xf32> to vector<1x64xf32>
    %c1_115 = arith.constant 1 : index
    %c0_116 = arith.constant 0 : index
    %c0_117 = arith.constant 0 : index
    %242 = vector.load %arg13[%c1_115, %c0_116, %c0_117] : memref<2x1x64xf32, #tpu.memory_space<vmem>>, vector<1x1x64xf32>
    %243 = vector.shape_cast %242 : vector<1x1x64xf32> to vector<1x64xf32>
    %cst_118 = arith.constant dense<0.000000e+00> : vector<32xf32>
    %244 = vector.multi_reduction <add>, %239, %cst_118 [1] : vector<32x64xf32> to vector<32xf32>
    %245 = vector.shape_cast %244 : vector<32xf32> to vector<32x1xf32>
    %cst_119 = arith.constant 6.400000e+01 : f32
    %246 = vector.broadcast %cst_119 : f32 to vector<32x1xf32>
    %247 = arith.divf %245, %246 : vector<32x1xf32>
    %248 = vector.broadcast %247 : vector<32x1xf32> to vector<32x64xf32>
    %249 = arith.subf %239, %248 : vector<32x64xf32>
    %250 = arith.mulf %249, %249 : vector<32x64xf32>
    %cst_120 = arith.constant dense<0.000000e+00> : vector<32xf32>
    %251 = vector.multi_reduction <add>, %250, %cst_120 [1] : vector<32x64xf32> to vector<32xf32>
    %252 = vector.shape_cast %251 : vector<32xf32> to vector<32x1xf32>
    %cst_121 = arith.constant 6.400000e+01 : f32
    %253 = vector.broadcast %cst_121 : f32 to vector<32x1xf32>
    %254 = arith.divf %252, %253 : vector<32x1xf32>
    %255 = vector.broadcast %247 : vector<32x1xf32> to vector<32x64xf32>
    %256 = arith.subf %239, %255 : vector<32x64xf32>
    %cst_122 = arith.constant 9.99999974E-6 : f32
    %257 = vector.broadcast %cst_122 : f32 to vector<32x1xf32>
    %258 = arith.addf %254, %257 : vector<32x1xf32>
    %259 = math.rsqrt %258 : vector<32x1xf32>
    %260 = vector.broadcast %259 : vector<32x1xf32> to vector<32x64xf32>
    %261 = arith.mulf %256, %260 : vector<32x64xf32>
    %262 = vector.broadcast %241 : vector<1x64xf32> to vector<32x64xf32>
    %263 = arith.mulf %261, %262 : vector<32x64xf32>
    %264 = vector.broadcast %243 : vector<1x64xf32> to vector<32x64xf32>
    %265 = arith.addf %263, %264 : vector<32x64xf32>
    %c1_123 = arith.constant 1 : index
    %c0_124 = arith.constant 0 : index
    %c0_125 = arith.constant 0 : index
    %266 = vector.load %arg14[%c1_123, %c0_124, %c0_125] : memref<2x64x256xf32, #tpu.memory_space<vmem>>, vector<1x64x256xf32>
    %267 = vector.shape_cast %266 : vector<1x64x256xf32> to vector<64x256xf32>
    %cst_126 = arith.constant dense<0.000000e+00> : vector<32x256xf32>
    %268 = tpu.matmul %265, %267, %cst_126 {dimension_numbers = #tpu.dot_dimension_numbers<[1], [0], [0], [1], [0, 0, 1, 1], [], []>} : vector<32x64xf32>, vector<64x256xf32>, vector<32x256xf32> -> vector<32x256xf32>
    %c1_127 = arith.constant 1 : index
    %c0_128 = arith.constant 0 : index
    %c0_129 = arith.constant 0 : index
    %269 = vector.load %arg15[%c1_127, %c0_128, %c0_129] : memref<2x1x256xf32, #tpu.memory_space<vmem>>, vector<1x1x256xf32>
    %270 = vector.shape_cast %269 : vector<1x1x256xf32> to vector<1x256xf32>
    %271 = vector.broadcast %270 : vector<1x256xf32> to vector<32x256xf32>
    %272 = arith.addf %268, %271 : vector<32x256xf32>
    %273 = arith.mulf %272, %272 : vector<32x256xf32>
    %274 = arith.mulf %272, %273 : vector<32x256xf32>
    %cst_130 = arith.constant 4.471500e-02 : f32
    %275 = vector.broadcast %cst_130 : f32 to vector<32x256xf32>
    %276 = arith.mulf %275, %274 : vector<32x256xf32>
    %277 = arith.addf %272, %276 : vector<32x256xf32>
    %cst_131 = arith.constant 0.797884583 : f32
    %278 = vector.broadcast %cst_131 : f32 to vector<32x256xf32>
    %279 = arith.mulf %278, %277 : vector<32x256xf32>
    %280 = math.tanh %279 : vector<32x256xf32>
    %cst_132 = arith.constant 1.000000e+00 : f32
    %281 = vector.broadcast %cst_132 : f32 to vector<32x256xf32>
    %282 = arith.addf %281, %280 : vector<32x256xf32>
    %cst_133 = arith.constant 5.000000e-01 : f32
    %283 = vector.broadcast %cst_133 : f32 to vector<32x256xf32>
    %284 = arith.mulf %283, %282 : vector<32x256xf32>
    %285 = arith.mulf %272, %284 : vector<32x256xf32>
    %c1_134 = arith.constant 1 : index
    %c0_135 = arith.constant 0 : index
    %c0_136 = arith.constant 0 : index
    %286 = vector.load %arg16[%c1_134, %c0_135, %c0_136] : memref<2x256x64xf32, #tpu.memory_space<vmem>>, vector<1x256x64xf32>
    %287 = vector.shape_cast %286 : vector<1x256x64xf32> to vector<256x64xf32>
    %cst_137 = arith.constant dense<0.000000e+00> : vector<32x64xf32>
    %288 = tpu.matmul %285, %287, %cst_137 {dimension_numbers = #tpu.dot_dimension_numbers<[1], [0], [0], [1], [0, 0, 1, 1], [], []>} : vector<32x256xf32>, vector<256x64xf32>, vector<32x64xf32> -> vector<32x64xf32>
    %289 = arith.addf %239, %288 : vector<32x64xf32>
    %c1_138 = arith.constant 1 : index
    %c0_139 = arith.constant 0 : index
    %c0_140 = arith.constant 0 : index
    %290 = vector.load %arg17[%c1_138, %c0_139, %c0_140] : memref<2x1x64xf32, #tpu.memory_space<vmem>>, vector<1x1x64xf32>
    %291 = vector.shape_cast %290 : vector<1x1x64xf32> to vector<1x64xf32>
    %292 = vector.broadcast %291 : vector<1x64xf32> to vector<32x64xf32>
    %293 = arith.addf %289, %292 : vector<32x64xf32>
    %294 = vector.shape_cast %293 : vector<32x64xf32> to vector<2x16x64xf32>
    %295 = vector.extract_strided_slice %294 {offsets = [0, 0, 0], sizes = [2, 1, 64], strides = [1, 1, 1]} : vector<2x16x64xf32> to vector<2x1x64xf32>
    %296 = vector.shape_cast %295 : vector<2x1x64xf32> to vector<2x64xf32>
    %297 = vector.extract_strided_slice %294 {offsets = [0, 1, 0], sizes = [2, 1, 64], strides = [1, 1, 1]} : vector<2x16x64xf32> to vector<2x1x64xf32>
    %298 = vector.shape_cast %297 : vector<2x1x64xf32> to vector<2x64xf32>
    %299 = tpu.concatenate %296, %298 in 1 : vector<2x64xf32>, vector<2x64xf32> -> vector<2x128xf32>
    %300 = vector.extract_strided_slice %294 {offsets = [0, 2, 0], sizes = [2, 1, 64], strides = [1, 1, 1]} : vector<2x16x64xf32> to vector<2x1x64xf32>
    %301 = vector.shape_cast %300 : vector<2x1x64xf32> to vector<2x64xf32>
    %302 = vector.extract_strided_slice %294 {offsets = [0, 3, 0], sizes = [2, 1, 64], strides = [1, 1, 1]} : vector<2x16x64xf32> to vector<2x1x64xf32>
    %303 = vector.shape_cast %302 : vector<2x1x64xf32> to vector<2x64xf32>
    %304 = tpu.concatenate %301, %303 in 1 : vector<2x64xf32>, vector<2x64xf32> -> vector<2x128xf32>
    %305 = vector.extract_strided_slice %294 {offsets = [0, 4, 0], sizes = [2, 1, 64], strides = [1, 1, 1]} : vector<2x16x64xf32> to vector<2x1x64xf32>
    %306 = vector.shape_cast %305 : vector<2x1x64xf32> to vector<2x64xf32>
    %307 = vector.extract_strided_slice %294 {offsets = [0, 5, 0], sizes = [2, 1, 64], strides = [1, 1, 1]} : vector<2x16x64xf32> to vector<2x1x64xf32>
    %308 = vector.shape_cast %307 : vector<2x1x64xf32> to vector<2x64xf32>
    %309 = tpu.concatenate %306, %308 in 1 : vector<2x64xf32>, vector<2x64xf32> -> vector<2x128xf32>
    %310 = vector.extract_strided_slice %294 {offsets = [0, 6, 0], sizes = [2, 1, 64], strides = [1, 1, 1]} : vector<2x16x64xf32> to vector<2x1x64xf32>
    %311 = vector.shape_cast %310 : vector<2x1x64xf32> to vector<2x64xf32>
    %312 = vector.extract_strided_slice %294 {offsets = [0, 7, 0], sizes = [2, 1, 64], strides = [1, 1, 1]} : vector<2x16x64xf32> to vector<2x1x64xf32>
    %313 = vector.shape_cast %312 : vector<2x1x64xf32> to vector<2x64xf32>
    %314 = tpu.concatenate %311, %313 in 1 : vector<2x64xf32>, vector<2x64xf32> -> vector<2x128xf32>
    %315 = vector.extract_strided_slice %294 {offsets = [0, 8, 0], sizes = [2, 1, 64], strides = [1, 1, 1]} : vector<2x16x64xf32> to vector<2x1x64xf32>
    %316 = vector.shape_cast %315 : vector<2x1x64xf32> to vector<2x64xf32>
    %317 = vector.extract_strided_slice %294 {offsets = [0, 9, 0], sizes = [2, 1, 64], strides = [1, 1, 1]} : vector<2x16x64xf32> to vector<2x1x64xf32>
    %318 = vector.shape_cast %317 : vector<2x1x64xf32> to vector<2x64xf32>
    %319 = tpu.concatenate %316, %318 in 1 : vector<2x64xf32>, vector<2x64xf32> -> vector<2x128xf32>
    %320 = vector.extract_strided_slice %294 {offsets = [0, 10, 0], sizes = [2, 1, 64], strides = [1, 1, 1]} : vector<2x16x64xf32> to vector<2x1x64xf32>
    %321 = vector.shape_cast %320 : vector<2x1x64xf32> to vector<2x64xf32>
    %322 = vector.extract_strided_slice %294 {offsets = [0, 11, 0], sizes = [2, 1, 64], strides = [1, 1, 1]} : vector<2x16x64xf32> to vector<2x1x64xf32>
    %323 = vector.shape_cast %322 : vector<2x1x64xf32> to vector<2x64xf32>
    %324 = tpu.concatenate %321, %323 in 1 : vector<2x64xf32>, vector<2x64xf32> -> vector<2x128xf32>
    %325 = vector.extract_strided_slice %294 {offsets = [0, 12, 0], sizes = [2, 1, 64], strides = [1, 1, 1]} : vector<2x16x64xf32> to vector<2x1x64xf32>
    %326 = vector.shape_cast %325 : vector<2x1x64xf32> to vector<2x64xf32>
    %327 = vector.extract_strided_slice %294 {offsets = [0, 13, 0], sizes = [2, 1, 64], strides = [1, 1, 1]} : vector<2x16x64xf32> to vector<2x1x64xf32>
    %328 = vector.shape_cast %327 : vector<2x1x64xf32> to vector<2x64xf32>
    %329 = tpu.concatenate %326, %328 in 1 : vector<2x64xf32>, vector<2x64xf32> -> vector<2x128xf32>
    %330 = vector.extract_strided_slice %294 {offsets = [0, 14, 0], sizes = [2, 1, 64], strides = [1, 1, 1]} : vector<2x16x64xf32> to vector<2x1x64xf32>
    %331 = vector.shape_cast %330 : vector<2x1x64xf32> to vector<2x64xf32>
    %332 = vector.extract_strided_slice %294 {offsets = [0, 15, 0], sizes = [2, 1, 64], strides = [1, 1, 1]} : vector<2x16x64xf32> to vector<2x1x64xf32>
    %333 = vector.shape_cast %332 : vector<2x1x64xf32> to vector<2x64xf32>
    %334 = tpu.concatenate %331, %333 in 1 : vector<2x64xf32>, vector<2x64xf32> -> vector<2x128xf32>
    %335 = tpu.concatenate %299, %304, %309, %314, %319, %324, %329, %334 in 1 : vector<2x128xf32>, vector<2x128xf32>, vector<2x128xf32>, vector<2x128xf32>, vector<2x128xf32>, vector<2x128xf32>, vector<2x128xf32>, vector<2x128xf32> -> vector<2x1024xf32>
    %c0_141 = arith.constant 0 : index
    %c0_142 = arith.constant 0 : index
    %336 = vector.load %arg18[%c0_141, %c0_142] : memref<1024x256xf32, #tpu.memory_space<vmem>>, vector<1024x256xf32>
    %cst_143 = arith.constant dense<0.000000e+00> : vector<2x256xf32>
    %337 = tpu.matmul %335, %336, %cst_143 {dimension_numbers = #tpu.dot_dimension_numbers<[1], [0], [0], [1], [0, 0, 1, 1], [], []>} : vector<2x1024xf32>, vector<1024x256xf32>, vector<2x256xf32> -> vector<2x256xf32>
    %c0_144 = arith.constant 0 : index
    %c0_145 = arith.constant 0 : index
    %338 = vector.load %arg19[%c0_144, %c0_145] : memref<1x256xf32, #tpu.memory_space<vmem>>, vector<1x256xf32>
    %339 = vector.broadcast %338 : vector<1x256xf32> to vector<2x256xf32>
    %340 = arith.addf %337, %339 : vector<2x256xf32>
    %c0_146 = arith.constant 0 : index
    %c0_147 = arith.constant 0 : index
    %341 = vector.load %arg20[%c0_146, %c0_147] : memref<2x256xf32, #tpu.memory_space<vmem>>, vector<2x256xf32>
    tpu.vector_store %arg20[%c0_146, %c0_147], %340 {strides = array<i32>} : memref<2x256xf32, #tpu.memory_space<vmem>>, vector<2x256xf32>,
    return
  }
}

</mosaic_0001>

<bundles_post_ra>
// kernel: neuro2vec_forward.1
= control target key start
LH: loop header
LB: loop body
LE: loop exit
PB: predicated region body
PF: predicated region fallthrough
CT: control target
= control target key end

     0   :  { %vm130_vm0 = vcmask 130048   ;;  %v7539_v43 = vmov 0   ;;  %vm347_vm7 = vcmask 523264   ;;  %s7541_s23 = smov 80   ;;  %s7543_s24 = smov 112   ;;  %vm582_vm10 = vcmask 261120   ;;  %s10109_s0 = inlined_call_operand.vmem [shape: f32[2,16,16], index: 0, kind: input, shape index: {}]   ;;  %s10110_s4 = inlined_call_operand.vmem [shape: f32[16,64], index: 4, kind: input, shape index: {}]   ;;  %s10111_s2 = inlined_call_operand.vmem [shape: f32[32,1], index: 2, kind: input, shape index: {}]   ;;  %s10112_s5 = inlined_call_operand.vmem [shape: f32[1,64], index: 5, kind: input, shape index: {}]   ;;  %s10113_s3 = inlined_call_operand.vmem [shape: f32[1,16,64], index: 3, kind: input, shape index: {}]   ;;  %s10114_s8 = inlined_call_operand.vmem [shape: f32[2,64,192], index: 8, kind: input, shape index: {}]   ;;  %s10115_s6 = inlined_call_operand.vmem [shape: f32[2,1,64], index: 6, kind: input, shape index: {}]   ;;  %s10116_s7 = inlined_call_operand.vmem [shape: f32[2,1,64], index: 7, kind: input, shape index: {}]   ;;  %s10117_s9 = inlined_call_operand.vmem [shape: f32[2,1,192], index: 9, kind: input, shape index: {}]   ;;  %s10118_s10 = inlined_call_operand.vmem [shape: f32[2,64,64], index: 10, kind: input, shape index: {}]   ;;  %s10119_s11 = inlined_call_operand.vmem [shape: f32[2,1,64], index: 11, kind: input, shape index: {}]   ;;  %s10120_s14 = inlined_call_operand.vmem [shape: f32[2,64,256], index: 14, kind: input, shape index: {}]   ;;  %s10121_s12 = inlined_call_operand.vmem [shape: f32[2,1,64], index: 12, kind: input, shape index: {}]   ;;  %s10122_s13 = inlined_call_operand.vmem [shape: f32[2,1,64], index: 13, kind: input, shape index: {}]   ;;  %s10123_s16 = inlined_call_operand.vmem [shape: f32[2,256,64], index: 16, kind: input, shape index: {}]   ;;  %s10124_s15 = inlined_call_operand.vmem [shape: f32[2,1,256], index: 15, kind: input, shape index: {}]   ;;  %s10125_s17 = inlined_call_operand.vmem [shape: f32[2,1,64], index: 17, kind: input, shape index: {}]   ;;  %s10126_s18 = inlined_call_operand.vmem [shape: f32[1024,256], index: 18, kind: input, shape index: {}]   ;;  %s10127_s1 = inlined_call_operand.vmem [shape: f32[2,256], index: 1, kind: input, shape index: {}]   ;;  %s10128_s21 = inlined_call_operand.vmem [shape: f32[2,256], index: 21, kind: output, shape index: {1}]   ;;  %s10129_s19 = inlined_call_operand.vmem [shape: f32[1,256], index: 19, kind: input, shape index: {}]   ;;  %s10130_s20 = inlined_call_operand.vmem [shape: f32[2,256], index: 20, kind: output, shape index: {0}]  }
   0x1   :  { %10140 = sst [smem:[#allocation2_spill]] %s10109_s0  ;;  %7165 = vset.pattern.permute.xlu1 %v7539_v43  ;;  %7164 = vset.pattern.permute.xlu0 %v7539_v43  ;;  %vm7937_vm11 = vmpackc.low %vm130_vm0, %vm130_vm0  ;;  %s7545_s29 = smov 16   ;;  %vm2219_vm12 = vcmask 392192   ;;  %vm5168_vm13 = vcmask 1041409   ;;  %vm5177_vm14 = vcmask 1043459   ;;  %vm5185_vm15 = vcmask 1045509  }
   0x2   :  { %10141 = sst [smem:[#allocation3_spill]] %s10110_s4  ;;  %s10146_s26 = sld [smem:[#allocation2_spill]] }
   0x3   :  { %10142 = sst [smem:[#allocation4_spill]] %s10111_s2  ;;  %s10147_s22 = sld [smem:[#allocation3_spill]] }
   0x4   :  { %10143 = sst [smem:[#allocation5_spill]] %s10112_s5  ;;  %s10148_s25 = sld [smem:[#allocation4_spill]] }
   0x5   :  { %10144 = sst [smem:[#allocation6_spill]] %s10113_s3  ;;  %s10136_s2 = smov 96  }
   0x6   :  { %10145 = sst [smem:[#allocation7_spill]] %s10114_s8  ;;  %s10149_s8 = sld [smem:[#allocation5_spill]] }
   0x7   :  { %s10150_s4 = sld [smem:[#allocation6_spill]]  ;;  %s10151_s27 = sld [smem:[#allocation7_spill]] }
   0x8   :  { %v126_v0 = vld [vmem:[%s10146_s26] sm:$0xff]  ;;  %v128_v1 = vld [vmem:[%s10146_s26 + $0x10] sm:$0xff]  ;;  %v127_v2 = vld [vmem:[%s10146_s26 + $0x8] sm:$0xff] }
   0x9   :  { %v131_v3 = vsel %vm130_vm0, %v126_v0, 0.0  ;;  %v137_v4 = vsel %vm130_vm0, %v128_v1, 0.0  ;;  %v129_v5 = vld [vmem:[%s10146_s26 + $0x18] sm:$0xff]  ;;  %v134_v6 = vsel %vm130_vm0, %v127_v2, 0.0  ;;  %v201_v40 = vld [vmem:[%s10147_s22] sm:$0xff]  ;;  %v202_v41 = vld [vmem:[%s10147_s22 + $0x8] sm:$0xff] }
   0xa   :  { %132 = vadd.xlane.f32.xlu0 %v131_v3  ;;  %138 = vadd.xlane.f32.xlu1 %v137_v4  ;;  %v140_v7 = vsel %vm130_vm0, %v129_v5, 0.0  ;;  %v6565_v42 = vpack.c.bf16 %v202_v41, %v201_v40  ;;  %v301_v44 = vld [vmem:[%s10148_s25 + $0x8] sm:$0xff]  ;;  %v302_v45 = vld [vmem:[%s10148_s25 + $0x10] sm:$0xff]  ;;  %v300_v46 = vld [vmem:[%s10148_s25] sm:$0xff] }
   0xb   :  { %vm305_vm1 = vcmp.gt.f32.partialorder %v301_v44, 0.5  ;;  %vm306_vm2 = vcmp.gt.f32.partialorder %v302_v45, 0.5  ;;  %vm304_vm3 = vcmp.gt.f32.partialorder %v300_v46, 0.5  ;;  %v303_v49 = vld [vmem:[%s10148_s25 + $0x18] sm:$0xff] }
   0xc   :  { %6566 = vmatprep.subr.bf16.mxu0 %v6565_v42  ;;  %v310_v47 = vsel %vm305_vm1, 1, %v7539_v43  ;;  %v309_v48 = vsel %vm304_vm3, 1, %v7539_v43  ;;  %v311_v50 = vsel %vm306_vm2, 1, %v7539_v43  ;;  %vm307_vm4 = vcmp.gt.f32.partialorder %v303_v49, 0.5 }
   0xd   :  { %6568 = vmatpush3.bf16.msra.mxu0 %v6565_v42  ;;  %v312_v51 = vsel %vm307_vm4, 1, %v7539_v43  ;;  %vm79_vm1 = vcmask 1041408  }
   0xe   :  { %135 = vadd.xlane.f32.xlu0 %v134_v6  ;;  %141 = vadd.xlane.f32.xlu1 %v140_v7 }
  0x97   :  { %v133_v8 = vpop.xlane.xlu0 %132  ;;  %v139_v9 = vpop.xlane.xlu1 %138 }
  0x9b   :  { %v136_v10 = vpop.xlane.xlu0 %135  ;;  %v142_v11 = vpop.xlane.xlu1 %141 }
  0x9c   :  { %v143_v12 = vadd.f32 %v136_v10, %v133_v8  ;;  %v150_v13 = vadd.f32 %v142_v11, %v139_v9 }
  0x9e   :  { %v144_v14 = vrot.slane %v143_v12, 4  ;;  %v151_v15 = vrot.slane %v150_v13, 4 }
  0xa0   :  { %v145_v16 = vadd.f32 %v144_v14, %v143_v12  ;;  %v152_v17 = vadd.f32 %v151_v15, %v150_v13 }
  0xa2   :  { %v146_v18 = vrot.slane %v145_v16, 2  ;;  %v153_v19 = vrot.slane %v152_v17, 2 }
  0xa4   :  { %v147_v20 = vadd.f32 %v146_v18, %v145_v16  ;;  %v154_v21 = vadd.f32 %v153_v19, %v152_v17  ;;  %v5827_v17 = vld [vmem:[%s10149_s8] ss:$0 sm:$0xff]  ;;  %v340_v18 = vld [vmem:[%s10150_s4 + $0x8] sm:$0xff] }
  0xa6   :  { %v148_v22 = vrot.slane %v147_v20, 1  ;;  %v155_v23 = vrot.slane %v154_v21, 1 }
  0xa8   :  { %v149_v24 = vadd.f32 %v148_v22, %v147_v20  ;;  %v156_v25 = vadd.f32 %v155_v23, %v154_v21  ;;  %v339_v20 = vld [vmem:[%s10150_s4] sm:$0xff]  ;;  %s7542_s4 = smov 32  }
  0xaa   :  { %v157_v26 = vmul.f32 0.00390625, %v149_v24  ;;  %v158_v27 = vmul.f32 0.00390625, %v156_v25 }
  0xac   :  { %v7676_v28 = vsub.f32 %v127_v2, %v157_v26  ;;  %v7678_v29 = vsub.f32 %v126_v0, %v157_v26  ;;  %v7680_v30 = vsub.f32 %v129_v5, %v158_v27  ;;  %v7682_v31 = vsub.f32 %v128_v1, %v158_v27 }
  0xae   :  { %v164_v32 = vmul.f32 %v7676_v28, %v7676_v28  ;;  %v163_v33 = vmul.f32 %v7678_v29, %v7678_v29  ;;  %v166_v36 = vmul.f32 %v7680_v30, %v7680_v30  ;;  %v165_v37 = vmul.f32 %v7682_v31, %v7682_v31 }
  0xb0   :  { %v170_v34 = vsel %vm130_vm0, %v164_v32, 0.0  ;;  %v167_v35 = vsel %vm130_vm0, %v163_v33, 0.0  ;;  %v176_v38 = vsel %vm130_vm0, %v166_v36, 0.0  ;;  %v173_v39 = vsel %vm130_vm0, %v165_v37, 0.0 }
  0xb1   :  { %171 = vadd.xlane.f32.xlu1 %v170_v34  ;;  %168 = vadd.xlane.f32.xlu0 %v167_v35 }
  0xb5   :  { %177 = vadd.xlane.f32.xlu1 %v176_v38  ;;  %174 = vadd.xlane.f32.xlu0 %v173_v39 }
  0xc6   :  { %317 = vperm.xlu1 %7165, %v310_v47  }
  0xca   :  { %320 = vperm.xlu1 %7165, %v311_v50  }
  0xcb   :  { %314 = vperm.xlu0 %7164, %v309_v48  }
  0xce   :  { %323 = vperm.xlu1 %7165, %v312_v51  }
 0x13e   :  { %v172_v52 = vpop.xlane.xlu1 %171  ;;  %v169_v53 = vpop.xlane.xlu0 %168 }
 0x13f   :  { %v179_v54 = vadd.f32 %v172_v52, %v169_v53 }
 0x141   :  { %v180_v55 = vrot.slane %v179_v54, 4 }
 0x142   :  { %v178_v56 = vpop.xlane.xlu1 %177  ;;  %v175_v57 = vpop.xlane.xlu0 %174 }
 0x143   :  { %v181_v58 = vadd.f32 %v180_v55, %v179_v54  ;;  %v186_v59 = vadd.f32 %v178_v56, %v175_v57  ;;  %v422_v57 = vld [vmem:[%s10151_s27 + $0x8] sm:$0xff] }
 0x145   :  { %v182_v60 = vrot.slane %v181_v58, 2  ;;  %v187_v61 = vrot.slane %v186_v59, 4 }
 0x146   :  { %v318_v14 = vpop.permute.xlu1 %317 }
 0x147   :  { %v183_v62 = vadd.f32 %v182_v60, %v181_v58  ;;  %v188_v63 = vadd.f32 %v187_v61, %v186_v59  ;;  %vm326_vm5 = vcmp.eq.s32.totalorder %v318_v14, 1  ;;  %v424_v58 = vld [vmem:[%s10151_s27 + $0x18] sm:$0xff]  ;;  %v421_v60 = vld [vmem:[%s10151_s27] sm:$0xff]  ;;  %v423_v61 = vld [vmem:[%s10151_s27 + $0x10] sm:$0xff] }
 0x148   :  { %v6569_v59 = vpack.c.bf16 %v424_v58, %v422_v57  ;;  %v435_v14 = vld [vmem:[%s10151_s27 + $0x70] sm:$0xff] }
 0x149   :  { %v184_v0 = vrot.slane %v183_v62, 1  ;;  %v189_v1 = vrot.slane %v188_v63, 2 }
 0x14a   :  { %v321_v15 = vpop.permute.xlu1 %320  ;;  %v315_v16 = vpop.permute.xlu0 %314  ;;  %6570 = vmatprep.subr.bf16.mxu1 %v6569_v59 }
 0x14b   :  { %v185_v2 = vadd.f32 %v184_v0, %v183_v62  ;;  %v190_v3 = vadd.f32 %v189_v1, %v188_v63  ;;  %vm325_vm6 = vcmp.eq.s32.totalorder %v315_v16, 1  ;;  %vm327_vm8 = vcmp.eq.s32.totalorder %v321_v15, 1  ;;  %v426_v63 = vld [vmem:[%s10151_s27 + $0x28] sm:$0xff]  ;;  %v428_v0 = vld [vmem:[%s10151_s27 + $0x38] sm:$0xff] }
 0x14c   :  { %v6571_v62 = vpack.c.bf16 %v423_v61, %v421_v60  ;;  %v6573_v1 = vpack.c.bf16 %v428_v0, %v426_v63  ;;  %v7540_v15 = vmov 0.0  }
 0x14d   :  { %v193_v4 = vmul.f32 0.003921569, %v185_v2  ;;  %v191_v5 = vrot.slane %v190_v3, 1  ;;  %v425_v2 = vld [vmem:[%s10151_s27 + $0x20] sm:$0xff]  ;;  %525 = vmatprep.mubr.f32.mxu1 %v7540_v15 }
 0x14e   :  { %v324_v21 = vpop.permute.xlu1 %323  ;;  %6572 = vmatpush1.bf16.msra.mxu1 %v6571_v62 }
 0x14f   :  { %7341 = vrsqrt.f32 %v193_v4  ;;  %v192_v6 = vadd.f32 %v191_v5, %v190_v3  ;;  %vm328_vm9 = vcmp.eq.s32.totalorder %v324_v21, 1  ;;  %v427_v3 = vld [vmem:[%s10151_s27 + $0x30] sm:$0xff]  ;;  %6574 = vmatprep.subr.bf16.mxu1 %v6573_v1  ;;  %v430_v5 = vld [vmem:[%s10151_s27 + $0x48] sm:$0xff] }
 0x150   :  { %v6575_v4 = vpack.c.bf16 %v427_v3, %v425_v2 }
 0x151   :  { %v194_v7 = vmul.f32 0.003921569, %v192_v6  ;;  %v432_v6 = vld [vmem:[%s10151_s27 + $0x58] sm:$0xff] }
 0x152   :  { %6576 = vmatpush1.bf16.msra.mxu1 %v6575_v4 }
 0x153   :  { %7343 = vrsqrt.f32 %v194_v7  ;;  %v6577_v7 = vpack.c.bf16 %v432_v6, %v430_v5 }
 0x155   :  { %6578 = vmatprep.subr.bf16.mxu1 %v6577_v7 }
 0x159   :  { %v7342_v8 = vpop.eup %7341 }
 0x15a   :  { %v197_v9 = vmul.f32 %v7342_v8, %v7678_v29  ;;  %v198_v10 = vmul.f32 %v7342_v8, %v7676_v28  ;;  %v429_v8 = vld [vmem:[%s10151_s27 + $0x40] sm:$0xff] }
 0x15c   :  { %6291 = vmatprep.mubr.msk.f32.mxu0 %vm130_vm0, %v197_v9  ;;  %v431_v9 = vld [vmem:[%s10151_s27 + $0x50] sm:$0xff] }
 0x15d   :  { %v7344_v11 = vpop.eup %7343  ;;  %6292 = vmatmul.mubr.msk.f32.vlgmr.msra.gmra.mrb[0].mxu0 %vm130_vm0, %v198_v10  ;;  %v434_v10 = vld [vmem:[%s10151_s27 + $0x68] sm:$0xff] }
 0x15e   :  { %v199_v12 = vmul.f32 %v7344_v11, %v7682_v31  ;;  %v200_v13 = vmul.f32 %v7344_v11, %v7680_v30  ;;  %v6579_v11 = vpack.c.bf16 %v431_v9, %v429_v8 }
 0x160   :  { %6294 = vmatprep.mubr.msk.f32.mxu0 %vm130_vm0, %v199_v12  ;;  %v436_v12 = vld [vmem:[%s10151_s27 + $0x78] sm:$0xff]  ;;  %6580 = vmatpush1.bf16.msra.mxu1 %v6579_v11 }
 0x161   :  { %6295 = vmatmul.mubr.msk.f32.gmra.mrb[2].mxu0 %vm130_vm0, %v200_v13  ;;  %v433_v13 = vld [vmem:[%s10151_s27 + $0x60] sm:$0xff]  ;;  %v6581_v16 = vpack.c.bf16 %v436_v12, %v434_v10 }
 0x163   :  { %6582 = vmatprep.subr.bf16.mxu1 %v6581_v16 }
 0x230   :  { %v6293_v19 = vpop.f32.mrb[0].mxu0 }
 0x231   :  { %v336_v22 = vsel %vm326_vm5, %v5827_v17, %v6293_v19  ;;  %v281_v23 = vpop.f32.mrb[1].mxu0 }
 0x232   :  { %v7731_v24 = vadd.f32 %v340_v18, %v336_v22  ;;  %v335_v25 = vsel %vm325_vm6, %v5827_v17, %v281_v23 }
 0x233   :  { %v7733_v26 = vadd.f32 %v339_v20, %v335_v25 }
 0x234   :  { %v6296_v27 = vpop.f32.mrb[2].mxu0  ;;  %v351_v28 = vsel %vm347_vm7, %v7731_v24, 0.0 }
 0x235   :  { %352 = vadd.xlane.f32.xlu0 %v351_v28  ;;  %v291_v29 = vpop.f32.mrb[3].mxu0  ;;  %v348_v30 = vsel %vm347_vm7, %v7733_v26, 0.0  ;;  %v338_v31 = vsel %vm328_vm9, %v5827_v17, %v6296_v27 }
 0x236   :  { %v337_v32 = vsel %vm327_vm8, %v5827_v17, %v291_v29  ;;  %349 = vadd.xlane.f32.xlu1 %v348_v30  ;;  %v7741_v34 = vadd.f32 %v340_v18, %v338_v31  ;;  %v6583_v17 = vpack.c.bf16 %v435_v14, %v433_v13 }
 0x237   :  { %v7739_v33 = vadd.f32 %v339_v20, %v337_v32 }
 0x238   :  { %v357_v36 = vsel %vm347_vm7, %v7741_v34, 0.0  ;;  %6584 = vmatpush1.bf16.msra.mxu1 %v6583_v17 }
 0x239   :  { %v354_v35 = vsel %vm347_vm7, %v7739_v33, 0.0 }
 0x23a   :  { %355 = vadd.xlane.f32.xlu1 %v354_v35  ;;  %v5828_v35 = vld [vmem:[%s10115_s6] ss:$0 sm:$0xff] }
 0x23e   :  { %358 = vadd.xlane.f32.xlu1 %v357_v36 }
 0x2c2   :  { %v353_v37 = vpop.xlane.xlu0 %352 }
 0x2c3   :  { %v362_v38 = vmul.f32 0.015625, %v353_v37  ;;  %v350_v39 = vpop.xlane.xlu1 %349  ;;  %v5829_v37 = vld [vmem:[%s10116_s7] ss:$0 sm:$0xff] }
 0x2c4   :  { %v361_v40 = vmul.f32 0.015625, %v350_v39 }
 0x2c5   :  { %v7748_v41 = vsub.f32 %v7731_v24, %v362_v38 }
 0x2c6   :  { %v7751_v42 = vsub.f32 %v7733_v26, %v361_v40 }
 0x2c7   :  { %v356_v43 = vpop.xlane.xlu1 %355  ;;  %v370_v48 = vmul.f32 %v7748_v41, %v7748_v41 }
 0x2c8   :  { %v363_v44 = vmul.f32 0.015625, %v356_v43  ;;  %v369_v45 = vmul.f32 %v7751_v42, %v7751_v42 }
 0x2c9   :  { %v376_v54 = vsel %vm347_vm7, %v370_v48, 0.0 }
 0x2ca   :  { %v7756_v46 = vsub.f32 %v7739_v33, %v363_v44  ;;  %v373_v47 = vsel %vm347_vm7, %v369_v45, 0.0 }
 0x2cb   :  { %374 = vadd.xlane.f32.xlu1 %v373_v47  ;;  %v359_v49 = vpop.xlane.xlu1 %358 }
 0x2cc   :  { %v364_v50 = vmul.f32 0.015625, %v359_v49  ;;  %v371_v51 = vmul.f32 %v7756_v46, %v7756_v46 }
 0x2ce   :  { %v7764_v52 = vsub.f32 %v7741_v34, %v364_v50  ;;  %v379_v53 = vsel %vm347_vm7, %v371_v51, 0.0 }
 0x2cf   :  { %380 = vadd.xlane.f32.xlu0 %v379_v53  ;;  %377 = vadd.xlane.f32.xlu1 %v376_v54 }
 0x2d0   :  { %v372_v55 = vmul.f32 %v7764_v52, %v7764_v52 }
 0x2d2   :  { %v382_v56 = vsel %vm347_vm7, %v372_v55, 0.0 }
 0x2d3   :  { %383 = vadd.xlane.f32.xlu1 %v382_v56 }
 0x358   :  { %v375_v18 = vpop.xlane.xlu1 %374 }
 0x359   :  { %v385_v19 = vmul.f32 0.015625, %v375_v18 }
 0x35b   :  { %v389_v20 = vadd.f32 1e-05, %v385_v19 }
 0x35c   :  { %v378_v21 = vpop.xlane.xlu1 %377  ;;  %v381_v22 = vpop.xlane.xlu0 %380 }
 0x35d   :  { %7345 = vrsqrt.f32 %v389_v20  ;;  %v386_v23 = vmul.f32 0.015625, %v378_v21  ;;  %v387_v25 = vmul.f32 0.015625, %v381_v22 }
 0x35f   :  { %v390_v27 = vadd.f32 1e-05, %v386_v23  ;;  %v391_v28 = vadd.f32 1e-05, %v387_v25 }
 0x360   :  { %v384_v29 = vpop.xlane.xlu1 %383 }
 0x361   :  { %7347 = vrsqrt.f32 %v390_v27  ;;  %v388_v30 = vmul.f32 0.015625, %v384_v29 }
 0x362   :  { %7349 = vrsqrt.f32 %v391_v28 }
 0x363   :  { %v392_v31 = vadd.f32 1e-05, %v388_v30 }
 0x365   :  { %7351 = vrsqrt.f32 %v392_v31 }
 0x367   :  { %v7346_v32 = vpop.eup %7345 }
 0x368   :  { %v397_v36 = vmul.f32 %v7346_v32, %v7751_v42 }
 0x36a   :  { %v407_v38 = vmul.f32 %v5828_v35, %v397_v36 }
 0x36b   :  { %v7348_v39 = vpop.eup %7347 }
 0x36c   :  { %v7350_v40 = vpop.eup %7349  ;;  %v417_v43 = vadd.f32 %v5829_v37, %v407_v38  ;;  %v398_v44 = vmul.f32 %v7348_v39, %v7748_v41 }
 0x36d   :  { %v399_v45 = vmul.f32 %v7350_v40, %v7756_v46  ;;  %v72_v46 = vlaneseq }
 0x36e   :  { %5830 = vmatmul.mubr.msk.f32.vlgmr.msra.gmra.mrb[0].mxu1 %vm347_vm7, %v417_v43  ;;  %v408_v47 = vmul.f32 %v5828_v35, %v398_v44 }
 0x36f   :  { %v7352_v48 = vpop.eup %7351  ;;  %531 = vmatprep.mubr.f32.mxu1 %v7540_v15  ;;  %v409_v42 = vmul.f32 %v5828_v35, %v399_v45  ;;  %v7837_v54 = vshrl.u32 %v72_v46, 7 }
 0x370   :  { %v418_v49 = vadd.f32 %v5829_v37, %v408_v47  ;;  %v400_v50 = vmul.f32 %v7352_v48, %v7764_v52  ;;  %v437_v52 = vld [vmem:[%s10117_s9] sm:$0x3] }
 0x371   :  { %v419_v51 = vadd.f32 %v5829_v37, %v409_v42  ;;  %v7840_v55 = vsub.s32 0, %v7837_v54  ;;  %v7847_v57 = vsub.s32 1, %v7837_v54 }
 0x372   :  { %5831 = vmatmul.mubr.msk.f32.gmra.mrb[2].mxu1 %vm347_vm7, %v418_v49  ;;  %v410_v53 = vmul.f32 %v5828_v35, %v400_v50 }
 0x373   :  { %537 = vmatprep.mubr.f32.mxu1 %v7540_v15  ;;  %v442_v56 = vrot.slane %v437_v52, %v7840_v55  ;;  %v446_v60 = vrot.slane %v437_v52, %v7847_v57 }
 0x374   :  { %v420_v41 = vadd.f32 %v5829_v37, %v410_v53 }
 0x376   :  { %5832 = vmatmul.mubr.msk.f32.gmra.mrb[4].mxu1 %vm347_vm7, %v419_v51 }
 0x377   :  { %543 = vmatprep.mubr.f32.mxu1 %v7540_v15 }
 0x37a   :  { %5833 = vmatmul.mubr.msk.f32.gmra.mrb[6].mxu1 %vm347_vm7, %v420_v41 }
 0x441   :  { %v527_v58 = vpop.f32.mrb[0].mxu1 }
 0x442   :  { %v528_v59 = vadd.f32 %v527_v58, %v442_v56  ;;  %v529_v61 = vpop.f32.mrb[1].mxu1 }
 0x443   :  { %v530_v63 = vadd.f32 %v529_v61, %v446_v60 }
 0x444   :  { %554 = vrot.lane.b32.xlu0 %v528_v59, %s7541_s23  ;;  %6301 = vmatprep.mubr.msk.f32.mxu0 %vm130_vm0, %v528_v59 }
 0x445   :  { %566 = vrot.lane.b32.xlu1 %v528_v59, %s7542_s4  ;;  %v533_v62 = vpop.f32.mrb[2].mxu1 }
 0x446   :  { %v7853_v0 = vadd.f32 %v533_v62, %v442_v56  ;;  %v535_v1 = vpop.f32.mrb[3].mxu1 }
 0x447   :  { %v536_v3 = vadd.f32 %v535_v1, %v446_v60 }
 0x448   :  { %568 = vrot.lane.b32.xlu0 %v530_v63, %s7542_s4  ;;  %v7166_v12 = vpack.i.bf16 %v7853_v0, %v528_v59 }
 0x449   :  { %556 = vrot.lane.b32.xlu1 %v7853_v0, %s7541_s23  ;;  %v539_v2 = vpop.f32.mrb[4].mxu1 }
 0x44a   :  { %v541_v4 = vpop.f32.mrb[5].mxu1  ;;  %v7861_v8 = vadd.f32 %v539_v2, %v442_v56 }
 0x44b   :  { %v542_v6 = vadd.f32 %v541_v4, %v446_v60 }
 0x44c   :  { %572 = vrot.lane.b32.xlu0 %v536_v3, %s7542_s4 }
 0x44d   :  { %570 = vrot.lane.b32.xlu1 %v7853_v0, %s7542_s4  ;;  %v545_v5 = vpop.f32.mrb[6].mxu1 }
 0x44e   :  { %v547_v7 = vpop.f32.mrb[7].mxu1  ;;  %v7866_v9 = vadd.f32 %v545_v5, %v442_v56 }
 0x44f   :  { %v548_v10 = vadd.f32 %v547_v7, %v446_v60 }
 0x450   :  { %576 = vrot.lane.b32.xlu0 %v542_v6, %s7542_s4  ;;  %v7171_v11 = vpack.i.bf16 %v7866_v9, %v7861_v8 }
 0x451   :  { %558 = vrot.lane.b32.xlu1 %v7861_v8, %s7541_s23 }
 0x454   :  { %560 = vrot.lane.b32.xlu0 %v7866_v9, %s7541_s23 }
 0x455   :  { %574 = vrot.lane.b32.xlu1 %v7861_v8, %s7542_s4 }
 0x458   :  { %580 = vrot.lane.b32.xlu0 %v548_v10, %s7542_s4 }
 0x459   :  { %578 = vrot.lane.b32.xlu1 %v7866_v9, %s7542_s4 }
 0x45c   :  { %589 = vrot.lane.b32.xlu0 %v536_v3, %s7543_s24 }
 0x45d   :  { %587 = vrot.lane.b32.xlu1 %v530_v63, %s7543_s24 }
 0x460   :  { %593 = vrot.lane.b32.xlu0 %v548_v10, %s7543_s24 }
 0x461   :  { %591 = vrot.lane.b32.xlu1 %v542_v6, %s7543_s24 }
 0x464   :  { %7172 = vrot.lane.b32.xlu0 %v7171_v11, %s7543_s24 }
 0x465   :  { %7167 = vrot.lane.b32.xlu1 %v7166_v12, %s7543_s24 }
 0x4b6   :  { %v555_v13 = vpop.permute.xlu0 %554 }
 0x4b7   :  { %v567_v14 = vpop.permute.xlu1 %566 }
 0x4ba   :  { %v569_v16 = vpop.permute.xlu0 %568 }
 0x4bb   :  { %v7884_v17 = vpop.permute.xlu1 %556  ;;  %v7889_v21 = vsel %vm582_vm10, %v567_v14, %v569_v16 }
 0x4bc   :  { %v7176_v18 = vpack.i.bf16 %v7884_v17, %v555_v13 }
 0x4be   :  { %7177 = vrot.lane.b32.xlu1 %v7176_v18, %s7543_s24  ;;  %v573_v19 = vpop.permute.xlu0 %572 }
 0x4bf   :  { %v571_v20 = vpop.permute.xlu1 %570 }
 0x4c0   :  { %v7892_v22 = vsel %vm582_vm10, %v571_v20, %v573_v19 }
 0x4c1   :  { %v7186_v23 = vpack.i.bf16 %v7892_v22, %v7889_v21 }
 0x4c2   :  { %v577_v25 = vpop.permute.xlu0 %576 }
 0x4c3   :  { %v559_v27 = vpop.permute.xlu1 %558  ;;  %7187 = vrot.lane.b32.xlu1 %v7186_v23, %s7543_s24 }
 0x4c4   :  { %6322 = vmatprep.mubr.msk.f32.mxu1 %vm130_vm0, %v559_v27 }
 0x4c6   :  { %v7898_v28 = vpop.permute.xlu0 %560 }
 0x4c7   :  { %v575_v29 = vpop.permute.xlu1 %574  ;;  %v7901_v30 = vpack.i.bf16 %v7898_v28, %v559_v27 }
 0x4c8   :  { %v7906_v35 = vsel %vm582_vm10, %v575_v29, %v577_v25 }
 0x4c9   :  { %7182 = vrot.lane.b32.xlu0 %v7901_v30, %s7543_s24 }
 0x4ca   :  { %v581_v31 = vpop.permute.xlu0 %580 }
 0x4cb   :  { %v579_v32 = vpop.permute.xlu1 %578 }
 0x4cc   :  { %v7909_v36 = vsel %vm582_vm10, %v579_v32, %v581_v31 }
 0x4cd   :  { %v7913_v37 = vpack.i.bf16 %v7909_v36, %v7906_v35 }
 0x4ce   :  { %v7915_v38 = vpop.permute.xlu0 %589 }
 0x4cf   :  { %v588_v39 = vpop.permute.xlu1 %587  ;;  %7192 = vrot.lane.b32.xlu0 %v7913_v37, %s7543_s24 }
 0x4d0   :  { %v7920_v40 = vpack.i.bf16 %v7915_v38, %v588_v39 }
 0x4d2   :  { %7197 = vrot.lane.b32.xlu1 %v7920_v40, %s7543_s24  ;;  %v7924_v43 = vpop.permute.xlu0 %593 }
 0x4d3   :  { %v7926_v44 = vpop.permute.xlu1 %591 }
 0x4d4   :  { %v7930_v45 = vpack.i.bf16 %v7924_v43, %v7926_v44 }
 0x4d6   :  { %7212 = vrot.lane.b32.xlu1 %v7176_v18, %s10136_s2  ;;  %7202 = vrot.lane.b32.xlu0 %v7930_v45, %s7543_s24  ;;  %v7173_v47 = vpop.permute.xlu0 %7172 }
 0x4d7   :  { %v7168_v48 = vpop.permute.xlu1 %7167  ;;  %v7175_v50 = vunpack.i.h.bf16 %v7173_v47  ;;  %v7174_v51 = vunpack.i.l.bf16 %v7173_v47 }
 0x4d8   :  { %v7170_v49 = vunpack.i.h.bf16 %v7168_v48  ;;  %v7169_v42 = vunpack.i.l.bf16 %v7168_v48 }
 0x4d9   :  { %v6591_v46 = vpack.c.bf16 %v7175_v50, %v7174_v51 }
 0x4da   :  { %v6585_v41 = vpack.c.bf16 %v7170_v49, %v7169_v42  ;;  %7217 = vrot.lane.b32.xlu1 %v7171_v11, %s10136_s2  ;;  %7207 = vrot.lane.b32.xlu0 %v7166_v12, %s10136_s2 }
 0x4dc   :  { %6587 = vmatprep.subr.msk.bf16.mxu0 %vm7937_vm11, %v6585_v41 }
 0x4dd   :  { %6590 = vmatpush3.bf16.xpose.msk.msra.mxu0 %vm7937_vm11, %v6585_v41 }
 0x4de   :  { %7222 = vrot.lane.b32.xlu0 %v7186_v23, %s10136_s2  ;;  %6593 = vmatprep.subr.msk.bf16.mxu0 %vm7937_vm11, %v6591_v46 }
 0x4e4   :  { %6302 = vmatmul.mubr.msk.f32.vlgmr.msra.gmra.mrb[4].mxu0 %vm130_vm0, %v7853_v0 }
 0x4e5   :  { %6596 = vmatpush3.bf16.xpose.msk.msra.mxu0 %vm7937_vm11, %v6591_v46  ;;  %6308 = vmatprep.mubr.msk.f32.mxu0 %vm130_vm0, %v7861_v8 }
 0x4ec   :  { %6309 = vmatmul.mubr.msk.f32.vlgmr.msra.gmra.mrb[6].mxu0 %vm130_vm0, %v7866_v9 }
 0x4ed   :  { %6315 = vmatprep.mubr.msk.f32.mxu0 %vm130_vm0, %v555_v13 }
 0x530   :  { %v7178_v52 = vpop.permute.xlu1 %7177 }
 0x531   :  { %v7180_v56 = vunpack.i.h.bf16 %v7178_v52  ;;  %v7179_v58 = vunpack.i.l.bf16 %v7178_v52 }
 0x533   :  { %v6597_v59 = vpack.c.bf16 %v7180_v56, %v7179_v58 }
 0x535   :  { %v7188_v60 = vpop.permute.xlu1 %7187  ;;  %6599 = vmatprep.subr.msk.bf16.mxu0 %vm7937_vm11, %v6597_v59 }
 0x536   :  { %v7190_v61 = vunpack.i.h.bf16 %v7188_v60  ;;  %v7189_v62 = vunpack.i.l.bf16 %v7188_v60  ;;  %6602 = vmatpush3.bf16.xpose.msk.msra.mxu0 %vm7937_vm11, %v6597_v59 }
 0x538   :  { %v6609_v63 = vpack.c.bf16 %v7190_v61, %v7189_v62 }
 0x53a   :  { %6611 = vmatprep.subr.msk.bf16.mxu0 %vm7937_vm11, %v6609_v63 }
 0x53b   :  { %v7183_v0 = vpop.permute.xlu0 %7182 }
 0x53c   :  { %v7185_v1 = vunpack.i.h.bf16 %v7183_v0  ;;  %v7184_v2 = vunpack.i.l.bf16 %v7183_v0 }
 0x53d   :  { %6316 = vmatmul.mubr.msk.f32.vlgmr.msra.gmra.mrb[8].mxu0 %vm130_vm0, %v7884_v17 }
 0x53e   :  { %v6603_v3 = vpack.c.bf16 %v7185_v1, %v7184_v2  ;;  %6614 = vmatpush3.bf16.xpose.msk.msra.mxu0 %vm7937_vm11, %v6609_v63  ;;  %6329 = vmatprep.mubr.msk.f32.mxu0 %vm130_vm0, %v7889_v21 }
 0x540   :  { %6605 = vmatprep.subr.msk.bf16.mxu1 %vm7937_vm11, %v6603_v3 }
 0x541   :  { %v7193_v4 = vpop.permute.xlu0 %7192  ;;  %6608 = vmatpush3.bf16.xpose.msk.msra.mxu1 %vm7937_vm11, %v6603_v3 }
 0x542   :  { %v7195_v5 = vunpack.i.h.bf16 %v7193_v4  ;;  %v7194_v6 = vunpack.i.l.bf16 %v7193_v4 }
 0x544   :  { %v6615_v7 = vpack.c.bf16 %v7195_v5, %v7194_v6  ;;  %v7198_v8 = vpop.permute.xlu1 %7197 }
 0x545   :  { %v7200_v9 = vunpack.i.h.bf16 %v7198_v8  ;;  %v7199_v10 = vunpack.i.l.bf16 %v7198_v8  ;;  %6330 = vmatmul.mubr.msk.f32.vlgmr.msra.gmra.mrb[10].mxu0 %vm130_vm0, %v7892_v22 }
 0x546   :  { %6617 = vmatprep.subr.msk.bf16.mxu1 %vm7937_vm11, %v6615_v7  ;;  %6343 = vmatprep.mubr.msk.f32.mxu0 %vm130_vm0, %v588_v39 }
 0x547   :  { %v6621_v11 = vpack.c.bf16 %v7200_v9, %v7199_v10 }
 0x548   :  { %v7213_v12 = vpop.permute.xlu1 %7212  ;;  %v7203_v13 = vpop.permute.xlu0 %7202  ;;  %6323 = vmatmul.mubr.msk.f32.vlgmr.msra.gmra.mrb[8].mxu1 %vm130_vm0, %v7898_v28 }
 0x549   :  { %v7205_v14 = vunpack.i.h.bf16 %v7203_v13  ;;  %v7204_v16 = vunpack.i.l.bf16 %v7203_v13  ;;  %6623 = vmatprep.subr.msk.bf16.mxu0 %vm7937_vm11, %v6621_v11  ;;  %6620 = vmatpush3.bf16.xpose.msk.msra.mxu1 %vm7937_vm11, %v6615_v7  ;;  %v7215_v20 = vunpack.i.h.bf16 %v7213_v12  ;;  %v7214_v21 = vunpack.i.l.bf16 %v7213_v12 }
 0x54a   :  { %6336 = vmatprep.mubr.msk.f32.mxu1 %vm130_vm0, %v7906_v35  ;;  %6626 = vmatpush3.bf16.xpose.msk.msra.mxu0 %vm7937_vm11, %v6621_v11 }
 0x54b   :  { %v6627_v17 = vpack.c.bf16 %v7205_v14, %v7204_v16  ;;  %v6641_v29 = vpack.c.bf16 %v7215_v20, %v7214_v21 }
 0x54c   :  { %v7218_v18 = vpop.permute.xlu1 %7217  ;;  %v7208_v19 = vpop.permute.xlu0 %7207 }
 0x54d   :  { %v7210_v22 = vunpack.i.h.bf16 %v7208_v19  ;;  %v7209_v23 = vunpack.i.l.bf16 %v7208_v19  ;;  %6629 = vmatprep.subr.msk.bf16.mxu1 %vm7937_vm11, %v6627_v17  ;;  %v7220_v25 = vunpack.i.h.bf16 %v7218_v18  ;;  %v7219_v27 = vunpack.i.l.bf16 %v7218_v18 }
 0x54f   :  { %v6633_v28 = vpack.c.bf16 %v7210_v22, %v7209_v23  ;;  %v8000_v32 = vpack.c.bf16 %v7220_v25, %v7219_v27 }
 0x550   :  { %6337 = vmatmul.mubr.msk.f32.vlgmr.msra.gmra.mrb[10].mxu1 %vm130_vm0, %v7909_v36  ;;  %v7223_v31 = vpop.permute.xlu0 %7222 }
 0x551   :  { %6344 = vmatmul.mubr.msk.f32.vlgmr.msra.gmra.mrb[12].mxu0 %vm130_vm0, %v7915_v38  ;;  %6634 = vmatprep.subr.bf16.mxu0 %v6633_v28  ;;  %v7225_v35 = vunpack.i.h.bf16 %v7223_v31  ;;  %v7224_v36 = vunpack.i.l.bf16 %v7223_v31 }
 0x552   :  { %6632 = vmatpush3.bf16.xpose.msk.msra.mxu1 %vm7937_vm11, %v6627_v17  ;;  %6350 = vmatprep.mubr.msk.f32.mxu1 %vm130_vm0, %v7926_v44 }
 0x553   :  { %6636 = vmatpush3.bf16.msra.mxu0 %v6633_v28  ;;  %6642 = vmatprep.subr.bf16.mxu1 %v6641_v29  ;;  %v8005_v38 = vpack.c.bf16 %v7225_v35, %v7224_v36 }
 0x554   :  { %6638 = vmatprep.subr.bf16.mxu0 %v8000_v32 }
 0x559   :  { %6351 = vmatmul.mubr.msk.f32.vlgmr.msra.gmra.mrb[12].mxu1 %vm130_vm0, %v7924_v43 }
 0x55a   :  { %6644 = vmatpush3.bf16.msra.mxu1 %v6641_v29 }
 0x55b   :  { %6650 = vmatprep.subr.bf16.mxu1 %v8005_v38 }
 0x5b7   :  { %v6303_v39 = vpop.f32.mrb[4].mxu0 }
 0x5b8   :  { %v673_v47 = vpop.f32.mrb[5].mxu0  ;;  %v1294_v44 = vsel %vm130_vm0, %v6303_v39, -inf }
 0x5b9   :  { %1295 = vmax.xlane.f32.xlu0 %v1294_v44  ;;  %v1291_v48 = vsel %vm130_vm0, %v673_v47, -inf }
 0x5ba   :  { %1292 = vmax.xlane.f32.xlu1 %v1291_v48 }
 0x5bf   :  { %v6310_v49 = vpop.f32.mrb[6].mxu0 }
 0x5c0   :  { %v760_v42 = vpop.f32.mrb[7].mxu0  ;;  %v1300_v50 = vsel %vm130_vm0, %v6310_v49, -inf }
 0x5c1   :  { %1301 = vmax.xlane.f32.xlu0 %v1300_v50  ;;  %v1297_v43 = vsel %vm130_vm0, %v760_v42, -inf }
 0x5c5   :  { %1298 = vmax.xlane.f32.xlu0 %v1297_v43 }
 0x610   :  { %v8012_v51 = vpop.f32.mrb[8].mxu0 }
 0x611   :  { %v8014_v41 = vpop.f32.mrb[9].mxu0  ;;  %v1306_v46 = vsel %vm130_vm0, %v8012_v51, -inf }
 0x612   :  { %1307 = vmax.xlane.f32.xlu1 %v1306_v46  ;;  %v1303_v52 = vsel %vm130_vm0, %v8014_v41, -inf }
 0x613   :  { %1304 = vmax.xlane.f32.xlu0 %v1303_v52 }
 0x618   :  { %v8020_v56 = vpop.f32.mrb[10].mxu0 }
 0x619   :  { %v8022_v58 = vpop.f32.mrb[11].mxu0  ;;  %v1318_v59 = vsel %vm130_vm0, %v8020_v56, -inf }
 0x61a   :  { %1319 = vmax.xlane.f32.xlu1 %v1318_v59  ;;  %v1315_v63 = vsel %vm130_vm0, %v8022_v58, -inf }
 0x61b   :  { %v8026_v60 = vpop.f32.mrb[8].mxu1 }
 0x61c   :  { %v8028_v61 = vpop.f32.mrb[9].mxu1  ;;  %v1312_v62 = vsel %vm130_vm0, %v8026_v60, -inf }
 0x61d   :  { %1313 = vmax.xlane.f32.xlu0 %v1312_v62  ;;  %v1309_v0 = vsel %vm130_vm0, %v8028_v61, -inf }
 0x61e   :  { %1316 = vmax.xlane.f32.xlu1 %v1315_v63 }
 0x621   :  { %1310 = vmax.xlane.f32.xlu0 %v1309_v0 }
 0x623   :  { %v8036_v1 = vpop.f32.mrb[10].mxu1 }
 0x624   :  { %v8038_v2 = vpop.f32.mrb[12].mxu0  ;;  %v8040_v3 = vpop.f32.mrb[11].mxu1  ;;  %v1324_v7 = vsel %vm130_vm0, %v8036_v1, -inf }
 0x625   :  { %v8042_v4 = vpop.f32.mrb[13].mxu0  ;;  %v1330_v5 = vsel %vm130_vm0, %v8038_v2, -inf  ;;  %v1321_v6 = vsel %vm130_vm0, %v8040_v3, -inf }
 0x626   :  { %1331 = vmax.xlane.f32.xlu1 %v1330_v5  ;;  %1322 = vmax.xlane.f32.xlu0 %v1321_v6  ;;  %v1327_v10 = vsel %vm130_vm0, %v8042_v4, -inf }
 0x62a   :  { %1325 = vmax.xlane.f32.xlu1 %v1324_v7 }
 0x62c   :  { %v8050_v8 = vpop.f32.mrb[12].mxu1 }
 0x62d   :  { %v8052_v9 = vpop.f32.mrb[13].mxu1  ;;  %v1336_v12 = vsel %vm130_vm0, %v8050_v8, -inf }
 0x62e   :  { %1328 = vmax.xlane.f32.xlu1 %v1327_v10  ;;  %v1333_v11 = vsel %vm130_vm0, %v8052_v9, -inf }
 0x62f   :  { %1334 = vmax.xlane.f32.xlu0 %v1333_v11 }
 0x632   :  { %1337 = vmax.xlane.f32.xlu1 %v1336_v12 }
 0x643   :  { %7227 = vrot.lane.b32.xlu1 %v7901_v30, %s10136_s2 }
 0x645   :  { %7232 = vrot.lane.b32.xlu0 %v7920_v40, %s10136_s2 }
 0x646   :  { %v1296_v13 = vpop.xlane.xlu0 %1295 }
 0x647   :  { %v1340_v14 = vsub.f32 %v6303_v39, %v1296_v13  ;;  %v1293_v16 = vpop.xlane.xlu1 %1292 }
 0x648   :  { %v1339_v19 = vsub.f32 %v673_v47, %v1293_v16 }
 0x649   :  { %v1357_v18 = vmul.f32 1.442695, %v1340_v14 }
 0x64a   :  { %v1355_v20 = vmul.f32 1.442695, %v1339_v19 }
 0x64b   :  { %7353 = vpow2.f32 %v1357_v18 }
 0x64c   :  { %7355 = vpow2.f32 %v1355_v20 }
 0x64e   :  { %v1302_v17 = vpop.xlane.xlu0 %1301 }
 0x64f   :  { %v1342_v21 = vsub.f32 %v6310_v49, %v1302_v17 }
 0x651   :  { %v1361_v23 = vmul.f32 1.442695, %v1342_v21 }
 0x652   :  { %v1299_v22 = vpop.xlane.xlu0 %1298 }
 0x653   :  { %v1341_v25 = vsub.f32 %v760_v42, %v1299_v22  ;;  %7357 = vpow2.f32 %v1361_v23 }
 0x655   :  { %v1359_v27 = vmul.f32 1.442695, %v1341_v25  ;;  %v8064_v28 = vpop.eup %7353 }
 0x656   :  { %v1390_v30 = vsel %vm130_vm0, %v8064_v28, 0.0  ;;  %v8068_v40 = vpop.eup %7355 }
 0x657   :  { %7359 = vpow2.f32 %v1359_v27  ;;  %v1387_v29 = vsel %vm130_vm0, %v8068_v40, 0.0 }
 0x65d   :  { %v8072_v31 = vpop.eup %7357 }
 0x65e   :  { %v1396_v35 = vsel %vm130_vm0, %v8072_v31, 0.0 }
 0x661   :  { %v8076_v36 = vpop.eup %7359 }
 0x662   :  { %v1393_v39 = vsel %vm130_vm0, %v8076_v36, 0.0 }
 0x664   :  { %1391 = vadd.xlane.f32.xlu0 %v1390_v30 }
 0x668   :  { %1388 = vadd.xlane.f32.xlu0 %v1387_v29 }
 0x66c   :  { %1397 = vadd.xlane.f32.xlu0 %v1396_v35 }
 0x670   :  { %1394 = vadd.xlane.f32.xlu0 %v1393_v39 }
 0x69f   :  { %v1308_v47 = vpop.xlane.xlu1 %1307 }
 0x6a0   :  { %v1344_v44 = vsub.f32 %v8012_v51, %v1308_v47  ;;  %v1305_v48 = vpop.xlane.xlu0 %1304 }
 0x6a1   :  { %v1343_v49 = vsub.f32 %v8014_v41, %v1305_v48 }
 0x6a2   :  { %v1365_v42 = vmul.f32 1.442695, %v1344_v44 }
 0x6a3   :  { %v1363_v50 = vmul.f32 1.442695, %v1343_v49 }
 0x6a4   :  { %7361 = vpow2.f32 %v1365_v42 }
 0x6a5   :  { %7363 = vpow2.f32 %v1363_v50 }
 0x6a7   :  { %v1320_v43 = vpop.xlane.xlu1 %1319 }
 0x6a8   :  { %v1348_v46 = vsub.f32 %v8020_v56, %v1320_v43 }
 0x6aa   :  { %v1373_v52 = vmul.f32 1.442695, %v1348_v46  ;;  %v1314_v59 = vpop.xlane.xlu0 %1313 }
 0x6ab   :  { %v1346_v62 = vsub.f32 %v8026_v60, %v1314_v59  ;;  %v1317_v63 = vpop.xlane.xlu1 %1316 }
 0x6ac   :  { %7365 = vpow2.f32 %v1373_v52  ;;  %v1347_v0 = vsub.f32 %v8022_v58, %v1317_v63 }
 0x6ad   :  { %v1369_v5 = vmul.f32 1.442695, %v1346_v62 }
 0x6ae   :  { %v8085_v51 = vpop.eup %7361  ;;  %v1371_v6 = vmul.f32 1.442695, %v1347_v0  ;;  %v1311_v41 = vpop.xlane.xlu0 %1310 }
 0x6af   :  { %7367 = vpow2.f32 %v1369_v5  ;;  %v1345_v7 = vsub.f32 %v8028_v61, %v1311_v41  ;;  %v1402_v10 = vsel %vm130_vm0, %v8085_v51, 0.0  ;;  %v8090_v56 = vpop.eup %7363 }
 0x6b0   :  { %7369 = vpow2.f32 %v1371_v6  ;;  %1403 = vadd.xlane.f32.xlu1 %v1402_v10  ;;  %v1399_v58 = vsel %vm130_vm0, %v8090_v56, 0.0 }
 0x6b1   :  { %v1367_v60 = vmul.f32 1.442695, %v1345_v7 }
 0x6b3   :  { %7371 = vpow2.f32 %v1367_v60  ;;  %v1332_v11 = vpop.xlane.xlu1 %1331  ;;  %v1323_v12 = vpop.xlane.xlu0 %1322 }
 0x6b4   :  { %v1352_v13 = vsub.f32 %v8038_v2, %v1332_v11  ;;  %v1349_v14 = vsub.f32 %v8040_v3, %v1323_v12  ;;  %1400 = vadd.xlane.f32.xlu1 %v1399_v58 }
 0x6b6   :  { %v8096_v61 = vpop.eup %7365  ;;  %v1381_v16 = vmul.f32 1.442695, %v1352_v13  ;;  %v1375_v17 = vmul.f32 1.442695, %v1349_v14 }
 0x6b7   :  { %v1326_v18 = vpop.xlane.xlu1 %1325  ;;  %v1414_v19 = vsel %vm130_vm0, %v8096_v61, 0.0 }
 0x6b8   :  { %7373 = vpow2.f32 %v1381_v16  ;;  %v1350_v20 = vsub.f32 %v8036_v1, %v1326_v18  ;;  %1415 = vadd.xlane.f32.xlu1 %v1414_v19 }
 0x6b9   :  { %v8101_v21 = vpop.eup %7367  ;;  %7375 = vpow2.f32 %v1375_v17 }
 0x6ba   :  { %v8103_v22 = vpop.eup %7369  ;;  %v1377_v2 = vmul.f32 1.442695, %v1350_v20  ;;  %v1408_v3 = vsel %vm130_vm0, %v8101_v21, 0.0 }
 0x6bb   :  { %v1329_v23 = vpop.xlane.xlu1 %1328  ;;  %1409 = vadd.xlane.f32.xlu0 %v1408_v3  ;;  %v1411_v25 = vsel %vm130_vm0, %v8103_v22, 0.0 }
 0x6bc   :  { %7377 = vpow2.f32 %v1377_v2  ;;  %v1351_v27 = vsub.f32 %v8042_v4, %v1329_v23  ;;  %v1335_v30 = vpop.xlane.xlu0 %1334  ;;  %1412 = vadd.xlane.f32.xlu1 %v1411_v25 }
 0x6bd   :  { %v8110_v1 = vpop.eup %7371  ;;  %v1353_v29 = vsub.f32 %v8052_v9, %v1335_v30 }
 0x6be   :  { %v1379_v35 = vmul.f32 1.442695, %v1351_v27  ;;  %v1405_v39 = vsel %vm130_vm0, %v8110_v1, 0.0 }
 0x6bf   :  { %v1383_v47 = vmul.f32 1.442695, %v1353_v29  ;;  %v1338_v44 = vpop.xlane.xlu1 %1337  ;;  %1406 = vadd.xlane.f32.xlu0 %v1405_v39 }
 0x6c0   :  { %7379 = vpow2.f32 %v1379_v35  ;;  %v1354_v48 = vsub.f32 %v8050_v8, %v1338_v44  ;;  %v7233_v5 = vpop.permute.xlu0 %7232 }
 0x6c1   :  { %7381 = vpow2.f32 %v1383_v47  ;;  %v7235_v25 = vunpack.i.h.bf16 %v7233_v5 }
 0x6c2   :  { %v8116_v49 = vpop.eup %7373  ;;  %v1385_v4 = vmul.f32 1.442695, %v1354_v48 }
 0x6c3   :  { %v8118_v42 = vpop.eup %7375  ;;  %v1426_v50 = vsel %vm130_vm0, %v8116_v49, 0.0  ;;  %v7228_v10 = vpop.permute.xlu1 %7227 }
 0x6c4   :  { %7383 = vpow2.f32 %v1385_v4  ;;  %1427 = vadd.xlane.f32.xlu1 %v1426_v50  ;;  %v1417_v9 = vsel %vm130_vm0, %v8118_v42, 0.0  ;;  %v7230_v58 = vunpack.i.h.bf16 %v7228_v10  ;;  %v7229_v13 = vunpack.i.l.bf16 %v7228_v10 }
 0x6c5   :  { %1418 = vadd.xlane.f32.xlu0 %v1417_v9 }
 0x6c6   :  { %v8124_v43 = vpop.eup %7377 }
 0x6c7   :  { %v1420_v8 = vsel %vm130_vm0, %v8124_v43, 0.0 }
 0x6c8   :  { %1421 = vadd.xlane.f32.xlu1 %v1420_v8 }
 0x6ca   :  { %v8128_v46 = vpop.eup %7379 }
 0x6cb   :  { %v8130_v52 = vpop.eup %7381  ;;  %v1423_v59 = vsel %vm130_vm0, %v8128_v46, 0.0 }
 0x6cc   :  { %1424 = vadd.xlane.f32.xlu1 %v1423_v59  ;;  %v1429_v62 = vsel %vm130_vm0, %v8130_v52, 0.0 }
 0x6cd   :  { %1430 = vadd.xlane.f32.xlu0 %v1429_v62 }
 0x6ce   :  { %v8136_v63 = vpop.eup %7383 }
 0x6cf   :  { %v1432_v0 = vsel %vm130_vm0, %v8136_v63, 0.0 }
 0x6d0   :  { %1433 = vadd.xlane.f32.xlu1 %v1432_v0 }
 0x6e1   :  { %7237 = vrot.lane.b32.xlu1 %v7913_v37, %s10136_s2 }
 0x6e3   :  { %7242 = vrot.lane.b32.xlu0 %v7930_v45, %s10136_s2  ;;  %v6645_v45 = vpack.c.bf16 %v7230_v58, %v7229_v13  ;;  %s10138_s2 = smov 48  }
 0x6f1   :  { %v1392_v6 = vpop.xlane.xlu0 %1391 }
 0x6f2   :  { %7385 = vrcp.f32 %v1392_v6 }
 0x6f5   :  { %v1389_v41 = vpop.xlane.xlu0 %1388 }
 0x6f6   :  { %7387 = vrcp.f32 %v1389_v41 }
 0x6f9   :  { %v1398_v7 = vpop.xlane.xlu0 %1397 }
 0x6fa   :  { %7389 = vrcp.f32 %v1398_v7 }
 0x6fc   :  { %v7386_v11 = vpop.eup %7385 }
 0x6fd   :  { %v1395_v60 = vpop.xlane.xlu0 %1394  ;;  %v1438_v37 = vmul.f32 %v7386_v11, %v8064_v28 }
 0x6fe   :  { %7391 = vrcp.f32 %v1395_v60 }
 0x700   :  { %v7388_v12 = vpop.eup %7387 }
 0x701   :  { %v1436_v14 = vmul.f32 %v7388_v12, %v8068_v40 }
 0x703   :  { %6357 = vmatprep.mubr.msk.f32.mxu0 %vm130_vm0, %v1436_v14 }
 0x704   :  { %6358 = vmatmul.mubr.msk.f32.vlgmr.msra.gmra.mrb[14].mxu0 %vm130_vm0, %v1438_v37  ;;  %v7390_v16 = vpop.eup %7389 }
 0x705   :  { %6640 = vmatpush3.bf16.msra.mxu0 %v8000_v32  ;;  %v1442_v19 = vmul.f32 %v7390_v16, %v8072_v31 }
 0x706   :  { %6646 = vmatprep.subr.bf16.mxu0 %v6645_v45 }
 0x708   :  { %v7392_v17 = vpop.eup %7391 }
 0x709   :  { %v1440_v18 = vmul.f32 %v7392_v17, %v8076_v36  ;;  %v7234_v36 = vunpack.i.l.bf16 %v7233_v5 }
 0x70b   :  { %6364 = vmatprep.mubr.msk.f32.mxu0 %vm130_vm0, %v1440_v18  ;;  %v6657_v29 = vpack.c.bf16 %v7235_v25, %v7234_v36  ;;  %v2230_v25 = vld [vmem:[%s10118_s10 + $0x30] sm:$0xff]  ;;  %v2231_v36 = vld [vmem:[%s10118_s10 + $0x38] sm:$0xff] }
 0x70c   :  { %6365 = vmatmul.mubr.msk.f32.vlgmr.msra.gmra.mrb[16].mxu0 %vm130_vm0, %v1442_v19 }
 0x70d   :  { %6648 = vmatpush3.bf16.msra.mxu0 %v6645_v45 }
 0x73d   :  { %v1404_v28 = vpop.xlane.xlu1 %1403 }
 0x73e   :  { %7393 = vrcp.f32 %v1404_v28 }
 0x741   :  { %v1401_v40 = vpop.xlane.xlu1 %1400 }
 0x742   :  { %7395 = vrcp.f32 %v1401_v40  ;;  %v2226_v40 = vld [vmem:[%s10118_s10 + $0x10] sm:$0xff] }
 0x745   :  { %v1416_v20 = vpop.xlane.xlu1 %1415 }
 0x746   :  { %7397 = vrcp.f32 %v1416_v20  ;;  %v2227_v20 = vld [vmem:[%s10118_s10 + $0x18] sm:$0xff] }
 0x748   :  { %v1410_v2 = vpop.xlane.xlu0 %1409  ;;  %v7394_v3 = vpop.eup %7393 }
 0x749   :  { %v1413_v32 = vpop.xlane.xlu1 %1412  ;;  %v1446_v30 = vmul.f32 %v7394_v3, %v8085_v51  ;;  %v2229_v3 = vld [vmem:[%s10118_s10 + $0x28] sm:$0xff] }
 0x74a   :  { %7399 = vrcp.f32 %v1413_v32  ;;  %v6669_v32 = vpack.c.bf16 %v2227_v20, %v2226_v40 }
 0x74b   :  { %7401 = vrcp.f32 %v1410_v2  ;;  %v2228_v2 = vld [vmem:[%s10118_s10 + $0x20] sm:$0xff] }
 0x74c   :  { %v7396_v23 = vpop.eup %7395  ;;  %v1407_v31 = vpop.xlane.xlu0 %1406 }
 0x74d   :  { %7403 = vrcp.f32 %v1407_v31  ;;  %v1444_v27 = vmul.f32 %v7396_v23, %v8090_v56  ;;  %v6673_v23 = vpack.c.bf16 %v2229_v3, %v2228_v2  ;;  %v6677_v31 = vpack.c.bf16 %v2231_v36, %v2230_v25 }
 0x74f   :  { %6371 = vmatprep.mubr.msk.f32.mxu1 %vm130_vm0, %v1444_v27 }
 0x750   :  { %6372 = vmatmul.mubr.msk.f32.vlgmr.msra.gmra.mrb[14].mxu1 %vm130_vm0, %v1446_v30  ;;  %v7398_v47 = vpop.eup %7397 }
 0x751   :  { %6652 = vmatpush3.bf16.msra.mxu1 %v8005_v38  ;;  %v1428_v35 = vpop.xlane.xlu1 %1427  ;;  %v1454_v56 = vmul.f32 %v7398_v47, %v8096_v61 }
 0x752   :  { %6658 = vmatprep.subr.bf16.mxu1 %v6657_v29  ;;  %v1419_v39 = vpop.xlane.xlu0 %1418 }
 0x753   :  { %7405 = vrcp.f32 %v1419_v39 }
 0x754   :  { %v7400_v44 = vpop.eup %7399  ;;  %7407 = vrcp.f32 %v1428_v35 }
 0x755   :  { %v1422_v48 = vpop.xlane.xlu1 %1421  ;;  %v1452_v4 = vmul.f32 %v7400_v44, %v8103_v22  ;;  %v7402_v50 = vpop.eup %7401 }
 0x756   :  { %v1450_v8 = vmul.f32 %v7402_v50, %v8101_v21 }
 0x757   :  { %v7404_v51 = vpop.eup %7403  ;;  %6385 = vmatprep.mubr.msk.f32.mxu1 %vm130_vm0, %v1452_v4 }
 0x758   :  { %6386 = vmatmul.mubr.msk.f32.vlgmr.msra.gmra.mrb[16].mxu1 %vm130_vm0, %v1454_v56  ;;  %v1448_v9 = vmul.f32 %v7404_v51, %v8110_v1 }
 0x759   :  { %6660 = vmatpush3.bf16.msra.mxu1 %v6657_v29  ;;  %v1425_v38 = vpop.xlane.xlu1 %1424 }
 0x75a   :  { %7409 = vrcp.f32 %v1425_v38  ;;  %v1431_v59 = vpop.xlane.xlu0 %1430  ;;  %6378 = vmatprep.mubr.msk.f32.mxu0 %vm130_vm0, %v1448_v9 }
 0x75b   :  { %7411 = vrcp.f32 %v1422_v48  ;;  %6379 = vmatmul.mubr.msk.f32.vlgmr.msra.gmra.mrb[18].mxu0 %vm130_vm0, %v1450_v8 }
 0x75c   :  { %7413 = vrcp.f32 %v1431_v59 }
 0x75d   :  { %v7406_v61 = vpop.eup %7405  ;;  %v1434_v22 = vpop.xlane.xlu1 %1433 }
 0x75e   :  { %v1456_v62 = vmul.f32 %v7406_v61, %v8118_v42  ;;  %7415 = vrcp.f32 %v1434_v22  ;;  %v7243_v0 = vpop.permute.xlu0 %7242  ;;  %v7408_v7 = vpop.eup %7407 }
 0x75f   :  { %v7245_v5 = vunpack.i.h.bf16 %v7243_v0  ;;  %v7244_v6 = vunpack.i.l.bf16 %v7243_v0  ;;  %v1462_v13 = vmul.f32 %v7408_v7, %v8116_v49 }
 0x760   :  { %6392 = vmatprep.mubr.msk.f32.mxu0 %vm130_vm0, %v1456_v62 }
 0x761   :  { %v7238_v1 = vpop.permute.xlu1 %7237  ;;  %v6661_v42 = vpack.c.bf16 %v7245_v5, %v7244_v6 }
 0x762   :  { %v7240_v21 = vunpack.i.h.bf16 %v7238_v1  ;;  %v7239_v41 = vunpack.i.l.bf16 %v7238_v1 }
 0x764   :  { %v7410_v10 = vpop.eup %7409  ;;  %v6653_v60 = vpack.c.bf16 %v7240_v21, %v7239_v41 }
 0x765   :  { %v7412_v11 = vpop.eup %7411  ;;  %v1460_v12 = vmul.f32 %v7410_v10, %v8128_v46 }
 0x766   :  { %v7414_v58 = vpop.eup %7413  ;;  %6654 = vmatprep.subr.bf16.mxu0 %v6653_v60  ;;  %v1458_v14 = vmul.f32 %v7412_v11, %v8124_v43  ;;  %v2224_v43 = vld [vmem:[%s10118_s10] sm:$0xff] }
 0x767   :  { %6656 = vmatpush3.bf16.msra.mxu0 %v6653_v60  ;;  %6399 = vmatprep.mubr.msk.f32.mxu1 %vm130_vm0, %v1460_v12  ;;  %v1464_v45 = vmul.f32 %v7414_v58, %v8130_v52  ;;  %v2225_v52 = vld [vmem:[%s10118_s10 + $0x8] sm:$0xff] }
 0x768   :  { %6400 = vmatmul.mubr.msk.f32.vlgmr.msra.gmra.mrb[18].mxu1 %vm130_vm0, %v1462_v13  ;;  %6662 = vmatprep.subr.bf16.mxu0 %v6661_v42  ;;  %v7416_v37 = vpop.eup %7415  ;;  %v6665_v19 = vpack.c.bf16 %v2225_v52, %v2224_v43 }
 0x769   :  { %v1466_v46 = vmul.f32 %v7416_v37, %v8136_v63 }
 0x76a   :  { %6393 = vmatmul.mubr.msk.f32.vlgmr.msra.gmra.mrb[20].mxu0 %vm130_vm0, %v1458_v14 }
 0x76b   :  { %6664 = vmatpush3.bf16.msra.mxu0 %v6661_v42  ;;  %6406 = vmatprep.mubr.msk.f32.mxu0 %vm130_vm0, %v1464_v45  ;;  %v5886_v45 = vld [vmem:[%s10119_s11] ss:$0 sm:$0xff] }
 0x76c   :  { %6666 = vmatprep.subr.bf16.mxu0 %v6665_v19 }
 0x76e   :  { %6407 = vmatmul.mubr.msk.f32.vlgmr.msra.gmra.mrb[22].mxu0 %vm130_vm0, %v1466_v46 }
 0x76f   :  { %6668 = vmatpush3.bf16.msra.mxu0 %v6665_v19 }
 0x770   :  { %6670 = vmatprep.subr.bf16.mxu0 %v6669_v32 }
 0x773   :  { %6672 = vmatpush3.bf16.msra.mxu0 %v6669_v32 }
 0x774   :  { %6674 = vmatprep.subr.bf16.mxu0 %v6673_v23 }
 0x777   :  { %6676 = vmatpush3.bf16.msra.mxu0 %v6673_v23 }
 0x778   :  { %6678 = vmatprep.subr.bf16.mxu0 %v6677_v31 }
 0x77b   :  { %6680 = vmatpush3.bf16.msra.mxu0 %v6677_v31 }
 0x7d7   :  { %v6359_v49 = vpop.f32.mrb[14].mxu0 }
 0x7d8   :  { %v1545_v16 = vpop.f32.mrb[15].mxu0 }
 0x7df   :  { %v8178_v17 = vpop.f32.mrb[16].mxu0 }
 0x7e0   :  { %v8180_v18 = vpop.f32.mrb[17].mxu0 }
 0x823   :  { %v6373_v28 = vpop.f32.mrb[14].mxu1 }
 0x824   :  { %2169 = vrot.lane.b32.xlu0 %v6373_v28, %s7545_s29  ;;  %v1719_v63 = vpop.f32.mrb[15].mxu1 }
 0x825   :  { %2167 = vrot.lane.b32.xlu1 %v1719_v63, %s7545_s29 }
 0x82b   :  { %v6387_v27 = vpop.f32.mrb[16].mxu1 }
 0x82c   :  { %2185 = vrot.lane.b32.xlu0 %v6387_v27, %s7542_s4  ;;  %v1893_v30 = vpop.f32.mrb[17].mxu1 }
 0x82d   :  { %2183 = vrot.lane.b32.xlu1 %v1893_v30, %s7542_s4 }
 0x82e   :  { %v6380_v29 = vpop.f32.mrb[18].mxu0 }
 0x82f   :  { %v1806_v35 = vpop.f32.mrb[19].mxu0 }
 0x830   :  { %2173 = vrot.lane.b32.xlu0 %v6380_v29, %s7545_s29 }
 0x831   :  { %2171 = vrot.lane.b32.xlu1 %v1806_v35, %s7545_s29 }
 0x83b   :  { %v6401_v39 = vpop.f32.mrb[18].mxu1 }
 0x83c   :  { %v2067_v47 = vpop.f32.mrb[19].mxu1  ;;  %2201 = vrot.lane.b32.xlu0 %v6401_v39, %s10138_s2 }
 0x83d   :  { %2199 = vrot.lane.b32.xlu1 %v2067_v47, %s10138_s2  ;;  %v6394_v44 = vpop.f32.mrb[20].mxu0 }
 0x83e   :  { %v1980_v48 = vpop.f32.mrb[21].mxu0 }
 0x840   :  { %2189 = vrot.lane.b32.xlu0 %v6394_v44, %s7542_s4 }
 0x841   :  { %2187 = vrot.lane.b32.xlu1 %v1980_v48, %s7542_s4  ;;  %v6408_v4 = vpop.f32.mrb[22].mxu0 }
 0x842   :  { %v2154_v50 = vpop.f32.mrb[23].mxu0 }
 0x844   :  { %2205 = vrot.lane.b32.xlu0 %v6408_v4, %s10138_s2 }
 0x845   :  { %2203 = vrot.lane.b32.xlu1 %v2154_v50, %s10138_s2 }
 0x896   :  { %v2170_v56 = vpop.permute.xlu0 %2169 }
 0x897   :  { %v2168_v51 = vpop.permute.xlu1 %2167  ;;  %v2212_v62 = vsel %vm130_vm0, %v6359_v49, %v2170_v56 }
 0x898   :  { %v2211_v61 = vsel %vm130_vm0, %v1545_v16, %v2168_v51 }
 0x89e   :  { %v2186_v9 = vpop.permute.xlu0 %2185 }
 0x89f   :  { %v2184_v38 = vpop.permute.xlu1 %2183  ;;  %v2216_v5 = vsel %vm582_vm10, %v2212_v62, %v2186_v9  ;;  %v2419_v9 = vld [vmem:[%s10120_s14 + $0x8] sm:$0xff] }
 0x8a0   :  { %v2215_v0 = vsel %vm582_vm10, %v2211_v61, %v2184_v38  ;;  %v2421_v38 = vld [vmem:[%s10120_s14 + $0x18] sm:$0xff]  ;;  %v2420_v61 = vld [vmem:[%s10120_s14 + $0x10] sm:$0xff]  ;;  %v2423_v62 = vld [vmem:[%s10120_s14 + $0x28] sm:$0xff] }
 0x8a2   :  { %v2174_v8 = vpop.permute.xlu0 %2173 }
 0x8a3   :  { %v2172_v59 = vpop.permute.xlu1 %2171  ;;  %v2214_v11 = vsel %vm130_vm0, %v8178_v17, %v2174_v8  ;;  %v6681_v8 = vpack.c.bf16 %v2421_v38, %v2419_v9 }
 0x8a4   :  { %v2213_v10 = vsel %vm130_vm0, %v8180_v18, %v2172_v59  ;;  %v2418_v59 = vld [vmem:[%s10120_s14] sm:$0xff] }
 0x8a5   :  { %6682 = vmatprep.subr.bf16.mxu0 %v6681_v8  ;;  %v2619_v8 = vld [vmem:[%s10123_s16] sm:$0xff] }
 0x8ae   :  { %v2202_v22 = vpop.permute.xlu0 %2201 }
 0x8af   :  { %v2200_v1 = vpop.permute.xlu1 %2199  ;;  %v2221_v21 = vsel %vm2219_vm12, %v2216_v5, %v2202_v22  ;;  %v6683_v22 = vpack.c.bf16 %v2420_v61, %v2418_v59  ;;  %v2422_v5 = vld [vmem:[%s10120_s14 + $0x20] sm:$0xff]  ;;  %v2620_v59 = vld [vmem:[%s10123_s16 + $0x8] sm:$0xff] }
 0x8b0   :  { %v2220_v6 = vsel %vm2219_vm12, %v2215_v0, %v2200_v1  ;;  %v2425_v0 = vld [vmem:[%s10120_s14 + $0x38] sm:$0xff]  ;;  %v6699_v61 = vpack.c.bf16 %v2620_v59, %v2619_v8 }
 0x8b1   :  { %6425 = vmatprep.mubr.msk.f32.mxu0 %vm347_vm7, %v2220_v6  ;;  %v6685_v1 = vpack.c.bf16 %v2425_v0, %v2423_v62  ;;  %v2424_v6 = vld [vmem:[%s10120_s14 + $0x30] sm:$0xff]  ;;  %v2638_v62 = vld [vmem:[%s10123_s16 + $0x98] sm:$0xff] }
 0x8b2   :  { %6426 = vmatmul.mubr.msk.f32.vlgmr.msra.gmra.mrb[24].mxu0 %vm347_vm7, %v2221_v21  ;;  %v2190_v41 = vpop.permute.xlu0 %2189  ;;  %v6687_v21 = vpack.c.bf16 %v2424_v6, %v2422_v5  ;;  %v2622_v5 = vld [vmem:[%s10123_s16 + $0x18] sm:$0xff] }
 0x8b3   :  { %v2188_v7 = vpop.permute.xlu1 %2187  ;;  %v2218_v13 = vsel %vm582_vm10, %v2214_v11, %v2190_v41  ;;  %6684 = vmatpush1.bf16.msra.mxu0 %v6683_v22  ;;  %v2427_v41 = vld [vmem:[%s10120_s14 + $0x48] sm:$0xff]  ;;  %v2428_v11 = vld [vmem:[%s10120_s14 + $0x50] sm:$0xff] }
 0x8b4   :  { %v2217_v12 = vsel %vm582_vm10, %v2213_v10, %v2188_v7  ;;  %6686 = vmatprep.subr.bf16.mxu0 %v6685_v1  ;;  %v2429_v7 = vld [vmem:[%s10120_s14 + $0x58] sm:$0xff]  ;;  %v2637_v22 = vld [vmem:[%s10123_s16 + $0x90] sm:$0xff] }
 0x8b5   :  { %v6689_v10 = vpack.c.bf16 %v2429_v7, %v2427_v41  ;;  %v6701_v0 = vpack.c.bf16 %v2638_v62, %v2637_v22  ;;  %v2621_v1 = vld [vmem:[%s10123_s16 + $0x10] sm:$0xff]  ;;  %v2640_v41 = vld [vmem:[%s10123_s16 + $0xa8] sm:$0xff] }
 0x8b6   :  { %v2206_v60 = vpop.permute.xlu0 %2205  ;;  %v6703_v6 = vpack.c.bf16 %v2622_v5, %v2621_v1 }
 0x8b7   :  { %v2204_v58 = vpop.permute.xlu1 %2203  ;;  %v2223_v14 = vsel %vm2219_vm12, %v2218_v13, %v2206_v60  ;;  %6688 = vmatpush1.bf16.msra.mxu0 %v6687_v21  ;;  %v2426_v60 = vld [vmem:[%s10120_s14 + $0x40] sm:$0xff]  ;;  %v2433_v13 = vld [vmem:[%s10120_s14 + $0x78] sm:$0xff] }
 0x8b8   :  { %v2222_v42 = vsel %vm2219_vm12, %v2217_v12, %v2204_v58  ;;  %v6691_v12 = vpack.c.bf16 %v2428_v11, %v2426_v60  ;;  %6690 = vmatprep.subr.bf16.mxu0 %v6689_v10  ;;  %v2431_v58 = vld [vmem:[%s10120_s14 + $0x68] sm:$0xff]  ;;  %v2639_v21 = vld [vmem:[%s10123_s16 + $0xa0] sm:$0xff] }
 0x8b9   :  { %6428 = vmatprep.mubr.msk.f32.mxu0 %vm347_vm7, %v2222_v42  ;;  %v6693_v42 = vpack.c.bf16 %v2433_v13, %v2431_v58  ;;  %v6705_v7 = vpack.c.bf16 %v2640_v41, %v2639_v21  ;;  %v2623_v10 = vld [vmem:[%s10123_s16 + $0x20] sm:$0xff]  ;;  %v2624_v60 = vld [vmem:[%s10123_s16 + $0x28] sm:$0xff]  ;;  %v2642_v58 = vld [vmem:[%s10123_s16 + $0xb8] sm:$0xff] }
 0x8ba   :  { %6429 = vmatmul.mubr.msk.f32.gmra.mrb[26].mxu0 %vm347_vm7, %v2223_v14  ;;  %v2430_v14 = vld [vmem:[%s10120_s14 + $0x60] sm:$0xff]  ;;  %v6707_v11 = vpack.c.bf16 %v2624_v60, %v2623_v10 }
 0x8bb   :  { %2522 = vmatprep.mubr.f32.mxu0 %v7540_v15  ;;  %6692 = vmatpush1.bf16.msra.mxu0 %v6691_v12  ;;  %v2641_v12 = vld [vmem:[%s10123_s16 + $0xb0] sm:$0xff] }
 0x8bc   :  { %6694 = vmatprep.subr.bf16.mxu0 %v6693_v42  ;;  %v6709_v13 = vpack.c.bf16 %v2642_v58, %v2641_v12  ;;  %v2625_v42 = vld [vmem:[%s10123_s16 + $0x30] sm:$0xff] }
 0x985   :  { %v6427_v37 = vpop.f32.mrb[24].mxu0 }
 0x986   :  { %v2330_v46 = vadd.f32 %v6427_v37, %v7731_v24  ;;  %v2310_v49 = vpop.f32.mrb[25].mxu0  ;;  %v2432_v37 = vld [vmem:[%s10120_s14 + $0x70] sm:$0xff] }
 0x987   :  { %v2329_v16 = vadd.f32 %v2310_v49, %v7733_v26 }
 0x988   :  { %v8242_v17 = vadd.f32 %v5886_v45, %v2330_v46 }
 0x989   :  { %v8244_v18 = vadd.f32 %v5886_v45, %v2329_v16 }
 0x98a   :  { %v2349_v43 = vsel %vm347_vm7, %v8242_v17, 0.0 }
 0x98b   :  { %2350 = vadd.xlane.f32.xlu0 %v2349_v43  ;;  %v2346_v52 = vsel %vm347_vm7, %v8244_v18, 0.0 }
 0x98c   :  { %2347 = vadd.xlane.f32.xlu1 %v2346_v52 }
 0x98d   :  { %v6430_v19 = vpop.f32.mrb[26].mxu0 }
 0x98e   :  { %v2332_v28 = vadd.f32 %v6430_v19, %v7741_v34  ;;  %v2320_v63 = vpop.f32.mrb[27].mxu0 }
 0x98f   :  { %v2331_v24 = vadd.f32 %v2320_v63, %v7739_v33 }
 0x990   :  { %v8252_v40 = vadd.f32 %v5886_v45, %v2332_v28 }
 0x991   :  { %v8254_v26 = vadd.f32 %v5886_v45, %v2331_v24  ;;  %v6695_v45 = vpack.c.bf16 %v2432_v37, %v2430_v14  ;;  %v2626_v14 = vld [vmem:[%s10123_s16 + $0x38] sm:$0xff] }
 0x992   :  { %v2355_v20 = vsel %vm347_vm7, %v8252_v40, 0.0  ;;  %v6711_v37 = vpack.c.bf16 %v2626_v14, %v2625_v42 }
 0x993   :  { %2356 = vadd.xlane.f32.xlu1 %v2355_v20  ;;  %v2352_v2 = vsel %vm347_vm7, %v8254_v26, 0.0  ;;  %6696 = vmatpush1.bf16.msra.mxu0 %v6695_v45  ;;  %v2643_v45 = vld [vmem:[%s10123_s16 + $0xc0] sm:$0xff] }
 0x994   :  { %2353 = vadd.xlane.f32.xlu0 %v2352_v2 }
 0xa18   :  { %v2351_v32 = vpop.xlane.xlu0 %2350 }
 0xa19   :  { %v2359_v3 = vmul.f32 0.015625, %v2351_v32  ;;  %v2348_v23 = vpop.xlane.xlu1 %2347 }
 0xa1a   :  { %v2358_v25 = vmul.f32 0.015625, %v2348_v23 }
 0xa1b   :  { %v8261_v34 = vsub.f32 %v8242_v17, %v2359_v3 }
 0xa1c   :  { %v8264_v33 = vsub.f32 %v8244_v18, %v2358_v25  ;;  %v5887_v25 = vld [vmem:[%s10121_s12] ss:$0 sm:$0xff] }
 0xa1d   :  { %v2367_v36 = vmul.f32 %v8261_v34, %v8261_v34 }
 0xa1e   :  { %v2366_v31 = vmul.f32 %v8264_v33, %v8264_v33 }
 0xa1f   :  { %v2373_v27 = vsel %vm347_vm7, %v2367_v36, 0.0 }
 0xa20   :  { %2374 = vadd.xlane.f32.xlu1 %v2373_v27  ;;  %v2357_v30 = vpop.xlane.xlu1 %2356  ;;  %v2370_v29 = vsel %vm347_vm7, %v2366_v31, 0.0  ;;  %v5888_v27 = vld [vmem:[%s10122_s13] ss:$0 sm:$0xff] }
 0xa21   :  { %v2361_v35 = vmul.f32 0.015625, %v2357_v30  ;;  %2371 = vadd.xlane.f32.xlu0 %v2370_v29  ;;  %v2354_v39 = vpop.xlane.xlu0 %2353 }
 0xa22   :  { %v2360_v47 = vmul.f32 0.015625, %v2354_v39 }
 0xa23   :  { %v8273_v44 = vsub.f32 %v8252_v40, %v2361_v35 }
 0xa24   :  { %v8276_v48 = vsub.f32 %v8254_v26, %v2360_v47 }
 0xa25   :  { %v2369_v4 = vmul.f32 %v8273_v44, %v8273_v44 }
 0xa26   :  { %v2368_v50 = vmul.f32 %v8276_v48, %v8276_v48 }
 0xa27   :  { %v2379_v56 = vsel %vm347_vm7, %v2369_v4, 0.0 }
 0xa28   :  { %2380 = vadd.xlane.f32.xlu1 %v2379_v56  ;;  %v2376_v51 = vsel %vm347_vm7, %v2368_v50, 0.0 }
 0xa29   :  { %2377 = vadd.xlane.f32.xlu0 %v2376_v51 }
 0xaad   :  { %v2375_v46 = vpop.xlane.xlu1 %2374 }
 0xaae   :  { %v2383_v49 = vmul.f32 0.015625, %v2375_v46  ;;  %v2372_v16 = vpop.xlane.xlu0 %2371  ;;  %v2644_v46 = vld [vmem:[%s10123_s16 + $0xc8] sm:$0xff] }
 0xaaf   :  { %v2382_v43 = vmul.f32 0.015625, %v2372_v16  ;;  %v2627_v16 = vld [vmem:[%s10123_s16 + $0x40] sm:$0xff] }
 0xab0   :  { %v2387_v52 = vadd.f32 1e-05, %v2383_v49  ;;  %v6713_v49 = vpack.c.bf16 %v2644_v46, %v2643_v45 }
 0xab1   :  { %v2386_v19 = vadd.f32 1e-05, %v2382_v43  ;;  %v2628_v43 = vld [vmem:[%s10123_s16 + $0x48] sm:$0xff] }
 0xab2   :  { %7417 = vrsqrt.f32 %v2387_v52  ;;  %v6715_v52 = vpack.c.bf16 %v2628_v43, %v2627_v16 }
 0xab3   :  { %7419 = vrsqrt.f32 %v2386_v19  ;;  %v2645_v19 = vld [vmem:[%s10123_s16 + $0xd0] sm:$0xff] }
 0xab5   :  { %v2381_v28 = vpop.xlane.xlu1 %2380 }
 0xab6   :  { %v2385_v63 = vmul.f32 0.015625, %v2381_v28  ;;  %v2378_v24 = vpop.xlane.xlu0 %2377  ;;  %v2646_v28 = vld [vmem:[%s10123_s16 + $0xd8] sm:$0xff] }
 0xab7   :  { %v2384_v20 = vmul.f32 0.015625, %v2378_v24  ;;  %v2629_v24 = vld [vmem:[%s10123_s16 + $0x50] sm:$0xff] }
 0xab8   :  { %v2389_v2 = vadd.f32 1e-05, %v2385_v63  ;;  %v6717_v63 = vpack.c.bf16 %v2646_v28, %v2645_v19 }
 0xab9   :  { %v2388_v32 = vadd.f32 1e-05, %v2384_v20  ;;  %v2630_v20 = vld [vmem:[%s10123_s16 + $0x58] sm:$0xff] }
 0xaba   :  { %7421 = vrsqrt.f32 %v2389_v2  ;;  %v6719_v2 = vpack.c.bf16 %v2630_v20, %v2629_v24 }
 0xabb   :  { %7423 = vrsqrt.f32 %v2388_v32  ;;  %v2647_v32 = vld [vmem:[%s10123_s16 + $0xe0] sm:$0xff] }
 0xabc   :  { %v7418_v3 = vpop.eup %7417 }
 0xabd   :  { %v7420_v23 = vpop.eup %7419  ;;  %v2395_v31 = vmul.f32 %v7418_v3, %v8261_v34  ;;  %v2648_v3 = vld [vmem:[%s10123_s16 + $0xe8] sm:$0xff] }
 0xabe   :  { %v2394_v36 = vmul.f32 %v7420_v23, %v8264_v33  ;;  %v6721_v23 = vpack.c.bf16 %v2648_v3, %v2647_v32 }
 0xabf   :  { %v2405_v35 = vmul.f32 %v5887_v25, %v2395_v31 }
 0xac0   :  { %v2404_v30 = vmul.f32 %v5887_v25, %v2394_v36  ;;  %v2632_v36 = vld [vmem:[%s10123_s16 + $0x68] sm:$0xff] }
 0xac1   :  { %v2415_v4 = vadd.f32 %v5888_v27, %v2405_v35 }
 0xac2   :  { %v2414_v29 = vadd.f32 %v5888_v27, %v2404_v30  ;;  %v2650_v30 = vld [vmem:[%s10123_s16 + $0xf8] sm:$0xff] }
 0xac4   :  { %v7422_v39 = vpop.eup %7421  ;;  %5889 = vmatmul.mubr.msk.f32.vlgmr.msra.gmra.mrb[28].mxu0 %vm347_vm7, %v2414_v29  ;;  %v2633_v29 = vld [vmem:[%s10123_s16 + $0x70] sm:$0xff] }
 0xac5   :  { %v7424_v47 = vpop.eup %7423  ;;  %2528 = vmatprep.mubr.f32.mxu0 %v7540_v15  ;;  %v2397_v33 = vmul.f32 %v7422_v39, %v8273_v44  ;;  %v2635_v44 = vld [vmem:[%s10123_s16 + $0x80] sm:$0xff]  ;;  %v2634_v39 = vld [vmem:[%s10123_s16 + $0x78] sm:$0xff] }
 0xac6   :  { %v2396_v50 = vmul.f32 %v7424_v47, %v8276_v48  ;;  %v2636_v48 = vld [vmem:[%s10123_s16 + $0x88] sm:$0xff]  ;;  %v6727_v47 = vpack.c.bf16 %v2634_v39, %v2633_v29 }
 0xac7   :  { %v2407_v51 = vmul.f32 %v5887_v25, %v2397_v33  ;;  %v6697_v38 = vpack.c.bf16 %v2636_v48, %v2635_v44 }
 0xac8   :  { %5890 = vmatmul.mubr.msk.f32.gmra.mrb[30].mxu0 %vm347_vm7, %v2415_v4  ;;  %v2406_v34 = vmul.f32 %v5887_v25, %v2396_v50  ;;  %v2631_v25 = vld [vmem:[%s10123_s16 + $0x60] sm:$0xff] }
 0xac9   :  { %2534 = vmatprep.mubr.f32.mxu0 %v7540_v15  ;;  %v2417_v9 = vadd.f32 %v5888_v27, %v2407_v51  ;;  %6698 = vmatprep.subr.bf16.mxu1 %v6697_v38  ;;  %v6723_v31 = vpack.c.bf16 %v2632_v36, %v2631_v25  ;;  %v2434_v4 = vld [vmem:[%s10124_s15] sm:$0x3] }
 0xaca   :  { %v2416_v56 = vadd.f32 %v5888_v27, %v2406_v34  ;;  %6700 = vmatpush3.bf16.msra.mxu1 %v6699_v61  ;;  %v2649_v27 = vld [vmem:[%s10123_s16 + $0xf0] sm:$0xff]  ;;  %v2439_v50 = vrot.slane %v2434_v4, %v7840_v55  ;;  %v2443_v33 = vrot.slane %v2434_v4, %v7847_v57 }
 0xacb   :  { %6702 = vmatprep.subr.bf16.mxu1 %v6701_v0  ;;  %v6725_v35 = vpack.c.bf16 %v2650_v30, %v2649_v27 }
 0xacc   :  { %5891 = vmatmul.mubr.msk.f32.gmra.mrb[32].mxu0 %vm347_vm7, %v2416_v56 }
 0xacd   :  { %2540 = vmatprep.mubr.f32.mxu0 %v7540_v15 }
 0xace   :  { %6704 = vmatpush3.bf16.msra.mxu1 %v6703_v6 }
 0xacf   :  { %6706 = vmatprep.subr.bf16.mxu1 %v6705_v7 }
 0xad0   :  { %5892 = vmatmul.mubr.msk.f32.gmra.mrb[34].mxu0 %vm347_vm7, %v2417_v9 }
 0xad1   :  { %2933 = vmatprep.mubr.f32.mxu0 %v7540_v15 }
 0xad2   :  { %6708 = vmatpush3.bf16.msra.mxu1 %v6707_v11 }
 0xad3   :  { %6710 = vmatprep.subr.bf16.mxu1 %v6709_v13 }
 0xad6   :  { %6712 = vmatpush3.bf16.msra.mxu1 %v6711_v37 }
 0xad7   :  { %6714 = vmatprep.subr.bf16.mxu1 %v6713_v49 }
 0xada   :  { %6716 = vmatpush3.bf16.msra.mxu1 %v6715_v52 }
 0xadb   :  { %6718 = vmatprep.subr.bf16.mxu1 %v6717_v63 }
 0xade   :  { %6720 = vmatpush3.bf16.msra.mxu1 %v6719_v2 }
 0xadf   :  { %6722 = vmatprep.subr.bf16.mxu1 %v6721_v23 }
 0xae2   :  { %6724 = vmatpush3.bf16.msra.mxu1 %v6723_v31 }
 0xae3   :  { %6726 = vmatprep.subr.bf16.mxu1 %v6725_v35 }
 0xae6   :  { %6728 = vmatpush3.bf16.msra.mxu1 %v6727_v47 }
 0xb97   :  { %v2524_v34 = vpop.f32.mrb[28].mxu0 }
 0xb98   :  { %v8451_v56 = vadd.f32 %v2524_v34, %v2439_v50  ;;  %v2526_v51 = vpop.f32.mrb[29].mxu0 }
 0xb99   :  { %v8453_v9 = vadd.f32 %v2526_v51, %v2443_v33 }
 0xb9a   :  { %v2547_v44 = vmul.f32 %v8451_v56, %v8451_v56 }
 0xb9b   :  { %v2548_v48 = vmul.f32 %v8453_v9, %v8453_v9  ;;  %v2530_v38 = vpop.f32.mrb[30].mxu0 }
 0xb9c   :  { %v2555_v8 = vmul.f32 %v2547_v44, %v8451_v56  ;;  %v8460_v59 = vadd.f32 %v2530_v38, %v2439_v50  ;;  %v2532_v61 = vpop.f32.mrb[31].mxu0 }
 0xb9d   :  { %v2556_v22 = vmul.f32 %v2548_v48, %v8453_v9  ;;  %v8463_v62 = vadd.f32 %v2532_v61, %v2443_v33 }
 0xb9e   :  { %v2563_v0 = vmul.f32 0.044715, %v2555_v8  ;;  %v2549_v1 = vmul.f32 %v8460_v59, %v8460_v59 }
 0xb9f   :  { %v2564_v5 = vmul.f32 0.044715, %v2556_v22  ;;  %v2550_v6 = vmul.f32 %v8463_v62, %v8463_v62  ;;  %v2536_v21 = vpop.f32.mrb[32].mxu0 }
 0xba0   :  { %v2571_v41 = vadd.f32 %v2563_v0, %v8451_v56  ;;  %v2557_v7 = vmul.f32 %v2549_v1, %v8460_v59  ;;  %v8471_v10 = vadd.f32 %v2536_v21, %v2439_v50  ;;  %v2538_v60 = vpop.f32.mrb[33].mxu0 }
 0xba1   :  { %v2572_v11 = vadd.f32 %v2564_v5, %v8453_v9  ;;  %v2558_v12 = vmul.f32 %v2550_v6, %v8463_v62  ;;  %v8475_v58 = vadd.f32 %v2538_v60, %v2443_v33 }
 0xba2   :  { %v2579_v13 = vmul.f32 0.7978846, %v2571_v41  ;;  %v2565_v42 = vmul.f32 0.044715, %v2557_v7  ;;  %v2551_v14 = vmul.f32 %v8471_v10, %v8471_v10 }
 0xba3   :  { %v2580_v37 = vmul.f32 0.7978846, %v2572_v11  ;;  %v2566_v45 = vmul.f32 0.044715, %v2558_v12  ;;  %v2552_v46 = vmul.f32 %v8475_v58, %v8475_v58  ;;  %v2542_v49 = vpop.f32.mrb[34].mxu0 }
 0xba4   :  { %7425 = vtanh.f32 %v2579_v13  ;;  %v2573_v16 = vadd.f32 %v2565_v42, %v8460_v59  ;;  %v2559_v43 = vmul.f32 %v2551_v14, %v8471_v10  ;;  %v8483_v52 = vadd.f32 %v2542_v49, %v2439_v50  ;;  %v2544_v19 = vpop.f32.mrb[35].mxu0 }
 0xba5   :  { %v2574_v28 = vadd.f32 %v2566_v45, %v8463_v62  ;;  %v2560_v63 = vmul.f32 %v2552_v46, %v8475_v58  ;;  %v2545_v24 = vadd.f32 %v2544_v19, %v2443_v33  ;;  %7427 = vtanh.f32 %v2580_v37 }
 0xba6   :  { %v2581_v20 = vmul.f32 0.7978846, %v2573_v16  ;;  %v2567_v2 = vmul.f32 0.044715, %v2559_v43  ;;  %v2553_v32 = vmul.f32 %v8483_v52, %v8483_v52 }
 0xba7   :  { %v2582_v3 = vmul.f32 0.7978846, %v2574_v28  ;;  %v2568_v23 = vmul.f32 0.044715, %v2560_v63  ;;  %v2554_v25 = vmul.f32 %v2545_v24, %v2545_v24 }
 0xba8   :  { %v2575_v36 = vadd.f32 %v2567_v2, %v8471_v10  ;;  %v2561_v31 = vmul.f32 %v2553_v32, %v8483_v52  ;;  %7429 = vtanh.f32 %v2581_v20  ;;  %v5893_v32 = vld [vmem:[%s10125_s17] ss:$0 sm:$0xff] }
 0xba9   :  { %v2576_v27 = vadd.f32 %v2568_v23, %v8475_v58  ;;  %v2562_v30 = vmul.f32 %v2554_v25, %v2545_v24  ;;  %7431 = vtanh.f32 %v2582_v3 }
 0xbaa   :  { %v2583_v29 = vmul.f32 0.7978846, %v2575_v36  ;;  %v2569_v35 = vmul.f32 0.044715, %v2561_v31 }
 0xbab   :  { %v2584_v39 = vmul.f32 0.7978846, %v2576_v27  ;;  %v2570_v47 = vmul.f32 0.044715, %v2562_v30 }
 0xbac   :  { %v2577_v4 = vadd.f32 %v2569_v35, %v8483_v52  ;;  %7433 = vtanh.f32 %v2583_v29 }
 0xbad   :  { %v2578_v50 = vadd.f32 %v2570_v47, %v2545_v24  ;;  %7435 = vtanh.f32 %v2584_v39 }
 0xbae   :  { %v7426_v33 = vpop.eup %7425  ;;  %v2585_v34 = vmul.f32 0.7978846, %v2577_v4 }
 0xbaf   :  { %v7428_v51 = vpop.eup %7427  ;;  %v2586_v44 = vmul.f32 0.7978846, %v2578_v50  ;;  %v2595_v48 = vadd.f32 1.0, %v7426_v33 }
 0xbb0   :  { %v2596_v38 = vadd.f32 1.0, %v7428_v51  ;;  %7437 = vtanh.f32 %v2585_v34 }
 0xbb1   :  { %v2603_v8 = vmul.f32 0.5, %v2595_v48  ;;  %7439 = vtanh.f32 %v2586_v44 }
 0xbb2   :  { %v7430_v61 = vpop.eup %7429  ;;  %v2604_v22 = vmul.f32 0.5, %v2596_v38 }
 0xbb3   :  { %v7432_v0 = vpop.eup %7431  ;;  %v2597_v1 = vadd.f32 1.0, %v7430_v61  ;;  %v2611_v21 = vmul.f32 %v2603_v8, %v8451_v56 }
 0xbb4   :  { %v2612_v5 = vmul.f32 %v2604_v22, %v8453_v9  ;;  %v2598_v6 = vadd.f32 1.0, %v7432_v0 }
 0xbb5   :  { %v2605_v41 = vmul.f32 0.5, %v2597_v1 }
 0xbb6   :  { %v7434_v7 = vpop.eup %7433  ;;  %2715 = vmatprep.mubr.f32.mxu1 %v2612_v5  ;;  %v2606_v60 = vmul.f32 0.5, %v2598_v6 }
 0xbb7   :  { %v7436_v11 = vpop.eup %7435  ;;  %2716 = vmatmul.mubr.f32.vlgmr.msra.gmra.mrb[20].mxu1 %v2611_v21  ;;  %v2599_v12 = vadd.f32 1.0, %v7434_v7  ;;  %v2613_v14 = vmul.f32 %v2605_v41, %v8460_v59 }
 0xbb8   :  { %v2614_v13 = vmul.f32 %v2606_v60, %v8463_v62  ;;  %v2600_v42 = vadd.f32 1.0, %v7436_v11 }
 0xbb9   :  { %v2607_v37 = vmul.f32 0.5, %v2599_v12 }
 0xbba   :  { %v7438_v45 = vpop.eup %7437  ;;  %2720 = vmatprep.mubr.f32.mxu1 %v2614_v13  ;;  %v2608_v46 = vmul.f32 0.5, %v2600_v42  ;;  %v5899_v42 = vld [vmem:[%s10151_s27 + $0x88] sm:$0xff] }
 0xbbb   :  { %v7440_v9 = vpop.eup %7439  ;;  %2721 = vmatmul.mubr.f32.gmra.mrb[22].mxu1 %v2613_v14  ;;  %v2601_v49 = vadd.f32 1.0, %v7438_v45  ;;  %v2615_v43 = vmul.f32 %v2607_v37, %v8471_v10  ;;  %v5901_v14 = vld [vmem:[%s10151_s27 + $0x98] sm:$0xff]  ;;  %v5898_v45 = vld [vmem:[%s10151_s27 + $0x80] sm:$0xff] }
 0xbbc   :  { %v2616_v56 = vmul.f32 %v2608_v46, %v8475_v58  ;;  %v2602_v16 = vadd.f32 1.0, %v7440_v9  ;;  %v6729_v37 = vpack.c.bf16 %v5901_v14, %v5899_v42  ;;  %v5900_v46 = vld [vmem:[%s10151_s27 + $0x90] sm:$0xff] }
 0xbbd   :  { %v2609_v19 = vmul.f32 0.5, %v2601_v49  ;;  %v6731_v9 = vpack.c.bf16 %v5900_v46, %v5898_v45  ;;  %v5903_v49 = vld [vmem:[%s10151_s27 + $0xa8] sm:$0xff] }
 0xbbe   :  { %2725 = vmatprep.mubr.f32.mxu1 %v2616_v56  ;;  %v2610_v28 = vmul.f32 0.5, %v2602_v16  ;;  %6730 = vmatprep.subr.bf16.mxu0 %v6729_v37  ;;  %v5905_v56 = vld [vmem:[%s10151_s27 + $0xb8] sm:$0xff] }
 0xbbf   :  { %2726 = vmatmul.mubr.f32.gmra.mrb[24].mxu1 %v2615_v43  ;;  %v2617_v63 = vmul.f32 %v2609_v19, %v8483_v52  ;;  %6732 = vmatpush1.bf16.msra.mxu0 %v6731_v9  ;;  %v6733_v16 = vpack.c.bf16 %v5905_v56, %v5903_v49  ;;  %v5902_v43 = vld [vmem:[%s10151_s27 + $0xa0] sm:$0xff]  ;;  %v5904_v19 = vld [vmem:[%s10151_s27 + $0xb0] sm:$0xff] }
 0xbc0   :  { %v2618_v62 = vmul.f32 %v2610_v28, %v2545_v24  ;;  %v6735_v28 = vpack.c.bf16 %v5904_v19, %v5902_v43 }
 0xbc1   :  { %6734 = vmatprep.subr.bf16.mxu0 %v6733_v16 }
 0xbc2   :  { %2730 = vmatprep.mubr.f32.mxu1 %v2618_v62  ;;  %v5907_v62 = vld [vmem:[%s10151_s27 + $0xc8] sm:$0xff] }
 0xbc3   :  { %2731 = vmatmul.mubr.f32.gmra.mrb[26].mxu1 %v2617_v63  ;;  %6736 = vmatpush1.bf16.msra.mxu0 %v6735_v28  ;;  %v5909_v63 = vld [vmem:[%s10151_s27 + $0xd8] sm:$0xff] }
 0xc8a   :  { %v6155_v59 = vpop.f32.mrb[20].mxu1 }
 0xc8b   :  { %v6156_v20 = vpop.f32.mrb[21].mxu1 }
 0xc8c   :  { %v6157_v2 = vadd.f32 %v6156_v20, %v6155_v59  ;;  %v6737_v59 = vpack.c.bf16 %v5909_v63, %v5907_v62  ;;  %v5906_v20 = vld [vmem:[%s10151_s27 + $0xc0] sm:$0xff] }
 0xc8e   :  { %v2736_v58 = vadd.f32 %v6157_v2, %v8244_v18  ;;  %v6158_v3 = vpop.f32.mrb[22].mxu1  ;;  %v5908_v2 = vld [vmem:[%s10151_s27 + $0xd0] sm:$0xff]  ;;  %6738 = vmatprep.subr.bf16.mxu0 %v6737_v59 }
 0xc8f   :  { %v6159_v10 = vpop.f32.mrb[23].mxu1 }
 0xc90   :  { %v8504_v23 = vadd.f32 %v5893_v32, %v2736_v58  ;;  %v6160_v25 = vadd.f32 %v6159_v10, %v6158_v3  ;;  %v5911_v58 = vld [vmem:[%s10151_s27 + $0xe8] sm:$0xff]  ;;  %v5913_v3 = vld [vmem:[%s10151_s27 + $0xf8] sm:$0xff] }
 0xc91   :  { %v6741_v10 = vpack.c.bf16 %v5913_v3, %v5911_v58 }
 0xc92   :  { %v2737_v24 = vadd.f32 %v6160_v25, %v8242_v17  ;;  %v6161_v36 = vpop.f32.mrb[24].mxu1  ;;  %v2755_v52 = vsel %vm347_vm7, %v8504_v23, 0.0  ;;  %v5910_v25 = vld [vmem:[%s10151_s27 + $0xe0] sm:$0xff] }
 0xc93   :  { %2756 = vadd.xlane.f32.xlu0 %v2755_v52  ;;  %v6162_v31 = vpop.f32.mrb[25].mxu1 }
 0xc94   :  { %v8509_v27 = vadd.f32 %v5893_v32, %v2737_v24  ;;  %v6163_v30 = vadd.f32 %v6162_v31, %v6161_v36  ;;  %v5912_v24 = vld [vmem:[%s10151_s27 + $0xf0] sm:$0xff] }
 0xc95   :  { %v6743_v36 = vpack.c.bf16 %v5912_v24, %v5910_v25 }
 0xc96   :  { %v2738_v29 = vadd.f32 %v6163_v30, %v8254_v26  ;;  %v6164_v35 = vpop.f32.mrb[26].mxu1  ;;  %v2758_v18 = vsel %vm347_vm7, %v8509_v27, 0.0 }
 0xc97   :  { %2759 = vadd.xlane.f32.xlu1 %v2758_v18  ;;  %v6165_v39 = vpop.f32.mrb[27].mxu1 }
 0xc98   :  { %v8514_v47 = vadd.f32 %v5893_v32, %v2738_v29  ;;  %v6166_v17 = vadd.f32 %v6165_v39, %v6164_v35 }
 0xc9a   :  { %v2739_v4 = vadd.f32 %v6166_v17, %v8252_v40  ;;  %v2761_v50 = vsel %vm347_vm7, %v8514_v47, 0.0 }
 0xc9b   :  { %2762 = vadd.xlane.f32.xlu0 %v2761_v50 }
 0xc9c   :  { %v8519_v33 = vadd.f32 %v5893_v32, %v2739_v4  ;;  %v6739_v32 = vpack.c.bf16 %v5908_v2, %v5906_v20 }
 0xc9e   :  { %v2764_v26 = vsel %vm347_vm7, %v8519_v33, 0.0  ;;  %6740 = vmatpush1.bf16.msra.mxu0 %v6739_v32 }
 0xc9f   :  { %2765 = vadd.xlane.f32.xlu1 %v2764_v26  ;;  %6742 = vmatprep.subr.bf16.mxu0 %v6741_v10 }
 0xca2   :  { %6744 = vmatpush1.bf16.msra.mxu0 %v6743_v36 }
 0xd20   :  { %v2757_v34 = vpop.xlane.xlu0 %2756 }
 0xd21   :  { %v2767_v51 = vmul.f32 0.015625, %v2757_v34 }
 0xd23   :  { %v8524_v44 = vsub.f32 %v8504_v23, %v2767_v51  ;;  %v5896_v51 = vld [vmem:[%s10115_s6 + $0x1] ss:$0 sm:$0xff] }
 0xd24   :  { %v2760_v48 = vpop.xlane.xlu1 %2759 }
 0xd25   :  { %v2768_v38 = vmul.f32 0.015625, %v2760_v48  ;;  %v2775_v40 = vmul.f32 %v8524_v44, %v8524_v44 }
 0xd27   :  { %v8529_v8 = vsub.f32 %v8509_v27, %v2768_v38  ;;  %v2779_v61 = vsel %vm347_vm7, %v2775_v40, 0.0  ;;  %v5897_v40 = vld [vmem:[%s10116_s7 + $0x1] ss:$0 sm:$0xff] }
 0xd28   :  { %2780 = vadd.xlane.f32.xlu0 %v2779_v61  ;;  %v2763_v22 = vpop.xlane.xlu0 %2762 }
 0xd29   :  { %v2769_v0 = vmul.f32 0.015625, %v2763_v22  ;;  %v2776_v1 = vmul.f32 %v8529_v8, %v8529_v8 }
 0xd2b   :  { %v8535_v5 = vsub.f32 %v8514_v47, %v2769_v0  ;;  %v2782_v6 = vsel %vm347_vm7, %v2776_v1, 0.0 }
 0xd2c   :  { %2783 = vadd.xlane.f32.xlu1 %v2782_v6  ;;  %v2766_v21 = vpop.xlane.xlu1 %2765 }
 0xd2d   :  { %v2770_v41 = vmul.f32 0.015625, %v2766_v21  ;;  %v2777_v7 = vmul.f32 %v8535_v5, %v8535_v5 }
 0xd2f   :  { %v8541_v60 = vsub.f32 %v8519_v33, %v2770_v41  ;;  %v2785_v11 = vsel %vm347_vm7, %v2777_v7, 0.0 }
 0xd30   :  { %2786 = vadd.xlane.f32.xlu0 %v2785_v11 }
 0xd31   :  { %v2778_v12 = vmul.f32 %v8541_v60, %v8541_v60 }
 0xd33   :  { %v2788_v13 = vsel %vm347_vm7, %v2778_v12, 0.0 }
 0xd34   :  { %2789 = vadd.xlane.f32.xlu1 %v2788_v13 }
 0xdb5   :  { %v2781_v52 = vpop.xlane.xlu0 %2780 }
 0xdb6   :  { %v2791_v31 = vmul.f32 0.015625, %v2781_v52 }
 0xdb8   :  { %v2795_v30 = vadd.f32 1e-05, %v2791_v31 }
 0xdb9   :  { %v2784_v29 = vpop.xlane.xlu1 %2783 }
 0xdba   :  { %7441 = vrsqrt.f32 %v2795_v30  ;;  %v2792_v35 = vmul.f32 0.015625, %v2784_v29 }
 0xdbc   :  { %v2796_v18 = vadd.f32 1e-05, %v2792_v35 }
 0xdbd   :  { %v2787_v39 = vpop.xlane.xlu0 %2786 }
 0xdbe   :  { %7443 = vrsqrt.f32 %v2796_v18  ;;  %v2793_v17 = vmul.f32 0.015625, %v2787_v39 }
 0xdc0   :  { %v2797_v4 = vadd.f32 1e-05, %v2793_v17 }
 0xdc1   :  { %v2790_v50 = vpop.xlane.xlu1 %2789 }
 0xdc2   :  { %7445 = vrsqrt.f32 %v2797_v4  ;;  %v2794_v26 = vmul.f32 0.015625, %v2790_v50 }
 0xdc4   :  { %v7442_v34 = vpop.eup %7441  ;;  %v2798_v48 = vadd.f32 1e-05, %v2794_v26 }
 0xdc5   :  { %v2803_v38 = vmul.f32 %v7442_v34, %v8524_v44 }
 0xdc6   :  { %7447 = vrsqrt.f32 %v2798_v48 }
 0xdc7   :  { %v2813_v61 = vmul.f32 %v5896_v51, %v2803_v38 }
 0xdc8   :  { %v7444_v22 = vpop.eup %7443 }
 0xdc9   :  { %v2823_v0 = vadd.f32 %v5897_v40, %v2813_v61  ;;  %v2804_v1 = vmul.f32 %v7444_v22, %v8529_v8 }
 0xdcb   :  { %5915 = vmatmul.mubr.msk.f32.vlgmr.msra.gmra.mrb[36].mxu0 %vm347_vm7, %v2823_v0  ;;  %v2814_v6 = vmul.f32 %v5896_v51, %v2804_v1 }
 0xdcc   :  { %v7446_v21 = vpop.eup %7445  ;;  %2939 = vmatprep.mubr.f32.mxu0 %v7540_v15 }
 0xdcd   :  { %v2824_v41 = vadd.f32 %v5897_v40, %v2814_v6  ;;  %v2805_v7 = vmul.f32 %v7446_v21, %v8535_v5  ;;  %v5914_v5 = vld [vmem:[%s10117_s9 + $0x2] sm:$0x3]  ;;  %s10154_s9 = smov 96  }
 0xdce   :  { %v2850_v14 = vrot.slane %v5914_v5, %v7840_v55  ;;  %v2854_v46 = vrot.slane %v5914_v5, %v7847_v57 }
 0xdcf   :  { %5916 = vmatmul.mubr.msk.f32.gmra.mrb[38].mxu0 %vm347_vm7, %v2824_v41  ;;  %v2815_v44 = vmul.f32 %v5896_v51, %v2805_v7 }
 0xdd0   :  { %v7448_v11 = vpop.eup %7447  ;;  %2945 = vmatprep.mubr.f32.mxu0 %v7540_v15 }
 0xdd1   :  { %v2825_v12 = vadd.f32 %v5897_v40, %v2815_v44  ;;  %v2806_v13 = vmul.f32 %v7448_v11, %v8541_v60 }
 0xdd3   :  { %5917 = vmatmul.mubr.msk.f32.gmra.mrb[40].mxu0 %vm347_vm7, %v2825_v12  ;;  %v2816_v8 = vmul.f32 %v5896_v51, %v2806_v13 }
 0xdd4   :  { %2951 = vmatprep.mubr.f32.mxu0 %v7540_v15 }
 0xdd5   :  { %v2826_v42 = vadd.f32 %v5897_v40, %v2816_v8 }
 0xdd7   :  { %5918 = vmatmul.mubr.msk.f32.gmra.mrb[42].mxu0 %vm347_vm7, %v2826_v42 }
 0xe9e   :  { %v2935_v37 = vpop.f32.mrb[36].mxu0 }
 0xe9f   :  { %v2936_v45 = vadd.f32 %v2935_v37, %v2850_v14  ;;  %v2937_v9 = vpop.f32.mrb[37].mxu0 }
 0xea0   :  { %v2938_v49 = vadd.f32 %v2937_v9, %v2854_v46 }
 0xea1   :  { %2974 = vrot.lane.b32.xlu1 %v2936_v45, %s7542_s4  ;;  %2962 = vrot.lane.b32.xlu0 %v2936_v45, %s7541_s23 }
 0xea2   :  { %6435 = vmatprep.mubr.msk.f32.mxu0 %vm130_vm0, %v2936_v45  ;;  %v2941_v60 = vpop.f32.mrb[38].mxu0 }
 0xea3   :  { %v8620_v56 = vadd.f32 %v2941_v60, %v2850_v14  ;;  %v2943_v16 = vpop.f32.mrb[39].mxu0 }
 0xea4   :  { %v2944_v19 = vadd.f32 %v2943_v16, %v2854_v46 }
 0xea5   :  { %2964 = vrot.lane.b32.xlu1 %v8620_v56, %s7541_s23  ;;  %2976 = vrot.lane.b32.xlu0 %v2938_v49, %s7542_s4  ;;  %v7246_v3 = vpack.i.bf16 %v8620_v56, %v2936_v45 }
 0xea6   :  { %v2947_v43 = vpop.f32.mrb[40].mxu0 }
 0xea7   :  { %v2949_v28 = vpop.f32.mrb[41].mxu0  ;;  %v8628_v63 = vadd.f32 %v2947_v43, %v2850_v14 }
 0xea8   :  { %v2950_v59 = vadd.f32 %v2949_v28, %v2854_v46 }
 0xea9   :  { %2978 = vrot.lane.b32.xlu1 %v8620_v56, %s7542_s4  ;;  %2980 = vrot.lane.b32.xlu0 %v2944_v19, %s7542_s4 }
 0xeaa   :  { %v2953_v62 = vpop.f32.mrb[42].mxu0 }
 0xeab   :  { %v2955_v20 = vpop.f32.mrb[43].mxu0  ;;  %v8633_v2 = vadd.f32 %v2953_v62, %v2850_v14 }
 0xeac   :  { %v2956_v32 = vadd.f32 %v2955_v20, %v2854_v46 }
 0xead   :  { %2984 = vrot.lane.b32.xlu0 %v2950_v59, %s7542_s4  ;;  %2966 = vrot.lane.b32.xlu1 %v8628_v63, %s7541_s23  ;;  %v7251_v58 = vpack.i.bf16 %v8633_v2, %v8628_v63 }
 0xeb1   :  { %2968 = vrot.lane.b32.xlu0 %v8633_v2, %s7541_s23  ;;  %2982 = vrot.lane.b32.xlu1 %v8628_v63, %s7542_s4 }
 0xeb5   :  { %2988 = vrot.lane.b32.xlu0 %v2956_v32, %s7542_s4  ;;  %2986 = vrot.lane.b32.xlu1 %v8633_v2, %s7542_s4 }
 0xeb9   :  { %2996 = vrot.lane.b32.xlu0 %v2944_v19, %s7543_s24  ;;  %2994 = vrot.lane.b32.xlu1 %v2938_v49, %s7543_s24 }
 0xebd   :  { %3000 = vrot.lane.b32.xlu0 %v2956_v32, %s7543_s24  ;;  %2998 = vrot.lane.b32.xlu1 %v2950_v59, %s7543_s24 }
 0xec1   :  { %7252 = vrot.lane.b32.xlu0 %v7251_v58, %s7543_s24  ;;  %7247 = vrot.lane.b32.xlu1 %v7246_v3, %s7543_s24 }
 0xf13   :  { %v2975_v10 = vpop.permute.xlu1 %2974  ;;  %v2963_v25 = vpop.permute.xlu0 %2962 }
 0xf14   :  { %6449 = vmatprep.mubr.msk.f32.mxu1 %vm130_vm0, %v2963_v25 }
 0xf17   :  { %v8652_v24 = vpop.permute.xlu1 %2964  ;;  %v2977_v36 = vpop.permute.xlu0 %2976 }
 0xf18   :  { %v7256_v52 = vpack.i.bf16 %v8652_v24, %v2963_v25  ;;  %v2990_v29 = vsel %vm582_vm10, %v2975_v10, %v2977_v36 }
 0xf1a   :  { %7257 = vrot.lane.b32.xlu1 %v7256_v52, %s7543_s24 }
 0xf1b   :  { %v2979_v31 = vpop.permute.xlu1 %2978  ;;  %v2981_v30 = vpop.permute.xlu0 %2980 }
 0xf1c   :  { %v8658_v35 = vsel %vm582_vm10, %v2979_v31, %v2981_v30 }
 0xf1d   :  { %v7266_v18 = vpack.i.bf16 %v8658_v35, %v2990_v29 }
 0xf1f   :  { %v2967_v39 = vpop.permute.xlu1 %2966  ;;  %7267 = vrot.lane.b32.xlu1 %v7266_v18, %s7543_s24  ;;  %v2985_v17 = vpop.permute.xlu0 %2984 }
 0xf23   :  { %v2983_v4 = vpop.permute.xlu1 %2982  ;;  %v8662_v50 = vpop.permute.xlu0 %2968 }
 0xf24   :  { %v8665_v26 = vpack.i.bf16 %v8662_v50, %v2967_v39  ;;  %v8670_v48 = vsel %vm582_vm10, %v2983_v4, %v2985_v17 }
 0xf26   :  { %7262 = vrot.lane.b32.xlu0 %v8665_v26, %s7543_s24 }
 0xf27   :  { %v2987_v34 = vpop.permute.xlu1 %2986  ;;  %v2989_v51 = vpop.permute.xlu0 %2988 }
 0xf28   :  { %v8673_v38 = vsel %vm582_vm10, %v2987_v34, %v2989_v51 }
 0xf29   :  { %v8677_v40 = vpack.i.bf16 %v8673_v38, %v8670_v48 }
 0xf2b   :  { %v2995_v61 = vpop.permute.xlu1 %2994  ;;  %7272 = vrot.lane.b32.xlu0 %v8677_v40, %s7543_s24  ;;  %v8681_v22 = vpop.permute.xlu0 %2996 }
 0xf2c   :  { %v8684_v0 = vpack.i.bf16 %v8681_v22, %v2995_v61 }
 0xf2e   :  { %7277 = vrot.lane.b32.xlu1 %v8684_v0, %s7543_s24 }
 0xf2f   :  { %v8688_v1 = vpop.permute.xlu1 %2998  ;;  %v8690_v6 = vpop.permute.xlu0 %3000 }
 0xf30   :  { %v8694_v21 = vpack.i.bf16 %v8690_v6, %v8688_v1 }
 0xf32   :  { %7292 = vrot.lane.b32.xlu1 %v7256_v52, %s10154_s9  ;;  %7282 = vrot.lane.b32.xlu0 %v8694_v21, %s7543_s24  ;;  %s7547_s24 = smov 64  }
 0xf33   :  { %v7248_v41 = vpop.permute.xlu1 %7247  ;;  %v7253_v7 = vpop.permute.xlu0 %7252 }
 0xf34   :  { %v7250_v44 = vunpack.i.h.bf16 %v7248_v41  ;;  %v7249_v11 = vunpack.i.l.bf16 %v7248_v41  ;;  %v7255_v12 = vunpack.i.h.bf16 %v7253_v7  ;;  %v7254_v13 = vunpack.i.l.bf16 %v7253_v7 }
 0xf36   :  { %v6745_v8 = vpack.c.bf16 %v7250_v44, %v7249_v11  ;;  %7297 = vrot.lane.b32.xlu1 %v7251_v58, %s10154_s9  ;;  %7287 = vrot.lane.b32.xlu0 %v7246_v3, %s10154_s9  ;;  %v6751_v42 = vpack.c.bf16 %v7255_v12, %v7254_v13 }
 0xf38   :  { %6747 = vmatprep.subr.msk.bf16.mxu0 %vm7937_vm11, %v6745_v8 }
 0xf39   :  { %6750 = vmatpush3.bf16.xpose.msk.msra.mxu0 %vm7937_vm11, %v6745_v8 }
 0xf3a   :  { %7302 = vrot.lane.b32.xlu0 %v7266_v18, %s10154_s9  ;;  %6753 = vmatprep.subr.msk.bf16.mxu0 %vm7937_vm11, %v6751_v42 }
 0xf40   :  { %6436 = vmatmul.mubr.msk.f32.vlgmr.msra.gmra.mrb[44].mxu0 %vm130_vm0, %v8620_v56 }
 0xf41   :  { %6756 = vmatpush3.bf16.xpose.msk.msra.mxu0 %vm7937_vm11, %v6751_v42  ;;  %6442 = vmatprep.mubr.msk.f32.mxu0 %vm130_vm0, %v8628_v63 }
 0xf48   :  { %6443 = vmatmul.mubr.msk.f32.vlgmr.msra.gmra.mrb[46].mxu0 %vm130_vm0, %v8633_v2 }
 0xf49   :  { %6456 = vmatprep.mubr.msk.f32.mxu0 %vm130_vm0, %v2967_v39 }
 0xf8c   :  { %v7258_v5 = vpop.permute.xlu1 %7257 }
 0xf8d   :  { %v7260_v14 = vunpack.i.h.bf16 %v7258_v5  ;;  %v7259_v37 = vunpack.i.l.bf16 %v7258_v5 }
 0xf8f   :  { %v6757_v45 = vpack.c.bf16 %v7260_v14, %v7259_v37 }
 0xf91   :  { %6759 = vmatprep.subr.msk.bf16.mxu1 %vm7937_vm11, %v6757_v45  ;;  %v7268_v46 = vpop.permute.xlu1 %7267 }
 0xf92   :  { %v7270_v9 = vunpack.i.h.bf16 %v7268_v46  ;;  %v7269_v60 = vunpack.i.l.bf16 %v7268_v46  ;;  %6762 = vmatpush3.bf16.xpose.msk.msra.mxu1 %vm7937_vm11, %v6757_v45 }
 0xf94   :  { %v6769_v49 = vpack.c.bf16 %v7270_v9, %v7269_v60 }
 0xf96   :  { %6771 = vmatprep.subr.msk.bf16.mxu1 %vm7937_vm11, %v6769_v49 }
 0xf98   :  { %v7263_v56 = vpop.permute.xlu0 %7262 }
 0xf99   :  { %v7265_v16 = vunpack.i.h.bf16 %v7263_v56  ;;  %v7264_v43 = vunpack.i.l.bf16 %v7263_v56  ;;  %6450 = vmatmul.mubr.msk.f32.vlgmr.msra.gmra.mrb[28].mxu1 %vm130_vm0, %v8652_v24 }
 0xf9a   :  { %6774 = vmatpush3.bf16.xpose.msk.msra.mxu1 %vm7937_vm11, %v6769_v49  ;;  %6463 = vmatprep.mubr.msk.f32.mxu1 %vm130_vm0, %v2990_v29 }
 0xf9b   :  { %v6763_v19 = vpack.c.bf16 %v7265_v16, %v7264_v43 }
 0xf9d   :  { %v7273_v28 = vpop.permute.xlu0 %7272  ;;  %6765 = vmatprep.subr.msk.bf16.mxu0 %vm7937_vm11, %v6763_v19 }
 0xf9e   :  { %v7275_v62 = vunpack.i.h.bf16 %v7273_v28  ;;  %v7274_v63 = vunpack.i.l.bf16 %v7273_v28  ;;  %6768 = vmatpush3.bf16.xpose.msk.msra.mxu0 %vm7937_vm11, %v6763_v19 }
 0xfa0   :  { %v6775_v59 = vpack.c.bf16 %v7275_v62, %v7274_v63  ;;  %v7278_v20 = vpop.permute.xlu1 %7277 }
 0xfa1   :  { %v7280_v2 = vunpack.i.h.bf16 %v7278_v20  ;;  %v7279_v32 = vunpack.i.l.bf16 %v7278_v20  ;;  %6464 = vmatmul.mubr.msk.f32.vlgmr.msra.gmra.mrb[30].mxu1 %vm130_vm0, %v8658_v35 }
 0xfa2   :  { %6777 = vmatprep.subr.msk.bf16.mxu0 %vm7937_vm11, %v6775_v59  ;;  %6477 = vmatprep.mubr.msk.f32.mxu1 %vm130_vm0, %v2995_v61 }
 0xfa3   :  { %v6781_v58 = vpack.c.bf16 %v7280_v2, %v7279_v32 }
 0xfa4   :  { %v7293_v3 = vpop.permute.xlu1 %7292  ;;  %v7283_v10 = vpop.permute.xlu0 %7282 }
 0xfa5   :  { %v7285_v25 = vunpack.i.h.bf16 %v7283_v10  ;;  %v7284_v24 = vunpack.i.l.bf16 %v7283_v10  ;;  %6457 = vmatmul.mubr.msk.f32.vlgmr.msra.gmra.mrb[48].mxu0 %vm130_vm0, %v8662_v50  ;;  %6783 = vmatprep.subr.msk.bf16.mxu1 %vm7937_vm11, %v6781_v58  ;;  %v7295_v35 = vunpack.i.h.bf16 %v7293_v3  ;;  %v7294_v18 = vunpack.i.l.bf16 %v7293_v3 }
 0xfa6   :  { %6780 = vmatpush3.bf16.xpose.msk.msra.mxu0 %vm7937_vm11, %v6775_v59  ;;  %6470 = vmatprep.mubr.msk.f32.mxu0 %vm130_vm0, %v8670_v48 }
 0xfa7   :  { %v6787_v36 = vpack.c.bf16 %v7285_v25, %v7284_v24  ;;  %6786 = vmatpush3.bf16.xpose.msk.msra.mxu1 %vm7937_vm11, %v6781_v58  ;;  %v8751_v50 = vpack.c.bf16 %v7295_v35, %v7294_v18 }
 0xfa8   :  { %v7298_v52 = vpop.permute.xlu1 %7297  ;;  %v7288_v31 = vpop.permute.xlu0 %7287 }
 0xfa9   :  { %v7290_v30 = vunpack.i.h.bf16 %v7288_v31  ;;  %v7289_v29 = vunpack.i.l.bf16 %v7288_v31  ;;  %6789 = vmatprep.subr.msk.bf16.mxu0 %vm7937_vm11, %v6787_v36  ;;  %v7300_v39 = vunpack.i.h.bf16 %v7298_v52  ;;  %v7299_v17 = vunpack.i.l.bf16 %v7298_v52 }
 0xfab   :  { %v6793_v4 = vpack.c.bf16 %v7290_v30, %v7289_v29  ;;  %v6797_v34 = vpack.c.bf16 %v7300_v39, %v7299_v17 }
 0xfac   :  { %v8818_v20 = vpop.permute.xlu0 %7302 }
 0xfad   :  { %6471 = vmatmul.mubr.msk.f32.vlgmr.msra.gmra.mrb[50].mxu0 %vm130_vm0, %v8673_v38  ;;  %6794 = vmatprep.subr.bf16.mxu1 %v6793_v4 }
 0xfae   :  { %6478 = vmatmul.mubr.msk.f32.vlgmr.msra.gmra.mrb[32].mxu1 %vm130_vm0, %v8681_v22  ;;  %6792 = vmatpush3.bf16.xpose.msk.msra.mxu0 %vm7937_vm11, %v6787_v36 }
 0xfaf   :  { %6484 = vmatprep.mubr.msk.f32.mxu0 %vm130_vm0, %v8688_v1  ;;  %6796 = vmatpush3.bf16.msra.mxu1 %v6793_v4 }
 0xfb0   :  { %6798 = vmatprep.subr.bf16.mxu0 %v6797_v34  ;;  %6802 = vmatprep.subr.bf16.mxu1 %v8751_v50 }
 0xfb5   :  { %6485 = vmatmul.mubr.msk.f32.vlgmr.msra.gmra.mrb[52].mxu0 %vm130_vm0, %v8690_v6 }
 0xfb6   :  { %6800 = vmatpush3.bf16.msra.mxu0 %v6797_v34 }
0x1013   :  { %v6437_v51 = vpop.f32.mrb[44].mxu0 }
0x1014   :  { %v3080_v48 = vpop.f32.mrb[45].mxu0  ;;  %v3701_v38 = vsel %vm130_vm0, %v6437_v51, -inf }
0x1015   :  { %3702 = vmax.xlane.f32.xlu0 %v3701_v38  ;;  %v3698_v61 = vsel %vm130_vm0, %v3080_v48, -inf }
0x1016   :  { %3699 = vmax.xlane.f32.xlu1 %v3698_v61 }
0x101b   :  { %v6444_v53 = vpop.f32.mrb[46].mxu0 }
0x101c   :  { %v3167_v22 = vpop.f32.mrb[47].mxu0  ;;  %v3707_v1 = vsel %vm130_vm0, %v6444_v53, -inf }
0x101d   :  { %3708 = vmax.xlane.f32.xlu0 %v3707_v1  ;;  %v3704_v41 = vsel %vm130_vm0, %v3167_v22, -inf }
0x1021   :  { %3705 = vmax.xlane.f32.xlu0 %v3704_v41 }
0x106c   :  { %v8766_v7 = vpop.f32.mrb[28].mxu1 }
0x106d   :  { %v8768_v6 = vpop.f32.mrb[29].mxu1  ;;  %v3713_v44 = vsel %vm130_vm0, %v8766_v7, -inf }
0x106e   :  { %3714 = vmax.xlane.f32.xlu1 %v3713_v44  ;;  %v3710_v11 = vsel %vm130_vm0, %v8768_v6, -inf }
0x106f   :  { %3711 = vmax.xlane.f32.xlu0 %v3710_v11 }
0x1074   :  { %v8774_v12 = vpop.f32.mrb[30].mxu1 }
0x1075   :  { %v8776_v13 = vpop.f32.mrb[31].mxu1  ;;  %v3725_v8 = vsel %vm130_vm0, %v8774_v12, -inf }
0x1076   :  { %3726 = vmax.xlane.f32.xlu1 %v3725_v8  ;;  %v3722_v14 = vsel %vm130_vm0, %v8776_v13, -inf }
0x1078   :  { %v8780_v42 = vpop.f32.mrb[48].mxu0 }
0x1079   :  { %v8782_v5 = vpop.f32.mrb[49].mxu0  ;;  %v3719_v37 = vsel %vm130_vm0, %v8780_v42, -inf }
0x107a   :  { %3723 = vmax.xlane.f32.xlu1 %v3722_v14  ;;  %3720 = vmax.xlane.f32.xlu0 %v3719_v37  ;;  %v3716_v45 = vsel %vm130_vm0, %v8782_v5, -inf }
0x107e   :  { %3717 = vmax.xlane.f32.xlu0 %v3716_v45 }
0x1080   :  { %v8790_v46 = vpop.f32.mrb[50].mxu0 }
0x1081   :  { %v8792_v9 = vpop.f32.mrb[32].mxu1  ;;  %v8794_v60 = vpop.f32.mrb[51].mxu0  ;;  %v3731_v43 = vsel %vm130_vm0, %v8790_v46, -inf }
0x1082   :  { %v8796_v49 = vpop.f32.mrb[33].mxu1  ;;  %v3737_v56 = vsel %vm130_vm0, %v8792_v9, -inf  ;;  %v3728_v16 = vsel %vm130_vm0, %v8794_v60, -inf }
0x1083   :  { %3738 = vmax.xlane.f32.xlu1 %v3737_v56  ;;  %3729 = vmax.xlane.f32.xlu0 %v3728_v16  ;;  %v3734_v62 = vsel %vm130_vm0, %v8796_v49, -inf }
0x1087   :  { %3732 = vmax.xlane.f32.xlu1 %v3731_v43 }
0x1088   :  { %v8804_v19 = vpop.f32.mrb[52].mxu0 }
0x1089   :  { %v8806_v28 = vpop.f32.mrb[53].mxu0  ;;  %v3743_v59 = vsel %vm130_vm0, %v8804_v19, -inf }
0x108a   :  { %v3740_v63 = vsel %vm130_vm0, %v8806_v28, -inf }
0x108b   :  { %3735 = vmax.xlane.f32.xlu1 %v3734_v62  ;;  %3741 = vmax.xlane.f32.xlu0 %v3740_v63 }
0x108f   :  { %3744 = vmax.xlane.f32.xlu1 %v3743_v59 }
0x10a0   :  { %7307 = vrot.lane.b32.xlu1 %v8665_v26, %s10154_s9 }
0x10a1   :  { %7312 = vrot.lane.b32.xlu0 %v8684_v0, %s10154_s9 }
0x10a2   :  { %v3703_v2 = vpop.xlane.xlu0 %3702 }
0x10a3   :  { %v3700_v32 = vpop.xlane.xlu1 %3699  ;;  %v3747_v10 = vsub.f32 %v6437_v51, %v3703_v2 }
0x10a4   :  { %v3746_v58 = vsub.f32 %v3080_v48, %v3700_v32 }
0x10a5   :  { %v3764_v52 = vmul.f32 1.442695, %v3747_v10 }
0x10a6   :  { %v3762_v25 = vmul.f32 1.442695, %v3746_v58 }
0x10a8   :  { %7449 = vpow2.f32 %v3762_v25 }
0x10a9   :  { %7451 = vpow2.f32 %v3764_v52 }
0x10aa   :  { %v3709_v3 = vpop.xlane.xlu0 %3708 }
0x10ab   :  { %v3749_v24 = vsub.f32 %v6444_v53, %v3709_v3 }
0x10ad   :  { %v3768_v31 = vmul.f32 1.442695, %v3749_v24 }
0x10ae   :  { %v3706_v36 = vpop.xlane.xlu0 %3705 }
0x10af   :  { %v3748_v30 = vsub.f32 %v3167_v22, %v3706_v36  ;;  %7453 = vpow2.f32 %v3768_v31 }
0x10b1   :  { %v3766_v26 = vmul.f32 1.442695, %v3748_v30 }
0x10b2   :  { %v8820_v29 = vpop.eup %7449 }
0x10b3   :  { %7455 = vpow2.f32 %v3766_v26  ;;  %v8822_v0 = vpop.eup %7451  ;;  %v3794_v35 = vsel %vm130_vm0, %v8820_v29, 0.0 }
0x10b4   :  { %v3797_v39 = vsel %vm130_vm0, %v8822_v0, 0.0 }
0x10b9   :  { %v8826_v18 = vpop.eup %7453 }
0x10ba   :  { %v3803_v17 = vsel %vm130_vm0, %v8826_v18, 0.0 }
0x10bd   :  { %v8832_v4 = vpop.eup %7455 }
0x10be   :  { %v3800_v34 = vsel %vm130_vm0, %v8832_v4, 0.0 }
0x10c0   :  { %3795 = vadd.xlane.f32.xlu0 %v3794_v35 }
0x10c4   :  { %3798 = vadd.xlane.f32.xlu1 %v3797_v39  ;;  %3804 = vadd.xlane.f32.xlu0 %v3803_v17 }
0x10c8   :  { %3801 = vadd.xlane.f32.xlu0 %v3800_v34 }
0x10fb   :  { %v3715_v51 = vpop.xlane.xlu1 %3714 }
0x10fc   :  { %v3751_v48 = vsub.f32 %v8766_v7, %v3715_v51  ;;  %v3712_v38 = vpop.xlane.xlu0 %3711 }
0x10fd   :  { %v3750_v61 = vsub.f32 %v8768_v6, %v3712_v38 }
0x10fe   :  { %v3772_v53 = vmul.f32 1.442695, %v3751_v48 }
0x10ff   :  { %v3770_v22 = vmul.f32 1.442695, %v3750_v61 }
0x1100   :  { %7457 = vpow2.f32 %v3772_v53 }
0x1101   :  { %7459 = vpow2.f32 %v3770_v22 }
0x1103   :  { %v3727_v1 = vpop.xlane.xlu1 %3726 }
0x1104   :  { %v3755_v41 = vsub.f32 %v8774_v12, %v3727_v1 }
0x1106   :  { %v3780_v44 = vmul.f32 1.442695, %v3755_v41 }
0x1107   :  { %v3724_v11 = vpop.xlane.xlu1 %3723  ;;  %v3721_v8 = vpop.xlane.xlu0 %3720 }
0x1108   :  { %7461 = vpow2.f32 %v3780_v44  ;;  %v3754_v14 = vsub.f32 %v8776_v13, %v3724_v11  ;;  %v3753_v37 = vsub.f32 %v8780_v42, %v3721_v8 }
0x110a   :  { %v8841_v45 = vpop.eup %7457  ;;  %v3778_v7 = vmul.f32 1.442695, %v3754_v14  ;;  %v3776_v56 = vmul.f32 1.442695, %v3753_v37 }
0x110b   :  { %v8843_v6 = vpop.eup %7459  ;;  %v3718_v16 = vpop.xlane.xlu0 %3717  ;;  %v3809_v43 = vsel %vm130_vm0, %v8841_v45, 0.0 }
0x110c   :  { %7463 = vpow2.f32 %v3778_v7  ;;  %v3752_v12 = vsub.f32 %v8782_v5, %v3718_v16  ;;  %3810 = vadd.xlane.f32.xlu1 %v3809_v43  ;;  %v3806_v62 = vsel %vm130_vm0, %v8843_v6, 0.0 }
0x110d   :  { %7465 = vpow2.f32 %v3776_v56  ;;  %3807 = vadd.xlane.f32.xlu0 %v3806_v62 }
0x110e   :  { %v3774_v13 = vmul.f32 1.442695, %v3752_v12 }
0x1110   :  { %7467 = vpow2.f32 %v3774_v13  ;;  %v3739_v42 = vpop.xlane.xlu1 %3738  ;;  %v3730_v63 = vpop.xlane.xlu0 %3729 }
0x1111   :  { %v3759_v59 = vsub.f32 %v8792_v9, %v3739_v42  ;;  %v3756_v2 = vsub.f32 %v8794_v60, %v3730_v63 }
0x1112   :  { %v8852_v32 = vpop.eup %7461 }
0x1113   :  { %v3788_v58 = vmul.f32 1.442695, %v3759_v59  ;;  %v3782_v3 = vmul.f32 1.442695, %v3756_v2  ;;  %v3821_v5 = vsel %vm130_vm0, %v8852_v32, 0.0  ;;  %v7305_v2 = vunpack.i.h.bf16 %v8818_v20 }
0x1114   :  { %v3733_v10 = vpop.xlane.xlu1 %3732  ;;  %3822 = vadd.xlane.f32.xlu1 %v3821_v5 }
0x1115   :  { %7469 = vpow2.f32 %v3788_v58  ;;  %v3757_v25 = vsub.f32 %v8790_v46, %v3733_v10  ;;  %v7304_v58 = vunpack.i.l.bf16 %v8818_v20 }
0x1116   :  { %v8857_v24 = vpop.eup %7463  ;;  %7471 = vpow2.f32 %v3782_v3 }
0x1117   :  { %v8859_v36 = vpop.eup %7465  ;;  %v3784_v9 = vmul.f32 1.442695, %v3757_v25  ;;  %v3818_v60 = vsel %vm130_vm0, %v8857_v24, 0.0  ;;  %v6809_v5 = vpack.c.bf16 %v7305_v2, %v7304_v58 }
0x1118   :  { %v3736_v52 = vpop.xlane.xlu1 %3735  ;;  %3819 = vadd.xlane.f32.xlu1 %v3818_v60  ;;  %v3815_v31 = vsel %vm130_vm0, %v8859_v36, 0.0  ;;  %v3742_v30 = vpop.xlane.xlu0 %3741 }
0x1119   :  { %7473 = vpow2.f32 %v3784_v9  ;;  %v3758_v26 = vsub.f32 %v8796_v49, %v3736_v52  ;;  %3816 = vadd.xlane.f32.xlu0 %v3815_v31  ;;  %v3760_v46 = vsub.f32 %v8806_v28, %v3742_v30 }
0x111a   :  { %v8867_v35 = vpop.eup %7467 }
0x111b   :  { %v3786_v39 = vmul.f32 1.442695, %v3758_v26  ;;  %v3790_v17 = vmul.f32 1.442695, %v3760_v46  ;;  %v3812_v34 = vsel %vm130_vm0, %v8867_v35, 0.0 }
0x111c   :  { %v3745_v51 = vpop.xlane.xlu1 %3744  ;;  %v7313_v43 = vpop.permute.xlu0 %7312 }
0x111d   :  { %7475 = vpow2.f32 %v3786_v39  ;;  %v3761_v48 = vsub.f32 %v8804_v19, %v3745_v51  ;;  %3813 = vadd.xlane.f32.xlu0 %v3812_v34  ;;  %v7315_v31 = vunpack.i.h.bf16 %v7313_v43  ;;  %v7314_v30 = vunpack.i.l.bf16 %v7313_v43 }
0x111e   :  { %7477 = vpow2.f32 %v3790_v17 }
0x111f   :  { %v8872_v38 = vpop.eup %7469  ;;  %v3792_v61 = vmul.f32 1.442695, %v3761_v48  ;;  %v6817_v46 = vpack.c.bf16 %v7315_v31, %v7314_v30  ;;  %v5973_v30 = vld [vmem:[%s10118_s10 + $0x70] sm:$0xff] }
0x1120   :  { %v8874_v49 = vpop.eup %7471  ;;  %v7308_v53 = vpop.permute.xlu1 %7307  ;;  %v3833_v28 = vsel %vm130_vm0, %v8872_v38, 0.0 }
0x1121   :  { %7479 = vpow2.f32 %v3792_v61  ;;  %v7310_v22 = vunpack.i.h.bf16 %v7308_v53  ;;  %v7309_v1 = vunpack.i.l.bf16 %v7308_v53  ;;  %3834 = vadd.xlane.f32.xlu1 %v3833_v28  ;;  %v3824_v41 = vsel %vm130_vm0, %v8874_v49, 0.0 }
0x1122   :  { %3825 = vadd.xlane.f32.xlu0 %v3824_v41 }
0x1123   :  { %v8880_v19 = vpop.eup %7473  ;;  %v6805_v44 = vpack.c.bf16 %v7310_v22, %v7309_v1 }
0x1124   :  { %v3827_v11 = vsel %vm130_vm0, %v8880_v19, 0.0 }
0x1125   :  { %3828 = vadd.xlane.f32.xlu1 %v3827_v11  ;;  %6806 = vmatprep.subr.bf16.mxu0 %v6805_v44 }
0x1127   :  { %v8884_v8 = vpop.eup %7475 }
0x1128   :  { %v8886_v14 = vpop.eup %7477  ;;  %v3830_v37 = vsel %vm130_vm0, %v8884_v8, 0.0 }
0x1129   :  { %3831 = vadd.xlane.f32.xlu1 %v3830_v37  ;;  %v3836_v7 = vsel %vm130_vm0, %v8886_v14, 0.0 }
0x112a   :  { %3837 = vadd.xlane.f32.xlu0 %v3836_v7 }
0x112b   :  { %v8892_v56 = vpop.eup %7479 }
0x112c   :  { %v3839_v16 = vsel %vm130_vm0, %v8892_v56, 0.0 }
0x112d   :  { %3840 = vadd.xlane.f32.xlu1 %v3839_v16 }
0x113e   :  { %7317 = vrot.lane.b32.xlu1 %v8677_v40, %s10154_s9 }
0x1140   :  { %7322 = vrot.lane.b32.xlu0 %v8694_v21, %s10154_s9 }
0x114d   :  { %v3796_v12 = vpop.xlane.xlu0 %3795 }
0x114e   :  { %7481 = vrcp.f32 %v3796_v12 }
0x1151   :  { %v3799_v62 = vpop.xlane.xlu1 %3798  ;;  %v3805_v13 = vpop.xlane.xlu0 %3804 }
0x1152   :  { %7483 = vrcp.f32 %v3799_v62 }
0x1153   :  { %7485 = vrcp.f32 %v3805_v13 }
0x1155   :  { %v3802_v42 = vpop.xlane.xlu0 %3801 }
0x1156   :  { %7487 = vrcp.f32 %v3802_v42 }
0x1158   :  { %v7482_v63 = vpop.eup %7481 }
0x1159   :  { %v3843_v59 = vmul.f32 %v7482_v63, %v8820_v29 }
0x115b   :  { %6491 = vmatprep.mubr.msk.f32.mxu1 %vm130_vm0, %v3843_v59 }
0x115c   :  { %v7484_v40 = vpop.eup %7483 }
0x115d   :  { %v3845_v21 = vmul.f32 %v7484_v40, %v8822_v0  ;;  %v7486_v3 = vpop.eup %7485 }
0x115e   :  { %v3849_v29 = vmul.f32 %v7486_v3, %v8826_v18 }
0x115f   :  { %6492 = vmatmul.mubr.msk.f32.vlgmr.msra.gmra.mrb[34].mxu1 %vm130_vm0, %v3845_v21 }
0x1160   :  { %v7488_v10 = vpop.eup %7487  ;;  %6804 = vmatpush3.bf16.msra.mxu1 %v8751_v50 }
0x1161   :  { %6810 = vmatprep.subr.bf16.mxu1 %v6809_v5  ;;  %v3847_v25 = vmul.f32 %v7488_v10, %v8832_v4 }
0x1163   :  { %6498 = vmatprep.mubr.msk.f32.mxu0 %vm130_vm0, %v3847_v25  ;;  %v5967_v25 = vld [vmem:[%s10118_s10 + $0x40] sm:$0xff] }
0x1164   :  { %6499 = vmatmul.mubr.msk.f32.vlgmr.msra.gmra.mrb[54].mxu0 %vm130_vm0, %v3849_v29 }
0x1165   :  { %6808 = vmatpush3.bf16.msra.mxu0 %v6805_v44 }
0x1199   :  { %v3811_v20 = vpop.xlane.xlu1 %3810 }
0x119a   :  { %7489 = vrcp.f32 %v3811_v20  ;;  %v3808_v0 = vpop.xlane.xlu0 %3807  ;;  %v5969_v20 = vld [vmem:[%s10118_s10 + $0x50] sm:$0xff] }
0x119b   :  { %7491 = vrcp.f32 %v3808_v0  ;;  %v5970_v0 = vld [vmem:[%s10118_s10 + $0x58] sm:$0xff] }
0x11a1   :  { %v3823_v9 = vpop.xlane.xlu1 %3822 }
0x11a2   :  { %7493 = vrcp.f32 %v3823_v9  ;;  %v5971_v9 = vld [vmem:[%s10118_s10 + $0x60] sm:$0xff] }
0x11a4   :  { %v7490_v60 = vpop.eup %7489 }
0x11a5   :  { %v7492_v52 = vpop.eup %7491  ;;  %v3820_v50 = vpop.xlane.xlu1 %3819  ;;  %v3853_v26 = vmul.f32 %v7490_v60, %v8841_v45  ;;  %v6829_v60 = vpack.c.bf16 %v5970_v0, %v5969_v20 }
0x11a6   :  { %7495 = vrcp.f32 %v3820_v50  ;;  %v3817_v4 = vpop.xlane.xlu0 %3816  ;;  %v3851_v18 = vmul.f32 %v7492_v52, %v8843_v6  ;;  %v5972_v52 = vld [vmem:[%s10118_s10 + $0x68] sm:$0xff]  ;;  %v5974_v50 = vld [vmem:[%s10118_s10 + $0x78] sm:$0xff] }
0x11a7   :  { %7497 = vrcp.f32 %v3817_v4  ;;  %v6833_v31 = vpack.c.bf16 %v5972_v52, %v5971_v9  ;;  %v6837_v4 = vpack.c.bf16 %v5974_v50, %v5973_v30 }
0x11a8   :  { %6505 = vmatprep.mubr.msk.f32.mxu1 %vm130_vm0, %v3851_v18 }
0x11a9   :  { %6506 = vmatmul.mubr.msk.f32.vlgmr.msra.gmra.mrb[36].mxu1 %vm130_vm0, %v3853_v26 }
0x11aa   :  { %6812 = vmatpush3.bf16.msra.mxu1 %v6809_v5  ;;  %v3814_v39 = vpop.xlane.xlu0 %3813 }
0x11ab   :  { %7499 = vrcp.f32 %v3814_v39  ;;  %6818 = vmatprep.subr.bf16.mxu1 %v6817_v46 }
0x11ac   :  { %v7494_v34 = vpop.eup %7493 }
0x11ad   :  { %v3861_v6 = vmul.f32 %v7494_v34, %v8852_v32 }
0x11ae   :  { %v3835_v17 = vpop.xlane.xlu1 %3834 }
0x11af   :  { %v3826_v51 = vpop.xlane.xlu0 %3825 }
0x11b0   :  { %v7496_v48 = vpop.eup %7495  ;;  %7501 = vrcp.f32 %v3826_v51 }
0x11b1   :  { %v3859_v61 = vmul.f32 %v7496_v48, %v8857_v24  ;;  %v7498_v53 = vpop.eup %7497  ;;  %7503 = vrcp.f32 %v3835_v17 }
0x11b2   :  { %v3829_v45 = vpop.xlane.xlu1 %3828  ;;  %v3857_v41 = vmul.f32 %v7498_v53, %v8859_v36 }
0x11b3   :  { %6519 = vmatprep.mubr.msk.f32.mxu1 %vm130_vm0, %v3859_v61 }
0x11b4   :  { %6520 = vmatmul.mubr.msk.f32.vlgmr.msra.gmra.mrb[38].mxu1 %vm130_vm0, %v3861_v6 }
0x11b5   :  { %v7500_v28 = vpop.eup %7499  ;;  %6820 = vmatpush3.bf16.msra.mxu1 %v6817_v46 }
0x11b6   :  { %v3832_v22 = vpop.xlane.xlu1 %3831  ;;  %v3855_v1 = vmul.f32 %v7500_v28, %v8867_v35 }
0x11b7   :  { %7505 = vrcp.f32 %v3832_v22  ;;  %v3838_v44 = vpop.xlane.xlu0 %3837 }
0x11b8   :  { %7507 = vrcp.f32 %v3829_v45  ;;  %6512 = vmatprep.mubr.msk.f32.mxu0 %vm130_vm0, %v3855_v1 }
0x11b9   :  { %7509 = vrcp.f32 %v3838_v44  ;;  %6513 = vmatmul.mubr.msk.f32.vlgmr.msra.gmra.mrb[56].mxu0 %vm130_vm0, %v3857_v41 }
0x11ba   :  { %v7502_v32 = vpop.eup %7501  ;;  %v3841_v24 = vpop.xlane.xlu1 %3840 }
0x11bb   :  { %v3863_v11 = vmul.f32 %v7502_v32, %v8874_v49  ;;  %7511 = vrcp.f32 %v3841_v24  ;;  %v7323_v37 = vpop.permute.xlu0 %7322  ;;  %v7504_v12 = vpop.eup %7503 }
0x11bc   :  { %v7325_v35 = vunpack.i.h.bf16 %v7323_v37  ;;  %v7324_v16 = vunpack.i.l.bf16 %v7323_v37  ;;  %v3869_v2 = vmul.f32 %v7504_v12, %v8872_v38 }
0x11bd   :  { %6526 = vmatprep.mubr.msk.f32.mxu0 %vm130_vm0, %v3863_v11 }
0x11be   :  { %v7318_v7 = vpop.permute.xlu1 %7317  ;;  %v6821_v58 = vpack.c.bf16 %v7325_v35, %v7324_v16 }
0x11bf   :  { %v7320_v36 = vunpack.i.h.bf16 %v7318_v7  ;;  %v7319_v43 = vunpack.i.l.bf16 %v7318_v7 }
0x11c1   :  { %v7506_v62 = vpop.eup %7505  ;;  %v6813_v13 = vpack.c.bf16 %v7320_v36, %v7319_v43 }
0x11c2   :  { %v7508_v42 = vpop.eup %7507  ;;  %v3867_v63 = vmul.f32 %v7506_v62, %v8884_v8 }
0x11c3   :  { %v7510_v59 = vpop.eup %7509  ;;  %6814 = vmatprep.subr.bf16.mxu0 %v6813_v13  ;;  %v3865_v49 = vmul.f32 %v7508_v42, %v8880_v19 }
0x11c4   :  { %6816 = vmatpush3.bf16.msra.mxu0 %v6813_v13  ;;  %6533 = vmatprep.mubr.msk.f32.mxu1 %vm130_vm0, %v3867_v63  ;;  %v3871_v21 = vmul.f32 %v7510_v59, %v8886_v14 }
0x11c5   :  { %6534 = vmatmul.mubr.msk.f32.vlgmr.msra.gmra.mrb[40].mxu1 %vm130_vm0, %v3869_v2  ;;  %6822 = vmatprep.subr.bf16.mxu0 %v6821_v58  ;;  %v7512_v40 = vpop.eup %7511 }
0x11c6   :  { %v3873_v38 = vmul.f32 %v7512_v40, %v8892_v56  ;;  %v5968_v56 = vld [vmem:[%s10118_s10 + $0x48] sm:$0xff]  ;;  %s10155_s10 = smov 48   ;;  %v5980_v40 = vld [vmem:[%s10119_s11 + $0x1] ss:$0 sm:$0xff] }
0x11c7   :  { %6527 = vmatmul.mubr.msk.f32.vlgmr.msra.gmra.mrb[58].mxu0 %vm130_vm0, %v3865_v49  ;;  %v6825_v29 = vpack.c.bf16 %v5968_v56, %v5967_v25 }
0x11c8   :  { %6824 = vmatpush3.bf16.msra.mxu0 %v6821_v58  ;;  %6540 = vmatprep.mubr.msk.f32.mxu0 %vm130_vm0, %v3871_v21 }
0x11c9   :  { %6826 = vmatprep.subr.bf16.mxu1 %v6825_v29 }
0x11ca   :  { %6828 = vmatpush3.bf16.msra.mxu1 %v6825_v29 }
0x11cb   :  { %6541 = vmatmul.mubr.msk.f32.vlgmr.msra.gmra.mrb[60].mxu0 %vm130_vm0, %v3873_v38  ;;  %6830 = vmatprep.subr.bf16.mxu1 %v6829_v60 }
0x11cc   :  { %4934 = vmatprep.mubr.f32.mxu0 %v7540_v15 }
0x11ce   :  { %6832 = vmatpush3.bf16.msra.mxu1 %v6829_v60 }
0x11cf   :  { %6834 = vmatprep.subr.bf16.mxu1 %v6833_v31 }
0x11d2   :  { %6836 = vmatpush3.bf16.msra.mxu1 %v6833_v31 }
0x11d3   :  { %6838 = vmatprep.subr.bf16.mxu1 %v6837_v4 }
0x11d6   :  { %6840 = vmatpush3.bf16.msra.mxu1 %v6837_v4 }
0x1232   :  { %v6493_v8 = vpop.f32.mrb[34].mxu1 }
0x1233   :  { %v3952_v3 = vpop.f32.mrb[35].mxu1 }
0x1237   :  { %v8936_v19 = vpop.f32.mrb[54].mxu0 }
0x1238   :  { %v8938_v5 = vpop.f32.mrb[55].mxu0 }
0x127c   :  { %v6507_v10 = vpop.f32.mrb[36].mxu1 }
0x127d   :  { %4576 = vrot.lane.b32.xlu0 %v6507_v10, %s7545_s29  ;;  %v4126_v14 = vpop.f32.mrb[37].mxu1 }
0x127e   :  { %4574 = vrot.lane.b32.xlu1 %v4126_v14, %s7545_s29 }
0x1287   :  { %v6521_v18 = vpop.f32.mrb[38].mxu1 }
0x1288   :  { %4592 = vrot.lane.b32.xlu0 %v6521_v18, %s7542_s4  ;;  %v4300_v26 = vpop.f32.mrb[39].mxu1 }
0x1289   :  { %4590 = vrot.lane.b32.xlu1 %v4300_v26, %s7542_s4 }
0x128c   :  { %v6514_v46 = vpop.f32.mrb[56].mxu0 }
0x128d   :  { %4580 = vrot.lane.b32.xlu0 %v6514_v46, %s7545_s29  ;;  %v4213_v39 = vpop.f32.mrb[57].mxu0 }
0x128e   :  { %4578 = vrot.lane.b32.xlu1 %v4213_v39, %s7545_s29 }
0x1298   :  { %v6535_v17 = vpop.f32.mrb[40].mxu1 }
0x1299   :  { %4608 = vrot.lane.b32.xlu0 %v6535_v17, %s10155_s10  ;;  %v4474_v34 = vpop.f32.mrb[41].mxu1 }
0x129a   :  { %v6528_v51 = vpop.f32.mrb[58].mxu0  ;;  %4606 = vrot.lane.b32.xlu1 %v4474_v34, %s10155_s10 }
0x129b   :  { %v4387_v48 = vpop.f32.mrb[59].mxu0 }
0x129d   :  { %4596 = vrot.lane.b32.xlu0 %v6528_v51, %s7542_s4 }
0x129e   :  { %v6542_v61 = vpop.f32.mrb[60].mxu0  ;;  %4594 = vrot.lane.b32.xlu1 %v4387_v48, %s7542_s4 }
0x129f   :  { %v4561_v6 = vpop.f32.mrb[61].mxu0 }
0x12a1   :  { %4612 = vrot.lane.b32.xlu0 %v6542_v61, %s10155_s10 }
0x12a2   :  { %4610 = vrot.lane.b32.xlu1 %v4561_v6, %s10155_s10 }
0x12ef   :  { %v4577_v45 = vpop.permute.xlu0 %4576 }
0x12f0   :  { %v4575_v53 = vpop.permute.xlu1 %4574  ;;  %v4619_v24 = vsel %vm130_vm0, %v6493_v8, %v4577_v45 }
0x12f1   :  { %v4618_v44 = vsel %vm130_vm0, %v3952_v3, %v4575_v53  ;;  %v5986_v53 = vld [vmem:[%s10120_s14 + $0x88] sm:$0xff] }
0x12fa   :  { %v4593_v28 = vpop.permute.xlu0 %4592 }
0x12fb   :  { %v4591_v22 = vpop.permute.xlu1 %4590  ;;  %v4623_v7 = vsel %vm582_vm10, %v4619_v24, %v4593_v28  ;;  %v5988_v28 = vld [vmem:[%s10120_s14 + $0x98] sm:$0xff] }
0x12fc   :  { %v4622_v11 = vsel %vm582_vm10, %v4618_v44, %v4591_v22  ;;  %v6841_v22 = vpack.c.bf16 %v5988_v28, %v5986_v53  ;;  %v5992_v24 = vld [vmem:[%s10120_s14 + $0xb8] sm:$0xff]  ;;  %v6006_v28 = vld [vmem:[%s10123_s16 + $0x100] sm:$0xff] }
0x12fe   :  { %6842 = vmatprep.subr.bf16.mxu0 %v6841_v22 }
0x12ff   :  { %v4581_v1 = vpop.permute.xlu0 %4580 }
0x1300   :  { %v4579_v41 = vpop.permute.xlu1 %4578  ;;  %v4621_v13 = vsel %vm130_vm0, %v8936_v19, %v4581_v1  ;;  %v5985_v1 = vld [vmem:[%s10120_s14 + $0x80] sm:$0xff] }
0x1301   :  { %v4620_v12 = vsel %vm130_vm0, %v8938_v5, %v4579_v41  ;;  %v5987_v41 = vld [vmem:[%s10120_s14 + $0x90] sm:$0xff]  ;;  %vm5193_vm0 = vcmask 1047559  }
0x1302   :  { %v6843_v44 = vpack.c.bf16 %v5987_v41, %v5985_v1  ;;  %v6024_v1 = vld [vmem:[%s10123_s16 + $0x190] sm:$0xff]  ;;  %v6025_v41 = vld [vmem:[%s10123_s16 + $0x198] sm:$0xff] }
0x1304   :  { %6844 = vmatpush1.bf16.msra.mxu0 %v6843_v44  ;;  %v6861_v44 = vpack.c.bf16 %v6025_v41, %v6024_v1 }
0x130b   :  { %v4609_v32 = vpop.permute.xlu0 %4608 }
0x130c   :  { %v4607_v37 = vpop.permute.xlu1 %4606  ;;  %v4627_v16 = vsel %vm2219_vm12, %v4623_v7, %v4609_v32  ;;  %v5990_v32 = vld [vmem:[%s10120_s14 + $0xa8] sm:$0xff]  ;;  %v5991_v7 = vld [vmem:[%s10120_s14 + $0xb0] sm:$0xff] }
0x130d   :  { %v4626_v35 = vsel %vm2219_vm12, %v4622_v11, %v4607_v37  ;;  %v6845_v11 = vpack.c.bf16 %v5992_v24, %v5990_v32  ;;  %v5989_v37 = vld [vmem:[%s10120_s14 + $0xa0] sm:$0xff]  ;;  %v6008_v32 = vld [vmem:[%s10123_s16 + $0x110] sm:$0xff]  ;;  %v6009_v24 = vld [vmem:[%s10123_s16 + $0x118] sm:$0xff] }
0x130e   :  { %6559 = vmatprep.mubr.msk.f32.mxu1 %vm347_vm7, %v4626_v35  ;;  %v6847_v35 = vpack.c.bf16 %v5991_v7, %v5989_v37  ;;  %v6026_v37 = vld [vmem:[%s10123_s16 + $0x1a0] sm:$0xff]  ;;  %v6027_v7 = vld [vmem:[%s10123_s16 + $0x1a8] sm:$0xff] }
0x130f   :  { %v4597_v36 = vpop.permute.xlu0 %4596  ;;  %6560 = vmatmul.mubr.msk.f32.vlgmr.msra.gmra.mrb[42].mxu1 %vm347_vm7, %v4627_v16  ;;  %6846 = vmatprep.subr.bf16.mxu0 %v6845_v11  ;;  %v5994_v16 = vld [vmem:[%s10120_s14 + $0xc8] sm:$0xff]  ;;  %v6863_v11 = vpack.c.bf16 %v6009_v24, %v6008_v32 }
0x1310   :  { %v4595_v43 = vpop.permute.xlu1 %4594  ;;  %v4625_v59 = vsel %vm582_vm10, %v4621_v13, %v4597_v36  ;;  %6848 = vmatpush1.bf16.msra.mxu0 %v6847_v35  ;;  %v5996_v36 = vld [vmem:[%s10120_s14 + $0xd8] sm:$0xff]  ;;  %v6865_v35 = vpack.c.bf16 %v6027_v7, %v6026_v37 }
0x1311   :  { %v4624_v42 = vsel %vm582_vm10, %v4620_v12, %v4595_v43  ;;  %v6849_v43 = vpack.c.bf16 %v5996_v36, %v5994_v16  ;;  %v5993_v12 = vld [vmem:[%s10120_s14 + $0xc0] sm:$0xff]  ;;  %v6011_v36 = vld [vmem:[%s10123_s16 + $0x128] sm:$0xff] }
0x1312   :  { %v6010_v16 = vld [vmem:[%s10123_s16 + $0x120] sm:$0xff] }
0x1313   :  { %v4613_v62 = vpop.permute.xlu0 %4612  ;;  %6850 = vmatprep.subr.bf16.mxu0 %v6849_v43  ;;  %v6867_v43 = vpack.c.bf16 %v6011_v36, %v6010_v16 }
0x1314   :  { %v4611_v63 = vpop.permute.xlu1 %4610  ;;  %v4629_v58 = vsel %vm2219_vm12, %v4625_v59, %v4613_v62  ;;  %v5995_v62 = vld [vmem:[%s10120_s14 + $0xd0] sm:$0xff]  ;;  %v5997_v59 = vld [vmem:[%s10120_s14 + $0xe0] sm:$0xff] }
0x1315   :  { %v4628_v2 = vsel %vm2219_vm12, %v4624_v42, %v4611_v63  ;;  %v6851_v13 = vpack.c.bf16 %v5995_v62, %v5993_v12  ;;  %v5998_v42 = vld [vmem:[%s10120_s14 + $0xe8] sm:$0xff]  ;;  %v6000_v63 = vld [vmem:[%s10120_s14 + $0xf8] sm:$0xff]  ;;  %v6028_v12 = vld [vmem:[%s10123_s16 + $0x1b0] sm:$0xff] }
0x1316   :  { %6562 = vmatprep.mubr.msk.f32.mxu1 %vm347_vm7, %v4628_v2  ;;  %v6853_v2 = vpack.c.bf16 %v6000_v63, %v5998_v42  ;;  %v6029_v62 = vld [vmem:[%s10123_s16 + $0x1b8] sm:$0xff]  ;;  %v6012_v42 = vld [vmem:[%s10123_s16 + $0x130] sm:$0xff] }
0x1317   :  { %6563 = vmatmul.mubr.msk.f32.gmra.mrb[44].mxu1 %vm347_vm7, %v4629_v58  ;;  %6852 = vmatpush1.bf16.msra.mxu0 %v6851_v13  ;;  %v5999_v58 = vld [vmem:[%s10120_s14 + $0xf0] sm:$0xff]  ;;  %v6869_v13 = vpack.c.bf16 %v6029_v62, %v6028_v12  ;;  %v6013_v63 = vld [vmem:[%s10123_s16 + $0x138] sm:$0xff] }
0x1318   :  { %6854 = vmatprep.subr.bf16.mxu0 %v6853_v2  ;;  %v6030_v2 = vld [vmem:[%s10123_s16 + $0x1c0] sm:$0xff] }
0x13e2   :  { %v6561_v49 = vpop.f32.mrb[42].mxu1 }
0x13e3   :  { %v4737_v21 = vadd.f32 %v6561_v49, %v8509_v27  ;;  %v4717_v38 = vpop.f32.mrb[43].mxu1  ;;  %v6855_v49 = vpack.c.bf16 %v5999_v58, %v5997_v59  ;;  %v6871_v59 = vpack.c.bf16 %v6013_v63, %v6012_v42  ;;  %v6031_v58 = vld [vmem:[%s10123_s16 + $0x1c8] sm:$0xff] }
0x13e4   :  { %v4736_v8 = vadd.f32 %v4717_v38, %v8504_v23 }
0x13e5   :  { %v8999_v3 = vadd.f32 %v5980_v40, %v4737_v21  ;;  %6856 = vmatpush1.bf16.msra.mxu0 %v6855_v49  ;;  %v6873_v49 = vpack.c.bf16 %v6031_v58, %v6030_v2 }
0x13e6   :  { %v9001_v19 = vadd.f32 %v5980_v40, %v4736_v8 }
0x13e7   :  { %v4759_v5 = vsel %vm347_vm7, %v8999_v3, 0.0 }
0x13e8   :  { %4760 = vadd.xlane.f32.xlu0 %v4759_v5  ;;  %v4756_v10 = vsel %vm347_vm7, %v9001_v19, 0.0 }
0x13e9   :  { %4757 = vadd.xlane.f32.xlu1 %v4756_v10 }
0x13ea   :  { %v6564_v14 = vpop.f32.mrb[44].mxu1 }
0x13eb   :  { %v4739_v25 = vadd.f32 %v6564_v14, %v8519_v33  ;;  %v4727_v56 = vpop.f32.mrb[45].mxu1 }
0x13ec   :  { %v4738_v27 = vadd.f32 %v4727_v56, %v8514_v47 }
0x13ed   :  { %v9009_v29 = vadd.f32 %v5980_v40, %v4739_v25 }
0x13ee   :  { %v9011_v23 = vadd.f32 %v5980_v40, %v4738_v27 }
0x13ef   :  { %v4765_v20 = vsel %vm347_vm7, %v9009_v29, 0.0 }
0x13f0   :  { %4766 = vadd.xlane.f32.xlu1 %v4765_v20  ;;  %v4762_v0 = vsel %vm347_vm7, %v9011_v23, 0.0 }
0x13f1   :  { %4763 = vadd.xlane.f32.xlu0 %v4762_v0 }
0x1475   :  { %v4761_v9 = vpop.xlane.xlu0 %4760 }
0x1476   :  { %v4769_v60 = vmul.f32 0.015625, %v4761_v9  ;;  %v4758_v52 = vpop.xlane.xlu1 %4757 }
0x1477   :  { %v4768_v31 = vmul.f32 0.015625, %v4758_v52  ;;  %v5983_v52 = vld [vmem:[%s10121_s12 + $0x1] ss:$0 sm:$0xff] }
0x1478   :  { %v9018_v33 = vsub.f32 %v8999_v3, %v4769_v60 }
0x1479   :  { %v9021_v47 = vsub.f32 %v9001_v19, %v4768_v31 }
0x147a   :  { %v4777_v30 = vmul.f32 %v9018_v33, %v9018_v33 }
0x147b   :  { %v4776_v50 = vmul.f32 %v9021_v47, %v9021_v47 }
0x147c   :  { %v4783_v4 = vsel %vm347_vm7, %v4777_v30, 0.0 }
0x147d   :  { %4784 = vadd.xlane.f32.xlu1 %v4783_v4  ;;  %v4767_v18 = vpop.xlane.xlu1 %4766  ;;  %v4780_v26 = vsel %vm347_vm7, %v4776_v50, 0.0  ;;  %v5984_v50 = vld [vmem:[%s10122_s13 + $0x1] ss:$0 sm:$0xff] }
0x147e   :  { %v4771_v46 = vmul.f32 0.015625, %v4767_v18  ;;  %v4764_v39 = vpop.xlane.xlu0 %4763  ;;  %4781 = vadd.xlane.f32.xlu0 %v4780_v26 }
0x147f   :  { %v4770_v17 = vmul.f32 0.015625, %v4764_v39 }
0x1480   :  { %v9030_v34 = vsub.f32 %v9009_v29, %v4771_v46 }
0x1481   :  { %v9033_v51 = vsub.f32 %v9011_v23, %v4770_v17 }
0x1482   :  { %v4779_v48 = vmul.f32 %v9030_v34, %v9030_v34 }
0x1483   :  { %v4778_v61 = vmul.f32 %v9033_v51, %v9033_v51 }
0x1484   :  { %v4789_v6 = vsel %vm347_vm7, %v4779_v48, 0.0 }
0x1485   :  { %4790 = vadd.xlane.f32.xlu1 %v4789_v6  ;;  %v4786_v45 = vsel %vm347_vm7, %v4778_v61, 0.0 }
0x1486   :  { %4787 = vadd.xlane.f32.xlu0 %v4786_v45 }
0x150a   :  { %v4785_v40 = vpop.xlane.xlu1 %4784 }
0x150b   :  { %v4793_v21 = vmul.f32 0.015625, %v4785_v40  ;;  %v4782_v38 = vpop.xlane.xlu0 %4781  ;;  %v6014_v40 = vld [vmem:[%s10123_s16 + $0x140] sm:$0xff] }
0x150c   :  { %v4792_v8 = vmul.f32 0.015625, %v4782_v38 }
0x150d   :  { %v4797_v5 = vadd.f32 1e-05, %v4793_v21  ;;  %v6015_v21 = vld [vmem:[%s10123_s16 + $0x148] sm:$0xff] }
0x150e   :  { %v4796_v10 = vadd.f32 1e-05, %v4792_v8  ;;  %v6875_v38 = vpack.c.bf16 %v6015_v21, %v6014_v40  ;;  %v6032_v8 = vld [vmem:[%s10123_s16 + $0x1d0] sm:$0xff] }
0x150f   :  { %7513 = vrsqrt.f32 %v4797_v5  ;;  %v6033_v5 = vld [vmem:[%s10123_s16 + $0x1d8] sm:$0xff] }
0x1510   :  { %7515 = vrsqrt.f32 %v4796_v10  ;;  %v6877_v10 = vpack.c.bf16 %v6033_v5, %v6032_v8 }
0x1512   :  { %v4791_v14 = vpop.xlane.xlu1 %4790 }
0x1513   :  { %v4795_v25 = vmul.f32 0.015625, %v4791_v14  ;;  %v4788_v56 = vpop.xlane.xlu0 %4787  ;;  %v6016_v14 = vld [vmem:[%s10123_s16 + $0x150] sm:$0xff] }
0x1514   :  { %v4794_v27 = vmul.f32 0.015625, %v4788_v56 }
0x1515   :  { %v4799_v20 = vadd.f32 1e-05, %v4795_v25  ;;  %v6017_v25 = vld [vmem:[%s10123_s16 + $0x158] sm:$0xff] }
0x1516   :  { %v4798_v0 = vadd.f32 1e-05, %v4794_v27  ;;  %v6879_v56 = vpack.c.bf16 %v6017_v25, %v6016_v14  ;;  %v6034_v27 = vld [vmem:[%s10123_s16 + $0x1e0] sm:$0xff] }
0x1517   :  { %7517 = vrsqrt.f32 %v4799_v20  ;;  %v6035_v20 = vld [vmem:[%s10123_s16 + $0x1e8] sm:$0xff] }
0x1518   :  { %7519 = vrsqrt.f32 %v4798_v0  ;;  %v6881_v0 = vpack.c.bf16 %v6035_v20, %v6034_v27 }
0x1519   :  { %v7514_v9 = vpop.eup %7513 }
0x151a   :  { %v7516_v60 = vpop.eup %7515  ;;  %v4805_v30 = vmul.f32 %v7514_v9, %v9018_v33  ;;  %v6018_v9 = vld [vmem:[%s10123_s16 + $0x160] sm:$0xff] }
0x151b   :  { %v4804_v31 = vmul.f32 %v7516_v60, %v9021_v47  ;;  %v6019_v60 = vld [vmem:[%s10123_s16 + $0x168] sm:$0xff] }
0x151c   :  { %v4815_v26 = vmul.f32 %v5983_v52, %v4805_v30  ;;  %v6037_v30 = vld [vmem:[%s10123_s16 + $0x1f8] sm:$0xff] }
0x151d   :  { %v4814_v4 = vmul.f32 %v5983_v52, %v4804_v31  ;;  %v6036_v31 = vld [vmem:[%s10123_s16 + $0x1f0] sm:$0xff] }
0x151e   :  { %v4825_v17 = vadd.f32 %v5984_v50, %v4815_v26 }
0x151f   :  { %v4824_v18 = vadd.f32 %v5984_v50, %v4814_v4  ;;  %v6020_v4 = vld [vmem:[%s10123_s16 + $0x170] sm:$0xff] }
0x1521   :  { %v7518_v46 = vpop.eup %7517  ;;  %6002 = vmatmul.mubr.msk.f32.vlgmr.msra.gmra.mrb[62].mxu0 %vm347_vm7, %v4824_v18  ;;  %v6021_v18 = vld [vmem:[%s10123_s16 + $0x178] sm:$0xff] }
0x1522   :  { %v7520_v39 = vpop.eup %7519  ;;  %4940 = vmatprep.mubr.f32.mxu0 %v7540_v15  ;;  %v4807_v47 = vmul.f32 %v7518_v46, %v9030_v34  ;;  %v6023_v34 = vld [vmem:[%s10123_s16 + $0x188] sm:$0xff]  ;;  %v6887_v26 = vpack.c.bf16 %v6021_v18, %v6020_v4  ;;  %v6001_v46 = vld [vmem:[%s10124_s15 + $0x2] sm:$0x3] }
0x1523   :  { %v4806_v48 = vmul.f32 %v7520_v39, %v9033_v51  ;;  %v6022_v51 = vld [vmem:[%s10123_s16 + $0x180] sm:$0xff]  ;;  %v4851_v39 = vrot.slane %v6001_v46, %v7840_v55 }
0x1524   :  { %v4817_v6 = vmul.f32 %v5983_v52, %v4807_v47  ;;  %v6857_v53 = vpack.c.bf16 %v6023_v34, %v6022_v51 }
0x1525   :  { %6003 = vmatmul.mubr.msk.f32.gmra.mrb[64].mxu0 %vm347_vm7, %v4825_v17  ;;  %v4816_v33 = vmul.f32 %v5983_v52, %v4806_v48  ;;  %v6883_v52 = vpack.c.bf16 %v6019_v60, %v6018_v9  ;;  %v4855_v17 = vrot.slane %v6001_v46, %v7847_v57 }
0x1526   :  { %4946 = vmatprep.mubr.f32.mxu0 %v7540_v15  ;;  %v4827_v45 = vadd.f32 %v5984_v50, %v4817_v6  ;;  %6858 = vmatprep.subr.bf16.mxu1 %v6857_v53 }
0x1527   :  { %v4826_v61 = vadd.f32 %v5984_v50, %v4816_v33  ;;  %v6885_v50 = vpack.c.bf16 %v6037_v30, %v6036_v31 }
0x1529   :  { %6004 = vmatmul.mubr.msk.f32.gmra.mrb[66].mxu0 %vm347_vm7, %v4826_v61 }
0x152a   :  { %4952 = vmatprep.mubr.f32.mxu0 %v7540_v15  ;;  %v6007_v15 = vld [vmem:[%s10123_s16 + $0x108] sm:$0xff] }
0x152b   :  { %v6859_v22 = vpack.c.bf16 %v6007_v15, %v6006_v28 }
0x152d   :  { %6005 = vmatmul.mubr.msk.f32.gmra.mrb[68].mxu0 %vm347_vm7, %v4827_v45  ;;  %6860 = vmatpush3.bf16.msra.mxu1 %v6859_v22 }
0x152e   :  { %6862 = vmatprep.subr.bf16.mxu1 %v6861_v44 }
0x1531   :  { %6864 = vmatpush3.bf16.msra.mxu1 %v6863_v11 }
0x1532   :  { %6866 = vmatprep.subr.bf16.mxu1 %v6865_v35 }
0x1535   :  { %6868 = vmatpush3.bf16.msra.mxu1 %v6867_v43 }
0x1536   :  { %6870 = vmatprep.subr.bf16.mxu1 %v6869_v13 }
0x1539   :  { %6872 = vmatpush3.bf16.msra.mxu1 %v6871_v59 }
0x153a   :  { %6874 = vmatprep.subr.bf16.mxu1 %v6873_v49 }
0x153d   :  { %6876 = vmatpush3.bf16.msra.mxu1 %v6875_v38 }
0x153e   :  { %6878 = vmatprep.subr.bf16.mxu1 %v6877_v10 }
0x1541   :  { %6880 = vmatpush3.bf16.msra.mxu1 %v6879_v56 }
0x1542   :  { %6882 = vmatprep.subr.bf16.mxu1 %v6881_v0 }
0x1545   :  { %6884 = vmatpush3.bf16.msra.mxu1 %v6883_v52 }
0x1546   :  { %6886 = vmatprep.subr.bf16.mxu1 %v6885_v50 }
0x1549   :  { %6888 = vmatpush3.bf16.msra.mxu1 %v6887_v26 }
0x15f4   :  { %v4936_v48 = vpop.f32.mrb[62].mxu0 }
0x15f5   :  { %v9207_v47 = vadd.f32 %v4936_v48, %v4851_v39  ;;  %v4938_v33 = vpop.f32.mrb[63].mxu0 }
0x15f6   :  { %v9209_v61 = vadd.f32 %v4938_v33, %v4855_v17 }
0x15f7   :  { %v4959_v6 = vmul.f32 %v9207_v47, %v9207_v47 }
0x15f8   :  { %v4960_v45 = vmul.f32 %v9209_v61, %v9209_v61  ;;  %v4942_v51 = vpop.f32.mrb[64].mxu0 }
0x15f9   :  { %v4967_v34 = vmul.f32 %v4959_v6, %v9207_v47  ;;  %v9216_v53 = vadd.f32 %v4942_v51, %v4851_v39  ;;  %v4944_v28 = vpop.f32.mrb[65].mxu0 }
0x15fa   :  { %v4968_v15 = vmul.f32 %v4960_v45, %v9209_v61  ;;  %v9219_v22 = vadd.f32 %v4944_v28, %v4855_v17 }
0x15fb   :  { %v4975_v1 = vmul.f32 0.044715, %v4967_v34  ;;  %v4961_v41 = vmul.f32 %v9216_v53, %v9216_v53 }
0x15fc   :  { %v4976_v44 = vmul.f32 0.044715, %v4968_v15  ;;  %v4962_v32 = vmul.f32 %v9219_v22, %v9219_v22  ;;  %v4948_v24 = vpop.f32.mrb[66].mxu0 }
0x15fd   :  { %v4983_v11 = vadd.f32 %v4975_v1, %v9207_v47  ;;  %v4969_v37 = vmul.f32 %v4961_v41, %v9216_v53  ;;  %v9227_v7 = vadd.f32 %v4948_v24, %v4851_v39  ;;  %v4950_v35 = vpop.f32.mrb[67].mxu0 }
0x15fe   :  { %v4984_v16 = vadd.f32 %v4976_v44, %v9209_v61  ;;  %v4970_v36 = vmul.f32 %v4962_v32, %v9219_v22  ;;  %v9231_v43 = vadd.f32 %v4950_v35, %v4855_v17 }
0x15ff   :  { %v4991_v12 = vmul.f32 0.7978846, %v4983_v11  ;;  %v4977_v62 = vmul.f32 0.044715, %v4969_v37  ;;  %v4963_v13 = vmul.f32 %v9227_v7, %v9227_v7 }
0x1600   :  { %v4992_v42 = vmul.f32 0.7978846, %v4984_v16  ;;  %v4978_v63 = vmul.f32 0.044715, %v4970_v36  ;;  %v4964_v59 = vmul.f32 %v9231_v43, %v9231_v43  ;;  %v4954_v2 = vpop.f32.mrb[68].mxu0 }
0x1601   :  { %7521 = vtanh.f32 %v4991_v12  ;;  %v4985_v58 = vadd.f32 %v4977_v62, %v9216_v53  ;;  %v4971_v49 = vmul.f32 %v4963_v13, %v9227_v7  ;;  %v9239_v40 = vadd.f32 %v4954_v2, %v4851_v39  ;;  %v4956_v21 = vpop.f32.mrb[69].mxu0 }
0x1602   :  { %v4986_v38 = vadd.f32 %v4978_v63, %v9219_v22  ;;  %v4972_v8 = vmul.f32 %v4964_v59, %v9231_v43  ;;  %v4957_v5 = vadd.f32 %v4956_v21, %v4855_v17  ;;  %7523 = vtanh.f32 %v4992_v42 }
0x1603   :  { %v4993_v10 = vmul.f32 0.7978846, %v4985_v58  ;;  %v4979_v14 = vmul.f32 0.044715, %v4971_v49  ;;  %v4965_v25 = vmul.f32 %v9239_v40, %v9239_v40 }
0x1604   :  { %v4994_v56 = vmul.f32 0.7978846, %v4986_v38  ;;  %v4980_v27 = vmul.f32 0.044715, %v4972_v8  ;;  %v4966_v20 = vmul.f32 %v4957_v5, %v4957_v5  ;;  %v5382_v8 = vld [vmem:[%s10126_s18 + $0x418] sm:$0xff] }
0x1605   :  { %v4987_v0 = vadd.f32 %v4979_v14, %v9227_v7  ;;  %v4973_v9 = vmul.f32 %v4965_v25, %v9239_v40  ;;  %7525 = vtanh.f32 %v4993_v10  ;;  %v5379_v25 = vld [vmem:[%s10126_s18 + $0x400] sm:$0xff] }
0x1606   :  { %v4988_v60 = vadd.f32 %v4980_v27, %v9231_v43  ;;  %v4974_v52 = vmul.f32 %v4966_v20, %v4957_v5  ;;  %7527 = vtanh.f32 %v4994_v56  ;;  %v5381_v56 = vld [vmem:[%s10126_s18 + $0x410] sm:$0xff]  ;;  %v5256_v27 = vld [vmem:[%s10126_s18 + $0x28] sm:$0xff] }
0x1607   :  { %v4995_v31 = vmul.f32 0.7978846, %v4987_v0  ;;  %v4981_v30 = vmul.f32 0.044715, %v4973_v9  ;;  %v7019_v20 = vpack.c.bf16 %v5381_v56, %v5379_v25  ;;  %v5258_v0 = vld [vmem:[%s10126_s18 + $0x38] sm:$0xff]  ;;  %v5384_v9 = vld [vmem:[%s10126_s18 + $0x428] sm:$0xff] }
0x1608   :  { %v4996_v50 = vmul.f32 0.7978846, %v4988_v60  ;;  %v4982_v4 = vmul.f32 0.044715, %v4974_v52  ;;  %v5386_v60 = vld [vmem:[%s10126_s18 + $0x438] sm:$0xff]  ;;  %v6893_v52 = vpack.c.bf16 %v5258_v0, %v5256_v27  ;;  %v5273_v25 = vld [vmem:[%s10126_s18 + $0xb0] sm:$0xff] }
0x1609   :  { %v4989_v18 = vadd.f32 %v4981_v30, %v9239_v40  ;;  %7529 = vtanh.f32 %v4995_v31  ;;  %v7021_v31 = vpack.c.bf16 %v5386_v60, %v5384_v9  ;;  %v5255_v30 = vld [vmem:[%s10126_s18 + $0x20] sm:$0xff]  ;;  %v5276_v0 = vld [vmem:[%s10126_s18 + $0xc8] sm:$0xff]  ;;  %v5278_v9 = vld [vmem:[%s10126_s18 + $0xd8] sm:$0xff] }
0x160a   :  { %v4990_v26 = vadd.f32 %v4982_v4, %v4957_v5  ;;  %7531 = vtanh.f32 %v4996_v50  ;;  %v5257_v50 = vld [vmem:[%s10126_s18 + $0x30] sm:$0xff]  ;;  %v5383_v4 = vld [vmem:[%s10126_s18 + $0x420] sm:$0xff]  ;;  %v5404_v60 = vld [vmem:[%s10126_s18 + $0x4c8] sm:$0xff] }
0x160b   :  { %v7522_v46 = vpop.eup %7521  ;;  %v4997_v39 = vmul.f32 0.7978846, %v4989_v18  ;;  %v6895_v18 = vpack.c.bf16 %v5257_v50, %v5255_v30  ;;  %v5399_v56 = vld [vmem:[%s10126_s18 + $0x4a0] sm:$0xff]  ;;  %v6913_v50 = vpack.c.bf16 %v5278_v9, %v5276_v0 }
0x160c   :  { %v7524_v17 = vpop.eup %7523  ;;  %v5007_v48 = vadd.f32 1.0, %v7522_v46  ;;  %v4998_v33 = vmul.f32 0.7978846, %v4990_v26  ;;  %v5385_v26 = vld [vmem:[%s10126_s18 + $0x430] sm:$0xff]  ;;  %v5260_v46 = vld [vmem:[%s10126_s18 + $0x48] sm:$0xff]  ;;  %v5419_v0 = vld [vmem:[%s10126_s18 + $0x540] sm:$0xff] }
0x160d   :  { %v5008_v6 = vadd.f32 1.0, %v7524_v17  ;;  %7533 = vtanh.f32 %v4997_v39  ;;  %v5262_v39 = vld [vmem:[%s10126_s18 + $0x58] sm:$0xff]  ;;  %v7023_v17 = vpack.c.bf16 %v5385_v26, %v5383_v4  ;;  %v5275_v4 = vld [vmem:[%s10126_s18 + $0xc0] sm:$0xff] }
0x160e   :  { %v5015_v45 = vmul.f32 0.5, %v5007_v48  ;;  %7535 = vtanh.f32 %v4998_v33  ;;  %v6897_v48 = vpack.c.bf16 %v5262_v39, %v5260_v46  ;;  %v5388_v33 = vld [vmem:[%s10126_s18 + $0x448] sm:$0xff]  ;;  %v5403_v26 = vld [vmem:[%s10126_s18 + $0x4c0] sm:$0xff]  ;;  %v5405_v39 = vld [vmem:[%s10126_s18 + $0x4d0] sm:$0xff] }
0x160f   :  { %v7526_v51 = vpop.eup %7525  ;;  %v5016_v34 = vmul.f32 0.5, %v5008_v6  ;;  %v5390_v6 = vld [vmem:[%s10126_s18 + $0x458] sm:$0xff] }
0x1610   :  { %v7528_v28 = vpop.eup %7527  ;;  %v5009_v15 = vadd.f32 1.0, %v7526_v51  ;;  %v5023_v44 = vmul.f32 %v5015_v45, %v9207_v47  ;;  %v5259_v45 = vld [vmem:[%s10126_s18 + $0x40] sm:$0xff]  ;;  %v7025_v51 = vpack.c.bf16 %v5390_v6, %v5388_v33  ;;  %v5408_v33 = vld [vmem:[%s10126_s18 + $0x4e8] sm:$0xff]  ;;  %v5410_v6 = vld [vmem:[%s10126_s18 + $0x4f8] sm:$0xff] }
0x1611   :  { %v5024_v1 = vmul.f32 %v5016_v34, %v9209_v61  ;;  %v5010_v41 = vadd.f32 1.0, %v7528_v28  ;;  %v5261_v34 = vld [vmem:[%s10126_s18 + $0x50] sm:$0xff]  ;;  %v5387_v28 = vld [vmem:[%s10126_s18 + $0x440] sm:$0xff] }
0x1612   :  { %v5017_v32 = vmul.f32 0.5, %v5009_v15  ;;  %v5389_v15 = vld [vmem:[%s10126_s18 + $0x450] sm:$0xff] }
0x1613   :  { %v7530_v24 = vpop.eup %7529  ;;  %5128 = vmatprep.mubr.f32.mxu1 %v5024_v1  ;;  %v5018_v11 = vmul.f32 0.5, %v5010_v41  ;;  %v6899_v1 = vpack.c.bf16 %v5261_v34, %v5259_v45  ;;  %v5264_v41 = vld [vmem:[%s10126_s18 + $0x68] sm:$0xff] }
0x1614   :  { %v7532_v37 = vpop.eup %7531  ;;  %5129 = vmatmul.mubr.f32.vlgmr.msra.gmra.mrb[46].mxu1 %v5023_v44  ;;  %v5011_v35 = vadd.f32 1.0, %v7530_v24  ;;  %v5025_v12 = vmul.f32 %v5017_v32, %v9216_v53  ;;  %v5252_v53 = vld [vmem:[%s10126_s18 + $0x8] sm:$0xff]  ;;  %v5266_v44 = vld [vmem:[%s10126_s18 + $0x78] sm:$0xff]  ;;  %v7027_v24 = vpack.c.bf16 %v5389_v15, %v5387_v28  ;;  %v5279_v28 = vld [vmem:[%s10126_s18 + $0xe0] sm:$0xff] }
0x1615   :  { %v5026_v16 = vmul.f32 %v5018_v11, %v9219_v22  ;;  %v5012_v36 = vadd.f32 1.0, %v7532_v37  ;;  %v5392_v32 = vld [vmem:[%s10126_s18 + $0x468] sm:$0xff]  ;;  %v6901_v11 = vpack.c.bf16 %v5266_v44, %v5264_v41  ;;  %v5394_v37 = vld [vmem:[%s10126_s18 + $0x478] sm:$0xff]  ;;  %v5281_v15 = vld [vmem:[%s10126_s18 + $0xf0] sm:$0xff]  ;;  %v7045_v41 = vpack.c.bf16 %v5410_v6, %v5408_v33 }
0x1616   :  { %v5019_v62 = vmul.f32 0.5, %v5011_v35  ;;  %v5263_v35 = vld [vmem:[%s10126_s18 + $0x60] sm:$0xff]  ;;  %v5409_v44 = vld [vmem:[%s10126_s18 + $0x4f0] sm:$0xff]  ;;  %v5300_v6 = vld [vmem:[%s10126_s18 + $0x188] sm:$0xff] }
0x1617   :  { %v7534_v13 = vpop.eup %7533  ;;  %5133 = vmatprep.mubr.f32.mxu1 %v5026_v16  ;;  %v5020_v42 = vmul.f32 0.5, %v5012_v36  ;;  %v5265_v16 = vld [vmem:[%s10126_s18 + $0x70] sm:$0xff]  ;;  %v7029_v36 = vpack.c.bf16 %v5394_v37, %v5392_v32  ;;  %v5284_v32 = vld [vmem:[%s10126_s18 + $0x108] sm:$0xff]  ;;  %v5414_v37 = vld [vmem:[%s10126_s18 + $0x518] sm:$0xff] }
0x1618   :  { %v7536_v61 = vpop.eup %7535  ;;  %5134 = vmatmul.mubr.f32.gmra.mrb[48].mxu1 %v5025_v12  ;;  %v5013_v63 = vadd.f32 1.0, %v7534_v13  ;;  %v5027_v2 = vmul.f32 %v5019_v62, %v9227_v7  ;;  %v5380_v7 = vld [vmem:[%s10126_s18 + $0x408] sm:$0xff]  ;;  %v5391_v12 = vld [vmem:[%s10126_s18 + $0x460] sm:$0xff]  ;;  %v5393_v62 = vld [vmem:[%s10126_s18 + $0x470] sm:$0xff] }
0x1619   :  { %v5028_v47 = vmul.f32 %v5020_v42, %v9231_v43  ;;  %v5014_v59 = vadd.f32 1.0, %v7536_v61  ;;  %v5254_v43 = vld [vmem:[%s10126_s18 + $0x18] sm:$0xff]  ;;  %v7017_v10 = vpack.c.bf16 %v5382_v8, %v5380_v7  ;;  %v5268_v13 = vld [vmem:[%s10126_s18 + $0x88] sm:$0xff]  ;;  %v5425_v33 = vld [vmem:[%s10126_s18 + $0x570] sm:$0xff] }
0x161a   :  { %v5021_v58 = vmul.f32 0.5, %v5013_v63  ;;  %v6889_v38 = vpack.c.bf16 %v5254_v43, %v5252_v53  ;;  %v5270_v42 = vld [vmem:[%s10126_s18 + $0x98] sm:$0xff]  ;;  %v5396_v61 = vld [vmem:[%s10126_s18 + $0x488] sm:$0xff]  ;;  %v5397_v53 = vld [vmem:[%s10126_s18 + $0x490] sm:$0xff] }
0x161b   :  { %5138 = vmatprep.mubr.f32.mxu1 %v5028_v47  ;;  %v5022_v49 = vmul.f32 0.5, %v5014_v59  ;;  %7018 = vmatprep.subr.bf16.mxu0 %v7017_v10  ;;  %v5398_v63 = vld [vmem:[%s10126_s18 + $0x498] sm:$0xff]  ;;  %v6903_v47 = vpack.c.bf16 %v5265_v16, %v5263_v35  ;;  %v7031_v59 = vpack.c.bf16 %v5393_v62, %v5391_v12  ;;  %v5272_v43 = vld [vmem:[%s10126_s18 + $0xa8] sm:$0xff]  ;;  %v6919_v35 = vpack.c.bf16 %v5281_v15, %v5279_v28  ;;  %v5283_v12 = vld [vmem:[%s10126_s18 + $0x100] sm:$0xff] }
0x161c   :  { %5139 = vmatmul.mubr.f32.gmra.mrb[50].mxu1 %v5027_v2  ;;  %v5029_v21 = vmul.f32 %v5021_v58, %v9239_v40  ;;  %v5251_v40 = vld [vmem:[%s10126_s18] sm:$0xff]  ;;  %6890 = vmatprep.subr.bf16.mxu1 %v6889_v38  ;;  %v6905_v2 = vpack.c.bf16 %v5270_v42, %v5268_v13  ;;  %v5274_v7 = vld [vmem:[%s10126_s18 + $0xb8] sm:$0xff]  ;;  %v5400_v38 = vld [vmem:[%s10126_s18 + $0x4a8] sm:$0xff] }
0x161d   :  { %v5030_v22 = vmul.f32 %v5022_v49, %v4957_v5  ;;  %v5253_v5 = vld [vmem:[%s10126_s18 + $0x10] sm:$0xff]  ;;  %7020 = vmatpush1.bf16.msra.mxu0 %v7019_v20  ;;  %v5267_v58 = vld [vmem:[%s10126_s18 + $0x80] sm:$0xff]  ;;  %v5402_v8 = vld [vmem:[%s10126_s18 + $0x4b8] sm:$0xff]  ;;  %v6909_v10 = vpack.c.bf16 %v5274_v7, %v5272_v43 }
0x161e   :  { %v6891_v14 = vpack.c.bf16 %v5253_v5, %v5251_v40  ;;  %7022 = vmatprep.subr.bf16.mxu0 %v7021_v31  ;;  %v5269_v49 = vld [vmem:[%s10126_s18 + $0x90] sm:$0xff]  ;;  %v7037_v27 = vpack.c.bf16 %v5402_v8, %v5400_v38  ;;  %v5411_v13 = vld [vmem:[%s10126_s18 + $0x500] sm:$0xff]  ;;  %v5292_v8 = vld [vmem:[%s10126_s18 + $0x148] sm:$0xff] }
0x161f   :  { %5143 = vmatprep.mubr.f32.mxu1 %v5030_v22  ;;  %v5395_v22 = vld [vmem:[%s10126_s18 + $0x480] sm:$0xff]  ;;  %v6907_v40 = vpack.c.bf16 %v5269_v49, %v5267_v58  ;;  %v5401_v20 = vld [vmem:[%s10126_s18 + $0x4b0] sm:$0xff] }
0x1620   :  { %5144 = vmatmul.mubr.f32.gmra.mrb[52].mxu1 %v5029_v21  ;;  %v7033_v21 = vpack.c.bf16 %v5398_v63, %v5396_v61  ;;  %v7035_v5 = vpack.c.bf16 %v5397_v53, %v5395_v22  ;;  %v7039_v30 = vpack.c.bf16 %v5401_v20, %v5399_v56  ;;  %v5285_v62 = vld [vmem:[%s10126_s18 + $0x110] sm:$0xff]  ;;  %v5288_v63 = vld [vmem:[%s10126_s18 + $0x128] sm:$0xff]  ;;  %v5415_v43 = vld [vmem:[%s10126_s18 + $0x520] sm:$0xff] }
0x1621   :  { %6892 = vmatpush1.bf16.msra.mxu1 %v6891_v14  ;;  %7024 = vmatpush1.bf16.msra.mxu0 %v7023_v17  ;;  %v5271_v14 = vld [vmem:[%s10126_s18 + $0xa0] sm:$0xff]  ;;  %v5280_v17 = vld [vmem:[%s10126_s18 + $0xe8] sm:$0xff]  ;;  %v5413_v61 = vld [vmem:[%s10126_s18 + $0x510] sm:$0xff]  ;;  %v6923_v58 = vpack.c.bf16 %v5285_v62, %v5283_v12 }
0x1622   :  { %6894 = vmatprep.subr.bf16.mxu1 %v6893_v52  ;;  %7026 = vmatprep.subr.bf16.mxu0 %v7025_v51  ;;  %v5406_v52 = vld [vmem:[%s10126_s18 + $0x4d8] sm:$0xff]  ;;  %v6911_v31 = vpack.c.bf16 %v5273_v25, %v5271_v14  ;;  %v7043_v51 = vpack.c.bf16 %v5405_v39, %v5403_v26  ;;  %v7051_v49 = vpack.c.bf16 %v5413_v61, %v5411_v13  ;;  %v5289_v53 = vld [vmem:[%s10126_s18 + $0x130] sm:$0xff] }
0x1623   :  { %v7041_v46 = vpack.c.bf16 %v5406_v52, %v5404_v60  ;;  %v5417_v38 = vld [vmem:[%s10126_s18 + $0x530] sm:$0xff]  ;;  %v5296_v52 = vld [vmem:[%s10126_s18 + $0x168] sm:$0xff] }
0x1624   :  { %v7055_v25 = vpack.c.bf16 %v5417_v38, %v5415_v43  ;;  %v5293_v20 = vld [vmem:[%s10126_s18 + $0x150] sm:$0xff]  ;;  %v5308_v43 = vld [vmem:[%s10126_s18 + $0x1c8] sm:$0xff] }
0x1625   :  { %6896 = vmatpush1.bf16.msra.mxu1 %v6895_v18  ;;  %7028 = vmatpush1.bf16.msra.mxu0 %v7027_v24  ;;  %v5277_v18 = vld [vmem:[%s10126_s18 + $0xd0] sm:$0xff]  ;;  %v5286_v24 = vld [vmem:[%s10126_s18 + $0x118] sm:$0xff]  ;;  %v5436_v38 = vld [vmem:[%s10126_s18 + $0x5c8] sm:$0xff] }
0x1626   :  { %6898 = vmatprep.subr.bf16.mxu1 %v6897_v48  ;;  %7030 = vmatprep.subr.bf16.mxu0 %v7029_v36  ;;  %v5282_v48 = vld [vmem:[%s10126_s18 + $0xf8] sm:$0xff]  ;;  %v6915_v45 = vpack.c.bf16 %v5277_v18, %v5275_v4  ;;  %v6921_v36 = vpack.c.bf16 %v5286_v24, %v5284_v32  ;;  %v5421_v60 = vld [vmem:[%s10126_s18 + $0x550] sm:$0xff]  ;;  %v5427_v32 = vld [vmem:[%s10126_s18 + $0x580] sm:$0xff] }
0x1627   :  { %v6917_v34 = vpack.c.bf16 %v5282_v48, %v5280_v17  ;;  %v7059_v18 = vpack.c.bf16 %v5421_v60, %v5419_v0  ;;  %v5297_v39 = vld [vmem:[%s10126_s18 + $0x170] sm:$0xff]  ;;  %v5423_v17 = vld [vmem:[%s10126_s18 + $0x560] sm:$0xff] }
0x1628   :  { %v7063_v15 = vpack.c.bf16 %v5425_v33, %v5423_v17  ;;  %v5442_v17 = vld [vmem:[%s10126_s18 + $0x5f8] sm:$0xff]  ;;  %v5313_v33 = vld [vmem:[%s10126_s18 + $0x1f0] sm:$0xff] }
0x1629   :  { %6900 = vmatpush1.bf16.msra.mxu1 %v6899_v1  ;;  %7032 = vmatpush1.bf16.msra.mxu0 %v7031_v59  ;;  %v5407_v1 = vld [vmem:[%s10126_s18 + $0x4e0] sm:$0xff]  ;;  %v5416_v59 = vld [vmem:[%s10126_s18 + $0x528] sm:$0xff] }
0x162a   :  { %6902 = vmatprep.subr.bf16.mxu1 %v6901_v11  ;;  %7034 = vmatprep.subr.bf16.mxu0 %v7033_v21  ;;  %v5412_v11 = vld [vmem:[%s10126_s18 + $0x508] sm:$0xff]  ;;  %v7047_v16 = vpack.c.bf16 %v5409_v44, %v5407_v1  ;;  %v5287_v21 = vld [vmem:[%s10126_s18 + $0x120] sm:$0xff]  ;;  %v5301_v44 = vld [vmem:[%s10126_s18 + $0x190] sm:$0xff] }
0x162b   :  { %v7049_v42 = vpack.c.bf16 %v5414_v37, %v5412_v11  ;;  %v6927_v14 = vpack.c.bf16 %v5289_v53, %v5287_v21  ;;  %v5429_v11 = vld [vmem:[%s10126_s18 + $0x590] sm:$0xff]  ;;  %v5304_v37 = vld [vmem:[%s10126_s18 + $0x1a8] sm:$0xff] }
0x162c   :  { %v7067_v62 = vpack.c.bf16 %v5429_v11, %v5427_v32  ;;  %v5318_v32 = vld [vmem:[%s10126_s18 + $0x218] sm:$0xff] }
0x162d   :  { %6904 = vmatpush1.bf16.msra.mxu1 %v6903_v47  ;;  %7036 = vmatpush1.bf16.msra.mxu0 %v7035_v5  ;;  %v5290_v47 = vld [vmem:[%s10126_s18 + $0x138] sm:$0xff]  ;;  %v5420_v5 = vld [vmem:[%s10126_s18 + $0x548] sm:$0xff] }
0x162e   :  { %6906 = vmatprep.subr.bf16.mxu1 %v6905_v2  ;;  %7038 = vmatprep.subr.bf16.mxu0 %v7037_v27  ;;  %v5418_v2 = vld [vmem:[%s10126_s18 + $0x538] sm:$0xff]  ;;  %v6925_v22 = vpack.c.bf16 %v5290_v47, %v5288_v63  ;;  %v5291_v27 = vld [vmem:[%s10126_s18 + $0x140] sm:$0xff] }
0x162f   :  { %v7053_v7 = vpack.c.bf16 %v5418_v2, %v5416_v59  ;;  %v6931_v4 = vpack.c.bf16 %v5293_v20, %v5291_v27  ;;  %v5303_v59 = vld [vmem:[%s10126_s18 + $0x1a0] sm:$0xff]  ;;  %v5305_v2 = vld [vmem:[%s10126_s18 + $0x1b0] sm:$0xff] }
0x1630   :  { %v5307_v27 = vld [vmem:[%s10126_s18 + $0x1c0] sm:$0xff] }
0x1631   :  { %6908 = vmatpush1.bf16.msra.mxu1 %v6907_v40  ;;  %7040 = vmatpush1.bf16.msra.mxu0 %v7039_v30  ;;  %v5294_v40 = vld [vmem:[%s10126_s18 + $0x158] sm:$0xff]  ;;  %v5424_v30 = vld [vmem:[%s10126_s18 + $0x568] sm:$0xff]  ;;  %v5435_v20 = vld [vmem:[%s10126_s18 + $0x5c0] sm:$0xff] }
0x1632   :  { %6910 = vmatprep.subr.bf16.mxu1 %v6909_v10  ;;  %7042 = vmatprep.subr.bf16.mxu0 %v7041_v46  ;;  %v5422_v10 = vld [vmem:[%s10126_s18 + $0x558] sm:$0xff]  ;;  %v6929_v56 = vpack.c.bf16 %v5294_v40, %v5292_v8  ;;  %v5295_v46 = vld [vmem:[%s10126_s18 + $0x160] sm:$0xff] }
0x1633   :  { %v7057_v9 = vpack.c.bf16 %v5422_v10, %v5420_v5  ;;  %v6935_v28 = vpack.c.bf16 %v5297_v39, %v5295_v46  ;;  %v9605_v40 = vld [vmem:[%s10125_s17 + $0x1] ss:$0 sm:$0xff] }
0x1635   :  { %6912 = vmatpush1.bf16.msra.mxu1 %v6911_v31  ;;  %7044 = vmatpush1.bf16.msra.mxu0 %v7043_v51  ;;  %v5298_v31 = vld [vmem:[%s10126_s18 + $0x178] sm:$0xff]  ;;  %v5428_v51 = vld [vmem:[%s10126_s18 + $0x588] sm:$0xff] }
0x1636   :  { %6914 = vmatprep.subr.bf16.mxu1 %v6913_v50  ;;  %7046 = vmatprep.subr.bf16.mxu0 %v7045_v41  ;;  %v5426_v50 = vld [vmem:[%s10126_s18 + $0x578] sm:$0xff]  ;;  %v6933_v26 = vpack.c.bf16 %v5298_v31, %v5296_v52  ;;  %v5299_v41 = vld [vmem:[%s10126_s18 + $0x180] sm:$0xff] }
0x1637   :  { %v7061_v48 = vpack.c.bf16 %v5426_v50, %v5424_v30  ;;  %v6939_v12 = vpack.c.bf16 %v5301_v44, %v5299_v41  ;;  %v5312_v50 = vld [vmem:[%s10126_s18 + $0x1e8] sm:$0xff] }
0x1638   :  { %v5316_v44 = vld [vmem:[%s10126_s18 + $0x208] sm:$0xff] }
0x1639   :  { %6916 = vmatpush1.bf16.msra.mxu1 %v6915_v45  ;;  %7048 = vmatpush1.bf16.msra.mxu0 %v7047_v16  ;;  %v5302_v45 = vld [vmem:[%s10126_s18 + $0x198] sm:$0xff]  ;;  %v5432_v16 = vld [vmem:[%s10126_s18 + $0x5a8] sm:$0xff] }
0x163a   :  { %6918 = vmatprep.subr.bf16.mxu1 %v6917_v34  ;;  %7050 = vmatprep.subr.bf16.mxu0 %v7049_v42  ;;  %v5430_v34 = vld [vmem:[%s10126_s18 + $0x598] sm:$0xff]  ;;  %v6937_v1 = vpack.c.bf16 %v5302_v45, %v5300_v6 }
0x163b   :  { %v7065_v24 = vpack.c.bf16 %v5430_v34, %v5428_v51  ;;  %v5441_v51 = vld [vmem:[%s10126_s18 + $0x5f0] sm:$0xff] }
0x163d   :  { %6920 = vmatpush1.bf16.msra.mxu1 %v6919_v35  ;;  %7052 = vmatpush1.bf16.msra.mxu0 %v7051_v49  ;;  %v5306_v35 = vld [vmem:[%s10126_s18 + $0x1b8] sm:$0xff]  ;;  %v6943_v49 = vpack.c.bf16 %v5305_v2, %v5303_v59 }
0x163e   :  { %6922 = vmatprep.subr.bf16.mxu1 %v6921_v36  ;;  %7054 = vmatprep.subr.bf16.mxu0 %v7053_v7  ;;  %v5434_v36 = vld [vmem:[%s10126_s18 + $0x5b8] sm:$0xff]  ;;  %v6941_v13 = vpack.c.bf16 %v5306_v35, %v5304_v37  ;;  %v6953_v35 = vpack.c.bf16 %v5318_v32, %v5316_v44 }
0x163f   :  { %v7069_v42 = vpack.c.bf16 %v5434_v36, %v5432_v16  ;;  %v5310_v7 = vld [vmem:[%s10126_s18 + $0x1d8] sm:$0xff] }
0x1640   :  { %v6945_v10 = vpack.c.bf16 %v5310_v7, %v5308_v43  ;;  %v5446_v16 = vld [vmem:[%s10126_s18 + $0x618] sm:$0xff] }
0x1641   :  { %6924 = vmatpush1.bf16.msra.mxu1 %v6923_v58  ;;  %7056 = vmatpush1.bf16.msra.mxu0 %v7055_v25  ;;  %v5431_v58 = vld [vmem:[%s10126_s18 + $0x5a0] sm:$0xff] }
0x1642   :  { %6926 = vmatprep.subr.bf16.mxu1 %v6925_v22  ;;  %7058 = vmatprep.subr.bf16.mxu0 %v7057_v9  ;;  %v5433_v22 = vld [vmem:[%s10126_s18 + $0x5b0] sm:$0xff] }
0x1643   :  { %v7071_v53 = vpack.c.bf16 %v5433_v22, %v5431_v58  ;;  %v5437_v9 = vld [vmem:[%s10126_s18 + $0x5d0] sm:$0xff] }
0x1644   :  { %v7075_v52 = vpack.c.bf16 %v5437_v9, %v5435_v20 }
0x1645   :  { %6928 = vmatpush1.bf16.msra.mxu1 %v6927_v14  ;;  %7060 = vmatpush1.bf16.msra.mxu0 %v7059_v18  ;;  %v5438_v14 = vld [vmem:[%s10126_s18 + $0x5d8] sm:$0xff]  ;;  %v5440_v18 = vld [vmem:[%s10126_s18 + $0x5e8] sm:$0xff] }
0x1646   :  { %6930 = vmatprep.subr.bf16.mxu1 %v6929_v56  ;;  %7062 = vmatprep.subr.bf16.mxu0 %v7061_v48  ;;  %v7073_v56 = vpack.c.bf16 %v5438_v14, %v5436_v38  ;;  %v5311_v48 = vld [vmem:[%s10126_s18 + $0x1e0] sm:$0xff]  ;;  %v7077_v6 = vpack.c.bf16 %v5442_v17, %v5440_v18  ;;  %v5317_v17 = vld [vmem:[%s10126_s18 + $0x210] sm:$0xff] }
0x1647   :  { %v6951_v45 = vpack.c.bf16 %v5313_v33, %v5311_v48  ;;  %v5443_v48 = vld [vmem:[%s10126_s18 + $0x600] sm:$0xff]  ;;  %v5445_v33 = vld [vmem:[%s10126_s18 + $0x610] sm:$0xff] }
0x1649   :  { %6932 = vmatpush1.bf16.msra.mxu1 %v6931_v4  ;;  %7064 = vmatpush1.bf16.msra.mxu0 %v7063_v15  ;;  %v5314_v4 = vld [vmem:[%s10126_s18 + $0x1f8] sm:$0xff] }
0x164a   :  { %6934 = vmatprep.subr.bf16.mxu1 %v6933_v26  ;;  %7066 = vmatprep.subr.bf16.mxu0 %v7065_v24  ;;  %v6949_v39 = vpack.c.bf16 %v5314_v4, %v5312_v50 }
0x164d   :  { %6936 = vmatpush1.bf16.msra.mxu1 %v6935_v28  ;;  %7068 = vmatpush1.bf16.msra.mxu0 %v7067_v62 }
0x164e   :  { %6938 = vmatprep.subr.bf16.mxu1 %v6937_v1  ;;  %7070 = vmatprep.subr.bf16.mxu0 %v7069_v42 }
0x1651   :  { %6940 = vmatpush1.bf16.msra.mxu1 %v6939_v12  ;;  %7072 = vmatpush1.bf16.msra.mxu0 %v7071_v53 }
0x1652   :  { %6942 = vmatprep.subr.bf16.mxu1 %v6941_v13  ;;  %7074 = vmatprep.subr.bf16.mxu0 %v7073_v56  ;;  %v7548_v56 = vmov 1983009808  }
0x1655   :  { %6944 = vmatpush1.bf16.msra.mxu1 %v6943_v49  ;;  %7076 = vmatpush1.bf16.msra.mxu0 %v7075_v52 }
0x1656   :  { %6946 = vmatprep.subr.bf16.mxu1 %v6945_v10  ;;  %7078 = vmatprep.subr.bf16.mxu0 %v7077_v6 }
0x16e7   :  { %v6275_v61 = vpop.f32.mrb[46].mxu1 }
0x16e8   :  { %v6276_v63 = vpop.f32.mrb[47].mxu1 }
0x16e9   :  { %v6277_v47 = vadd.f32 %v6276_v63, %v6275_v61 }
0x16eb   :  { %v6278_v21 = vpop.f32.mrb[48].mxu1  ;;  %v5149_v8 = vadd.f32 %v6277_v47, %v9001_v19  ;;  %v5309_v19 = vld [vmem:[%s10126_s18 + $0x1d0] sm:$0xff] }
0x16ec   :  { %v6279_v5 = vpop.f32.mrb[49].mxu1  ;;  %v6947_v0 = vpack.c.bf16 %v5309_v19, %v5307_v27  ;;  %v70_v27 = vunpack.c.l.s4 %v7548_v56  ;;  %v5456_v56 = vld [vmem:[%s10126_s18 + $0x668] sm:$0xff] }
0x16ed   :  { %v6280_v25 = vadd.f32 %v6279_v5, %v6278_v21  ;;  %v5161_v31 = vadd.f32 %v9605_v40, %v5149_v8 }
0x16ee   :  { %6948 = vmatpush1.bf16.msra.mxu1 %v6947_v0  ;;  %v71_v19 = vunpack.c.0.s8 %v70_v27  ;;  %v9695_v0 = vld [vmem:[%s10127_s1] sm:$0xf]  ;;  %v5458_v27 = vld [vmem:[%s10126_s18 + $0x678] sm:$0xff] }
0x16ef   :  { %v6281_v60 = vpop.f32.mrb[50].mxu1  ;;  %v5150_v26 = vadd.f32 %v6280_v25, %v8999_v3  ;;  %v5439_v3 = vld [vmem:[%s10126_s18 + $0x5e0] sm:$0xff]  ;;  %6950 = vmatprep.subr.bf16.mxu1 %v6949_v39  ;;  %v5171_v41 = vrot.slane %v5161_v31, 1 }
0x16f0   :  { %v6282_v30 = vpop.f32.mrb[51].mxu1  ;;  %v7079_v15 = vpack.c.bf16 %v5441_v51, %v5439_v3  ;;  %v9690_v20 = vsub.s32 %v71_v19, %v7837_v54  ;;  %v5322_v3 = vld [vmem:[%s10126_s18 + $0x238] sm:$0xff] }
0x16f1   :  { %v6283_v46 = vadd.f32 %v6282_v30, %v6281_v60  ;;  %v5162_v24 = vadd.f32 %v9605_v40, %v5150_v26  ;;  %v5315_v26 = vld [vmem:[%s10126_s18 + $0x200] sm:$0xff] }
0x16f2   :  { %6952 = vmatpush1.bf16.msra.mxu1 %v6951_v45  ;;  %7080 = vmatpush1.bf16.msra.mxu0 %v7079_v15  ;;  %v75_v9 = vrot.slane %v9695_v0, %v9690_v20  ;;  %v5320_v45 = vld [vmem:[%s10126_s18 + $0x228] sm:$0xff] }
0x16f3   :  { %v5151_v34 = vadd.f32 %v6283_v46, %v9011_v23  ;;  %v6284_v28 = vpop.f32.mrb[52].mxu1  ;;  %v5444_v23 = vld [vmem:[%s10126_s18 + $0x608] sm:$0xff]  ;;  %6954 = vmatprep.subr.bf16.mxu1 %v6953_v35  ;;  %v5206_v59 = vrot.slane %v5162_v24, 1 }
0x16f4   :  { %v6285_v1 = vpop.f32.mrb[53].mxu1  ;;  %v7081_v36 = vpack.c.bf16 %v5446_v16, %v5444_v23  ;;  %v76_v60 = vcombine.high %v75_v9, %v75_v9  ;;  %v80_v52 = vsel %vm79_vm1, %v75_v9, 0.0  ;;  %v5448_v15 = vld [vmem:[%s10126_s18 + $0x628] sm:$0xff]  ;;  %v6955_v23 = vpack.c.bf16 %v5317_v17, %v5315_v26  ;;  %v5334_v26 = vld [vmem:[%s10126_s18 + $0x298] sm:$0xff] }
0x16f5   :  { %v5163_v11 = vadd.f32 %v9605_v40, %v5151_v34  ;;  %v6286_v37 = vadd.f32 %v6285_v1, %v6284_v28  ;;  %v5450_v1 = vld [vmem:[%s10126_s18 + $0x638] sm:$0xff] }
0x16f6   :  { %7082 = vmatprep.subr.bf16.mxu0 %v7081_v36  ;;  %v6957_v36 = vpack.c.bf16 %v5322_v3, %v5320_v45  ;;  %v5333_v45 = vld [vmem:[%s10126_s18 + $0x290] sm:$0xff] }
0x16f7   :  { %v5152_v12 = vadd.f32 %v6286_v37, %v9009_v29  ;;  %v5172_v62 = vsel %vm5168_vm13, %v5163_v11, %v5171_v41  ;;  %v5180_v13 = vsel %vm5177_vm14, %v5163_v11, %v5171_v41  ;;  %v5188_v42 = vsel %vm5185_vm15, %v5163_v11, %v5171_v41  ;;  %v5321_v37 = vld [vmem:[%s10126_s18 + $0x230] sm:$0xff] }
0x16f8   :  { %5173 = vrot.lane.b32.xlu1 %v5172_v62, %s7547_s24  ;;  %v5196_v61 = vsel %vm5193_vm0, %v5163_v11, %v5171_v41  ;;  %v5167_v63 = vrot.slane %v5163_v11, 7  ;;  %v5319_v11 = vld [vmem:[%s10126_s18 + $0x220] sm:$0xff]  ;;  %v5449_v62 = vld [vmem:[%s10126_s18 + $0x630] sm:$0xff] }
0x16f9   :  { %v5164_v47 = vadd.f32 %v9605_v40, %v5152_v12  ;;  %v7331_v2 = vpack.i.bf16 %v5188_v42, %v5196_v61  ;;  %v5447_v12 = vld [vmem:[%s10126_s18 + $0x620] sm:$0xff] }
0x16fa   :  { %v9670_v58 = vsel %vm5168_vm13, %v5167_v63, %v5161_v31  ;;  %v9673_v29 = vsel %vm5185_vm15, %v5167_v63, %v5161_v31  ;;  %v5178_v49 = vsel %vm5177_vm14, %v5167_v63, %v5161_v31  ;;  %v9677_v22 = vsel %vm5193_vm0, %v5167_v63, %v5161_v31 }
0x16fb   :  { %v5207_v21 = vsel %vm5168_vm13, %v5164_v47, %v5206_v59  ;;  %v5214_v53 = vsel %vm5177_vm14, %v5164_v47, %v5206_v59  ;;  %v5221_v43 = vsel %vm5185_vm15, %v5164_v47, %v5206_v59  ;;  %v5228_v7 = vsel %vm5193_vm0, %v5164_v47, %v5206_v59  ;;  %v5326_v59 = vld [vmem:[%s10126_s18 + $0x258] sm:$0xff] }
0x16fc   :  { %5208 = vrot.lane.b32.xlu1 %v5207_v21, %s7547_s24  ;;  %v7326_v38 = vpack.i.bf16 %v5214_v53, %v5180_v13  ;;  %v7336_v8 = vpack.i.bf16 %v5221_v43, %v5228_v7  ;;  %v5203_v40 = vrot.slane %v5164_v47, 7  ;;  %v81_v31 = vsel %vm79_vm1, %v76_v60, 0.0  ;;  %v5324_v13 = vld [vmem:[%s10126_s18 + $0x248] sm:$0xff]  ;;  %v5323_v7 = vld [vmem:[%s10126_s18 + $0x240] sm:$0xff] }
0x16fd   :  { %v82_v30 = vadd.f32 %v81_v31, %v80_v52  ;;  %v7085_v47 = vpack.c.bf16 %v5450_v1, %v5448_v15  ;;  %v6959_v53 = vpack.c.bf16 %v5321_v37, %v5319_v11  ;;  %v7087_v43 = vpack.c.bf16 %v5449_v62, %v5447_v12  ;;  %v5327_v60 = vld [vmem:[%s10126_s18 + $0x260] sm:$0xff]  ;;  %v5329_v52 = vld [vmem:[%s10126_s18 + $0x270] sm:$0xff]  ;;  %v5336_v15 = vld [vmem:[%s10126_s18 + $0x2a8] sm:$0xff] }
0x16fe   :  { %7327 = vrot.lane.b32.xlu0 %v7326_v38, %s7547_s24  ;;  %v5204_v5 = vsel %vm5168_vm13, %v5203_v40, %v5162_v24  ;;  %v9685_v10 = vsel %vm5185_vm15, %v5203_v40, %v5162_v24  ;;  %v5212_v14 = vsel %vm5177_vm14, %v5203_v40, %v5162_v24  ;;  %v5226_v25 = vsel %vm5193_vm0, %v5203_v40, %v5162_v24  ;;  %v5325_v38 = vld [vmem:[%s10126_s18 + $0x250] sm:$0xff]  ;;  %v5338_v1 = vld [vmem:[%s10126_s18 + $0x2b8] sm:$0xff]  ;;  %v5335_v11 = vld [vmem:[%s10126_s18 + $0x2a0] sm:$0xff] }
0x16ff   :  { %v7083_v24 = vpack.c.bf16 %v5445_v33, %v5443_v48  ;;  %v6963_v19 = vpack.c.bf16 %v5325_v38, %v5323_v7  ;;  %v6967_v17 = vpack.c.bf16 %v5329_v52, %v5327_v60  ;;  %v5331_v33 = vld [vmem:[%s10126_s18 + $0x280] sm:$0xff]  ;;  %v5337_v37 = vld [vmem:[%s10126_s18 + $0x2b0] sm:$0xff]  ;;  %v5340_v62 = vld [vmem:[%s10126_s18 + $0x2c8] sm:$0xff] }
0x1700   :  { %7337 = vrot.lane.b32.xlu1 %v7336_v8, %s7547_s24  ;;  %v6961_v8 = vpack.c.bf16 %v5326_v59, %v5324_v13  ;;  %v5465_v12 = vld [vmem:[%s10126_s18 + $0x6b0] sm:$0xff]  ;;  %v5342_v13 = vld [vmem:[%s10126_s18 + $0x2d8] sm:$0xff]  ;;  %v5339_v59 = vld [vmem:[%s10126_s18 + $0x2c0] sm:$0xff] }
0x1701   :  { %v5346_v7 = vld [vmem:[%s10126_s18 + $0x2f8] sm:$0xff]  ;;  %v5472_v38 = vld [vmem:[%s10126_s18 + $0x6e8] sm:$0xff] }
0x1702   :  { %7332 = vrot.lane.b32.xlu0 %v7331_v2, %s7547_s24  ;;  %v5452_v2 = vld [vmem:[%s10126_s18 + $0x648] sm:$0xff]  ;;  %v5350_v60 = vld [vmem:[%s10126_s18 + $0x318] sm:$0xff] }
0x1703   :  { %v5476_v52 = vld [vmem:[%s10126_s18 + $0x708] sm:$0xff] }
0x1721   :  { %83 = vadd.xlane.f32.xlu0 %v82_v30  ;;  %v7093_v30 = vpack.c.bf16 %v5458_v27, %v5456_v56  ;;  %v5471_v27 = vld [vmem:[%s10126_s18 + $0x6e0] sm:$0xff] }
0x176a   :  { %v5174_v50 = vpop.permute.xlu1 %5173 }
0x176b   :  { %v5176_v42 = vsel %vm347_vm7, %v9670_v58, %v5174_v50  ;;  %v5455_v50 = vld [vmem:[%s10126_s18 + $0x660] sm:$0xff] }
0x176e   :  { %v5209_v4 = vpop.permute.xlu1 %5208 }
0x176f   :  { %v5211_v61 = vsel %vm347_vm7, %v5204_v5, %v5209_v4  ;;  %v5453_v5 = vld [vmem:[%s10126_s18 + $0x650] sm:$0xff] }
0x1770   :  { %v7328_v18 = vpop.permute.xlu0 %7327  ;;  %v5457_v4 = vld [vmem:[%s10126_s18 + $0x670] sm:$0xff] }
0x1771   :  { %v7330_v46 = vunpack.i.h.bf16 %v7328_v18  ;;  %v7329_v39 = vunpack.i.l.bf16 %v7328_v18  ;;  %v5332_v18 = vld [vmem:[%s10126_s18 + $0x288] sm:$0xff]  ;;  %v7095_v48 = vpack.c.bf16 %v5457_v4, %v5455_v50  ;;  %v5347_v4 = vld [vmem:[%s10126_s18 + $0x300] sm:$0xff] }
0x1772   :  { %v9713_v6 = vpop.permute.xlu1 %7337  ;;  %v6969_v3 = vpack.c.bf16 %v5334_v26, %v5332_v18  ;;  %v5349_v18 = vld [vmem:[%s10126_s18 + $0x310] sm:$0xff] }
0x1773   :  { %v7339_v51 = vunpack.i.l.bf16 %v9713_v6  ;;  %v5184_v34 = vsel %vm347_vm7, %v5178_v49, %v7329_v39  ;;  %v5218_v28 = vsel %vm347_vm7, %v5212_v14, %v7330_v46  ;;  %v5454_v49 = vld [vmem:[%s10126_s18 + $0x658] sm:$0xff]  ;;  %v5328_v14 = vld [vmem:[%s10126_s18 + $0x268] sm:$0xff] }
0x1774   :  { %v9730_v41 = vpop.permute.xlu0 %7332  ;;  %v5234_v44 = vrot.slane %v5184_v34, 2  ;;  %v5243_v32 = vrot.slane %v5218_v28, 2  ;;  %v7089_v40 = vpack.c.bf16 %v5454_v49, %v5452_v2  ;;  %v5460_v46 = vld [vmem:[%s10126_s18 + $0x688] sm:$0xff]  ;;  %v5462_v39 = vld [vmem:[%s10126_s18 + $0x698] sm:$0xff]  ;;  %v5459_v34 = vld [vmem:[%s10126_s18 + $0x680] sm:$0xff]  ;;  %v6977_v49 = vpack.c.bf16 %v5342_v13, %v5340_v62 }
0x1775   :  { %v7334_v35 = vunpack.i.l.bf16 %v9730_v41  ;;  %v5232_v16 = vsel %vm347_vm7, %v5226_v25, %v7339_v51  ;;  %v5330_v25 = vld [vmem:[%s10126_s18 + $0x278] sm:$0xff]  ;;  %v7097_v51 = vpack.c.bf16 %v5462_v39, %v5460_v46  ;;  %v5461_v28 = vld [vmem:[%s10126_s18 + $0x690] sm:$0xff]  ;;  %v5475_v39 = vld [vmem:[%s10126_s18 + $0x700] sm:$0xff] }
0x1776   :  { %5583 = vmatprep.mubr.f32.mxu1 %v5234_v44  ;;  %5725 = vmatprep.mubr.f32.mxu0 %v5243_v32  ;;  %v5249_v63 = vrot.slane %v5232_v16, 6  ;;  %v6965_v31 = vpack.c.bf16 %v5330_v25, %v5328_v14  ;;  %v5464_v44 = vld [vmem:[%s10126_s18 + $0x6a8] sm:$0xff]  ;;  %v5466_v32 = vld [vmem:[%s10126_s18 + $0x6b8] sm:$0xff]  ;;  %v5341_v2 = vld [vmem:[%s10126_s18 + $0x2d0] sm:$0xff] }
0x1777   :  { %5584 = vmatmul.mubr.f32.vlgmr.msra.gmra.mrb[54].mxu1 %v5176_v42  ;;  %5726 = vmatmul.mubr.f32.vlgmr.msra.gmra.mrb[70].mxu0 %v5211_v61  ;;  %v5200_v58 = vsel %vm347_vm7, %v9677_v22, %v7334_v35  ;;  %v5451_v22 = vld [vmem:[%s10126_s18 + $0x640] sm:$0xff]  ;;  %v6973_v35 = vpack.c.bf16 %v5338_v1, %v5336_v15  ;;  %v7101_v16 = vpack.c.bf16 %v5466_v32, %v5464_v44  ;;  %v5468_v42 = vld [vmem:[%s10126_s18 + $0x6c8] sm:$0xff]  ;;  %v5470_v61 = vld [vmem:[%s10126_s18 + $0x6d8] sm:$0xff] }
0x1778   :  { %6956 = vmatpush1.bf16.msra.mxu1 %v6955_v23  ;;  %7084 = vmatpush1.bf16.msra.mxu0 %v7083_v24  ;;  %v5240_v21 = vrot.slane %v5200_v58, 6  ;;  %v7091_v9 = vpack.c.bf16 %v5453_v5, %v5451_v22  ;;  %v6971_v23 = vpack.c.bf16 %v5333_v45, %v5331_v33  ;;  %v7099_v24 = vpack.c.bf16 %v5461_v28, %v5459_v34  ;;  %v5343_v5 = vld [vmem:[%s10126_s18 + $0x2e0] sm:$0xff]  ;;  %v5345_v14 = vld [vmem:[%s10126_s18 + $0x2f0] sm:$0xff]  ;;  %v5354_v33 = vld [vmem:[%s10126_s18 + $0x338] sm:$0xff] }
0x1779   :  { %5796 = vmatprep.mubr.f32.mxu0 %v5249_v63  ;;  %6958 = vmatprep.subr.bf16.mxu1 %v6957_v36  ;;  %v5463_v36 = vld [vmem:[%s10126_s18 + $0x6a0] sm:$0xff]  ;;  %v6975_v63 = vpack.c.bf16 %v5337_v37, %v5335_v11  ;;  %v7105_v58 = vpack.c.bf16 %v5470_v61, %v5468_v42  ;;  %v5480_v45 = vld [vmem:[%s10126_s18 + $0x728] sm:$0xff]  ;;  %v5353_v15 = vld [vmem:[%s10126_s18 + $0x330] sm:$0xff] }
0x177a   :  { %5654 = vmatprep.mubr.f32.mxu1 %v5240_v21  ;;  %7086 = vmatprep.subr.bf16.mxu0 %v7085_v47  ;;  %v7103_v47 = vpack.c.bf16 %v5465_v12, %v5463_v36  ;;  %v5467_v21 = vld [vmem:[%s10126_s18 + $0x6c0] sm:$0xff]  ;;  %v5358_v11 = vld [vmem:[%s10126_s18 + $0x358] sm:$0xff]  ;;  %v5484_v37 = vld [vmem:[%s10126_s18 + $0x748] sm:$0xff] }
0x177b   :  { %v5351_v28 = vld [vmem:[%s10126_s18 + $0x320] sm:$0xff]  ;;  %v5357_v62 = vld [vmem:[%s10126_s18 + $0x350] sm:$0xff] }
0x177c   :  { %6960 = vmatpush1.bf16.msra.mxu1 %v6959_v53  ;;  %7088 = vmatpush1.bf16.msra.mxu0 %v7087_v43  ;;  %v5469_v53 = vld [vmem:[%s10126_s18 + $0x6d0] sm:$0xff]  ;;  %v5344_v43 = vld [vmem:[%s10126_s18 + $0x2e8] sm:$0xff]  ;;  %v5479_v32 = vld [vmem:[%s10126_s18 + $0x720] sm:$0xff] }
0x177d   :  { %6962 = vmatprep.subr.bf16.mxu1 %v6961_v8  ;;  %7090 = vmatprep.subr.bf16.mxu0 %v7089_v40  ;;  %v5474_v8 = vld [vmem:[%s10126_s18 + $0x6f8] sm:$0xff]  ;;  %v6979_v40 = vpack.c.bf16 %v5341_v2, %v5339_v59  ;;  %v7107_v22 = vpack.c.bf16 %v5469_v53, %v5467_v21  ;;  %v6981_v25 = vpack.c.bf16 %v5346_v7, %v5344_v43  ;;  %v5355_v12 = vld [vmem:[%s10126_s18 + $0x340] sm:$0xff]  ;;  %v5488_v2 = vld [vmem:[%s10126_s18 + $0x768] sm:$0xff] }
0x177e   :  { %v7109_v56 = vpack.c.bf16 %v5474_v8, %v5472_v38  ;;  %v5483_v61 = vld [vmem:[%s10126_s18 + $0x740] sm:$0xff]  ;;  %v5362_v59 = vld [vmem:[%s10126_s18 + $0x378] sm:$0xff]  ;;  %v5361_v43 = vld [vmem:[%s10126_s18 + $0x370] sm:$0xff] }
0x177f   :  { %v5359_v53 = vld [vmem:[%s10126_s18 + $0x360] sm:$0xff] }
0x1780   :  { %6964 = vmatpush1.bf16.msra.mxu1 %v6963_v19  ;;  %7092 = vmatpush1.bf16.msra.mxu0 %v7091_v9  ;;  %v5473_v19 = vld [vmem:[%s10126_s18 + $0x6f0] sm:$0xff]  ;;  %v5348_v9 = vld [vmem:[%s10126_s18 + $0x308] sm:$0xff]  ;;  %v5487_v8 = vld [vmem:[%s10126_s18 + $0x760] sm:$0xff] }
0x1781   :  { %6966 = vmatprep.subr.bf16.mxu1 %v6965_v31  ;;  %7094 = vmatprep.subr.bf16.mxu0 %v7093_v30  ;;  %v5478_v31 = vld [vmem:[%s10126_s18 + $0x718] sm:$0xff]  ;;  %v6983_v30 = vpack.c.bf16 %v5345_v14, %v5343_v5  ;;  %v7111_v50 = vpack.c.bf16 %v5473_v19, %v5471_v27  ;;  %v6985_v26 = vpack.c.bf16 %v5350_v60, %v5348_v9  ;;  %v5492_v14 = vld [vmem:[%s10126_s18 + $0x788] sm:$0xff]  ;;  %v5363_v19 = vld [vmem:[%s10126_s18 + $0x380] sm:$0xff] }
0x1782   :  { %v7113_v46 = vpack.c.bf16 %v5478_v31, %v5476_v52  ;;  %v5366_v5 = vld [vmem:[%s10126_s18 + $0x398] sm:$0xff]  ;;  %v5365_v9 = vld [vmem:[%s10126_s18 + $0x390] sm:$0xff]  ;;  %v5491_v31 = vld [vmem:[%s10126_s18 + $0x780] sm:$0xff] }
0x1784   :  { %6968 = vmatpush1.bf16.msra.mxu1 %v6967_v17  ;;  %7096 = vmatpush1.bf16.msra.mxu0 %v7095_v48  ;;  %v5477_v17 = vld [vmem:[%s10126_s18 + $0x710] sm:$0xff]  ;;  %v5352_v48 = vld [vmem:[%s10126_s18 + $0x328] sm:$0xff] }
0x1785   :  { %6970 = vmatprep.subr.bf16.mxu1 %v6969_v3  ;;  %7098 = vmatprep.subr.bf16.mxu0 %v7097_v51  ;;  %v5482_v3 = vld [vmem:[%s10126_s18 + $0x738] sm:$0xff]  ;;  %v6987_v51 = vpack.c.bf16 %v5349_v18, %v5347_v4  ;;  %v7115_v34 = vpack.c.bf16 %v5477_v17, %v5475_v39  ;;  %v6989_v1 = vpack.c.bf16 %v5354_v33, %v5352_v48  ;;  %v5496_v18 = vld [vmem:[%s10126_s18 + $0x7a8] sm:$0xff]  ;;  %v5367_v17 = vld [vmem:[%s10126_s18 + $0x3a0] sm:$0xff] }
0x1786   :  { %v7117_v44 = vpack.c.bf16 %v5482_v3, %v5480_v45  ;;  %v5370_v4 = vld [vmem:[%s10126_s18 + $0x3b8] sm:$0xff]  ;;  %v5369_v48 = vld [vmem:[%s10126_s18 + $0x3b0] sm:$0xff]  ;;  %v5495_v3 = vld [vmem:[%s10126_s18 + $0x7a0] sm:$0xff] }
0x1788   :  { %6972 = vmatpush1.bf16.msra.mxu1 %v6971_v23  ;;  %7100 = vmatpush1.bf16.msra.mxu0 %v7099_v24  ;;  %v5481_v23 = vld [vmem:[%s10126_s18 + $0x730] sm:$0xff]  ;;  %v5356_v24 = vld [vmem:[%s10126_s18 + $0x348] sm:$0xff] }
0x1789   :  { %6974 = vmatprep.subr.bf16.mxu1 %v6973_v35  ;;  %7102 = vmatprep.subr.bf16.mxu0 %v7101_v16  ;;  %v5486_v35 = vld [vmem:[%s10126_s18 + $0x758] sm:$0xff]  ;;  %v6991_v16 = vpack.c.bf16 %v5353_v15, %v5351_v28  ;;  %v7119_v36 = vpack.c.bf16 %v5481_v23, %v5479_v32  ;;  %v6993_v13 = vpack.c.bf16 %v5358_v11, %v5356_v24  ;;  %v5372_v15 = vld [vmem:[%s10126_s18 + $0x3c8] sm:$0xff]  ;;  %v5371_v11 = vld [vmem:[%s10126_s18 + $0x3c0] sm:$0xff] }
0x178a   :  { %v7121_v42 = vpack.c.bf16 %v5486_v35, %v5484_v37  ;;  %v5502_v32 = vld [vmem:[%s10126_s18 + $0x7d8] sm:$0xff]  ;;  %v7007_v23 = vpack.c.bf16 %v5369_v48, %v5367_v17  ;;  %v5373_v37 = vld [vmem:[%s10126_s18 + $0x3d0] sm:$0xff] }
0x178c   :  { %6976 = vmatpush1.bf16.msra.mxu1 %v6975_v63  ;;  %7104 = vmatpush1.bf16.msra.mxu0 %v7103_v47  ;;  %v5485_v63 = vld [vmem:[%s10126_s18 + $0x750] sm:$0xff]  ;;  %v5360_v47 = vld [vmem:[%s10126_s18 + $0x368] sm:$0xff] }
0x178d   :  { %6978 = vmatprep.subr.bf16.mxu1 %v6977_v49  ;;  %7106 = vmatprep.subr.bf16.mxu0 %v7105_v58  ;;  %v5490_v49 = vld [vmem:[%s10126_s18 + $0x778] sm:$0xff]  ;;  %v6995_v58 = vpack.c.bf16 %v5357_v62, %v5355_v12  ;;  %v7123_v21 = vpack.c.bf16 %v5485_v63, %v5483_v61  ;;  %v6997_v7 = vpack.c.bf16 %v5362_v59, %v5360_v47  ;;  %v5499_v12 = vld [vmem:[%s10126_s18 + $0x7c0] sm:$0xff]  ;;  %v5501_v62 = vld [vmem:[%s10126_s18 + $0x7d0] sm:$0xff] }
0x178e   :  { %v7125_v38 = vpack.c.bf16 %v5490_v49, %v5488_v2  ;;  %v5504_v61 = vld [vmem:[%s10126_s18 + $0x7e8] sm:$0xff]  ;;  %v5506_v63 = vld [vmem:[%s10126_s18 + $0x7f8] sm:$0xff]  ;;  %v7011_v47 = vpack.c.bf16 %v5373_v37, %v5371_v11  ;;  %v7139_v59 = vpack.c.bf16 %v5501_v62, %v5499_v12  ;;  %v5375_v2 = vld [vmem:[%s10126_s18 + $0x3e0] sm:$0xff] }
0x1790   :  { %6980 = vmatpush1.bf16.msra.mxu1 %v6979_v40  ;;  %7108 = vmatpush1.bf16.msra.mxu0 %v7107_v22  ;;  %v5489_v40 = vld [vmem:[%s10126_s18 + $0x770] sm:$0xff]  ;;  %v5364_v22 = vld [vmem:[%s10126_s18 + $0x388] sm:$0xff] }
0x1791   :  { %6982 = vmatprep.subr.bf16.mxu1 %v6981_v25  ;;  %7110 = vmatprep.subr.bf16.mxu0 %v7109_v56  ;;  %v5494_v25 = vld [vmem:[%s10126_s18 + $0x798] sm:$0xff]  ;;  %v6999_v56 = vpack.c.bf16 %v5361_v43, %v5359_v53  ;;  %v7127_v27 = vpack.c.bf16 %v5489_v40, %v5487_v8  ;;  %v7001_v60 = vpack.c.bf16 %v5366_v5, %v5364_v22  ;;  %v5377_v53 = vld [vmem:[%s10126_s18 + $0x3f0] sm:$0xff]  ;;  %v5503_v43 = vld [vmem:[%s10126_s18 + $0x7e0] sm:$0xff] }
0x1792   :  { %v7129_v52 = vpack.c.bf16 %v5494_v25, %v5492_v14  ;;  %v7015_v22 = vpack.c.bf16 %v5377_v53, %v5375_v2 }
0x1794   :  { %6984 = vmatpush1.bf16.msra.mxu1 %v6983_v30  ;;  %7112 = vmatpush1.bf16.msra.mxu0 %v7111_v50  ;;  %v5493_v30 = vld [vmem:[%s10126_s18 + $0x790] sm:$0xff]  ;;  %v5368_v50 = vld [vmem:[%s10126_s18 + $0x3a8] sm:$0xff] }
0x1795   :  { %6986 = vmatprep.subr.bf16.mxu1 %v6985_v26  ;;  %7114 = vmatprep.subr.bf16.mxu0 %v7113_v46  ;;  %v5498_v26 = vld [vmem:[%s10126_s18 + $0x7b8] sm:$0xff]  ;;  %v7003_v46 = vpack.c.bf16 %v5365_v9, %v5363_v19  ;;  %v7131_v39 = vpack.c.bf16 %v5493_v30, %v5491_v31  ;;  %v7005_v33 = vpack.c.bf16 %v5370_v4, %v5368_v50 }
0x1796   :  { %v7133_v45 = vpack.c.bf16 %v5498_v26, %v5496_v18 }
0x1798   :  { %6988 = vmatpush1.bf16.msra.mxu1 %v6987_v51  ;;  %7116 = vmatpush1.bf16.msra.mxu0 %v7115_v34  ;;  %v5497_v51 = vld [vmem:[%s10126_s18 + $0x7b0] sm:$0xff]  ;;  %v7549_v34 = vmov 269488144  }
0x1799   :  { %6990 = vmatprep.subr.bf16.mxu1 %v6989_v1  ;;  %7118 = vmatprep.subr.bf16.mxu0 %v7117_v44  ;;  %v88_v28 = vunpack.c.l.s4 %v7549_v34  ;;  %v5374_v1 = vld [vmem:[%s10126_s18 + $0x3d8] sm:$0xff]  ;;  %v5500_v44 = vld [vmem:[%s10126_s18 + $0x7c8] sm:$0xff]  ;;  %v7135_v24 = vpack.c.bf16 %v5497_v51, %v5495_v3 }
0x179b   :  { %v89_v35 = vunpack.c.0.s8 %v88_v28 }
0x179c   :  { %6992 = vmatpush1.bf16.msra.mxu1 %v6991_v16  ;;  %7120 = vmatpush1.bf16.msra.mxu0 %v7119_v36  ;;  %v7009_v16 = vpack.c.bf16 %v5374_v1, %v5372_v15  ;;  %v7137_v36 = vpack.c.bf16 %v5502_v32, %v5500_v44 }
0x179d   :  { %6994 = vmatprep.subr.bf16.mxu1 %v6993_v13  ;;  %7122 = vmatprep.subr.bf16.mxu0 %v7121_v42  ;;  %v5376_v13 = vld [vmem:[%s10126_s18 + $0x3e8] sm:$0xff]  ;;  %v5378_v42 = vld [vmem:[%s10126_s18 + $0x3f8] sm:$0xff]  ;;  %v92_v49 = vsub.s32 %v89_v35, %v7837_v54  ;;  %v7335_v54 = vunpack.i.h.bf16 %v9730_v41 }
0x17a0   :  { %6996 = vmatpush1.bf16.msra.mxu1 %v6995_v58  ;;  %7124 = vmatpush1.bf16.msra.mxu0 %v7123_v21  ;;  %v7013_v58 = vpack.c.bf16 %v5378_v42, %v5376_v13  ;;  %v7141_v21 = vpack.c.bf16 %v5506_v63, %v5504_v61 }
0x17a1   :  { %6998 = vmatprep.subr.bf16.mxu1 %v6997_v7  ;;  %7126 = vmatprep.subr.bf16.mxu0 %v7125_v38  ;;  %v5505_v7 = vld [vmem:[%s10126_s18 + $0x7f0] sm:$0xff]  ;;  %v7340_v38 = vunpack.i.h.bf16 %v9713_v6 }
0x17a2   :  { %v7143_v5 = vpack.c.bf16 %v5505_v7, %v5503_v43 }
0x17a3   :  { %v5225_v25 = vsel %vm347_vm7, %v9685_v10, %v7340_v38 }
0x17a4   :  { %7000 = vmatpush1.bf16.msra.mxu1 %v6999_v56  ;;  %7128 = vmatpush1.bf16.msra.mxu0 %v7127_v27  ;;  %v5192_v56 = vsel %vm347_vm7, %v9673_v29, %v7335_v54  ;;  %v5246_v6 = vrot.slane %v5225_v25, 4 }
0x17a5   :  { %7002 = vmatprep.subr.bf16.mxu1 %v7001_v60  ;;  %7130 = vmatprep.subr.bf16.mxu0 %v7129_v52  ;;  %v5237_v41 = vrot.slane %v5192_v56, 4 }
0x17a8   :  { %7004 = vmatpush1.bf16.msra.mxu1 %v7003_v46  ;;  %7132 = vmatpush1.bf16.msra.mxu0 %v7131_v39 }
0x17a9   :  { %7006 = vmatprep.subr.bf16.mxu1 %v7005_v33  ;;  %7134 = vmatprep.subr.bf16.mxu0 %v7133_v45 }
0x17ac   :  { %7008 = vmatpush1.bf16.msra.mxu1 %v7007_v23  ;;  %7136 = vmatpush1.bf16.msra.mxu0 %v7135_v24 }
0x17ad   :  { %7010 = vmatprep.subr.bf16.mxu1 %v7009_v16  ;;  %7138 = vmatprep.subr.bf16.mxu0 %v7137_v36 }
0x17ae   :  { %v84_v8 = vpop.xlane.xlu0 %83 }
0x17af   :  { %v85_v40 = vmul.f32 0.00390625, %v84_v8 }
0x17b0   :  { %7012 = vmatpush1.bf16.msra.mxu1 %v7011_v47  ;;  %7140 = vmatpush1.bf16.msra.mxu0 %v7139_v59 }
0x17b1   :  { %v93_v14 = vrot.slane %v85_v40, %v92_v49  ;;  %7014 = vmatprep.subr.bf16.mxu1 %v7013_v58  ;;  %7142 = vmatprep.subr.bf16.mxu0 %v7141_v21 }
0x17b3   :  { %v95_v27 = vsub.f32 %v9695_v0, %v93_v14 }
0x17b4   :  { %7016 = vmatpush1.bf16.msra.mxu1 %v7015_v22  ;;  %7144 = vmatpush1.bf16.msra.mxu0 %v7143_v5 }
0x17b5   :  { %v96_v19 = vmul.f32 %v95_v27, %v95_v27 }
0x17b7   :  { %5655 = vmatmul.mubr.f32.vlgmr.msra.gmra.mrb[54].mxu1 %v5237_v41  ;;  %5797 = vmatmul.mubr.f32.vlgmr.msra.gmra.mrb[70].mxu0 %v5246_v6  ;;  %v104_v9 = vrot.slane %v96_v19, %v9690_v20  ;;  %v5507_v20 = vld [vmem:[%s10129_s19] sm:$0x3] }
0x17b8   :  { %v5512_v18 = vrot.slane %v5507_v20, %v7840_v55  ;;  %v5516_v26 = vrot.slane %v5507_v20, %v7847_v57 }
0x17b9   :  { %v105_v60 = vcombine.high %v104_v9, %v104_v9  ;;  %v108_v52 = vsel %vm79_vm1, %v104_v9, 0.0 }
0x17bb   :  { %v109_v31 = vsel %vm79_vm1, %v105_v60, 0.0 }
0x17bc   :  { %v110_v10 = vadd.f32 %v109_v31, %v108_v52 }
0x17be   :  { %111 = vadd.xlane.f32.xlu1 %v110_v10 }
0x184b   :  { %v112_v30 = vpop.xlane.xlu1 %111 }
0x184c   :  { %v113_v29 = vmul.f32 0.003921569, %v112_v30 }
0x184e   :  { %7537 = vrsqrt.f32 %v113_v29 }
0x1858   :  { %v7538_v0 = vpop.eup %7537 }
0x1859   :  { %v122_v50 = vrot.slane %v7538_v0, %v92_v49 }
0x185b   :  { %v124_v4 = vmul.f32 %v122_v50, %v95_v27 }
0x185d   :  { %125 = vst [vmem:[%s10128_s21] sm:$0xf] %v124_v4 }
0x188a   :  { %v5656_v46 = vpop.f32.mrb[54].mxu1  ;;  %v5798_v39 = vpop.f32.mrb[70].mxu0 }
0x188b   :  { %v7145_v17 = vadd.f32 %v5656_v46, %v5512_v18  ;;  %v5658_v48 = vpop.f32.mrb[55].mxu1  ;;  %v5800_v33 = vpop.f32.mrb[71].mxu0 }
0x188c   :  { %v7147_v45 = vadd.f32 %v5658_v48, %v5516_v26 }
0x188d   :  { %v7146_v3 = vadd.f32 %v7145_v17, %v5798_v39 }
0x188e   :  { %v7148_v51 = vadd.f32 %v7147_v45, %v5800_v33 }
0x1890   :  { %v5805_v34 = vcombine.low %v7146_v3, %v7148_v51 }
0x1892   :  { %6040 = vst.sshfl [vmem:[%s10130_s20] sm:$0x33 pattern:$0x76325410] %v5805_v34 }

</bundles_post_ra>
